<compile_context>
chip_gen: v7x
topology: tpu7x:2x2x1
jax: 0.10.0
libtpu: 0.0.40
codegen_flags: <defaults>
</compile_context>

<pallas_src>
import functools

import jax
import jax.numpy as jnp
from jax.experimental import pallas as pl

# ------------------------------ static dims -------------------------------- #
FEAT = 40          # input mel features
D_REAL = 240       # real d_model
D_PAD = 256        # padded d_model (lane-dense)
H = 4              # heads
DH_REAL = 60       # real head dim
DH_PAD = 64        # padded head dim
FF = 256           # dim_feedforward
N_SPK = 600        # real number of speakers
N_SPK_PAD = 640    # padded (5*128) logits width


# ------------------------------ fused kernel ------------------------------- #

def _classifier1_kernel(mels_ref, wpre_ref, bpre_ref,
                        wq_ref, bq_ref, wk_ref, bk_ref, wv_ref, bv_ref,
                        wo_ref, bo_ref, ln1g_ref, ln1b_ref,
                        wff1_ref, bff1_ref, wff2_ref, bff2_ref,
                        ln2g_ref, ln2b_ref,
                        wp1_ref, bp1_ref, wp2_ref, bp2_ref,
                        out_ref, *, batch, length, n_heads, d_real, eps):
    M = batch * length
    D = wpre_ref.shape[1]                      # D_PAD

    # validity mask over the padded feature axis (cols >= d_real are zero padding)
    feat_mask = (jax.lax.broadcasted_iota(jnp.int32, (1, D), 1) < d_real
                 ).astype(jnp.float32)
    inv_d = 1.0 / float(d_real)

    def layer_norm(x, g, b):
        # x has zeros in the padded columns, so sums over D equal sums over d_real.
        mean = jnp.sum(x, axis=-1, keepdims=True) * inv_d
        xc = (x - mean) * feat_mask            # padded cols forced back to 0
        var = jnp.sum(xc * xc, axis=-1, keepdims=True) * inv_d
        return xc * jax.lax.rsqrt(var + eps) * g + b   # padded g/b are 0 -> pads stay 0

    # prenet: (M, 40) @ (40, 256)
    x = jnp.dot(mels_ref[...], wpre_ref[...],
                preferred_element_type=jnp.float32) + bpre_ref[...]

    # --- multi-head self-attention (heads statically unrolled, all in VMEM) ---
    # Wq/bq already carry the 1/sqrt(head_dim) scale (folded at pack time).
    attn = jnp.zeros((M, D), jnp.float32)
    for h in range(n_heads):
        q = jnp.dot(x, wq_ref[h], preferred_element_type=jnp.float32) + bq_ref[h]
        k = jnp.dot(x, wk_ref[h], preferred_element_type=jnp.float32) + bk_ref[h]
        v = jnp.dot(x, wv_ref[h], preferred_element_type=jnp.float32) + bv_ref[h]
        qb = q.reshape(batch, length, DH_PAD)
        kb = k.reshape(batch, length, DH_PAD)
        vb = v.reshape(batch, length, DH_PAD)

        # scores: contract head dims directly (no explicit transpose) -> (B, L, L)
        s = jax.lax.dot_general(qb, kb, (((2,), (2,)), ((0,), (0,))),
                                preferred_element_type=jnp.float32)
        s = s - jnp.max(s, axis=-1, keepdims=True)
        p = jnp.exp(s)
        p = p * pl.reciprocal(jnp.sum(p, axis=-1, keepdims=True), approx=True)

        # context: (B, L, L) x (B, L, dh) -> (B, L, dh)
        ctx = jax.lax.dot_general(p, vb, (((2,), (1,)), ((0,), (0,))),
                                  preferred_element_type=jnp.float32)
        # per-head slice of the output projection, accumulated
        attn = attn + jnp.dot(ctx.reshape(M, DH_PAD), wo_ref[h],
                              preferred_element_type=jnp.float32)
    attn = attn + bo_ref[...]

    # residual + LayerNorm1 (post-norm encoder layer)
    x = layer_norm(x + attn, ln1g_ref[...], ln1b_ref[...])

    # feed-forward (relu) + residual + LayerNorm2
    hid = jnp.dot(x, wff1_ref[...], preferred_element_type=jnp.float32) + bff1_ref[...]
    hid = jnp.maximum(hid, 0.0)
    ffn = jnp.dot(hid, wff2_ref[...], preferred_element_type=jnp.float32) + bff2_ref[...]
    x = layer_norm(x + ffn, ln2g_ref[...], ln2b_ref[...])

    # mean pooling over the length axis -> (B, D)
    stats = jnp.mean(x.reshape(batch, length, D), axis=1)

    # pred head: Linear -> Sigmoid -> Linear
    # (padded cols of h1 are sigmoid(0)=0.5 but multiply zero rows of w_p2 -> harmless)
    h1 = jax.nn.sigmoid(
        jnp.dot(stats, wp1_ref[...], preferred_element_type=jnp.float32) + bp1_ref[...])
    out_ref[...] = jnp.dot(h1, wp2_ref[...],
                           preferred_element_type=jnp.float32) + bp2_ref[...]


# ------------------------- parameters & packing ----------------------------- #

def init_params(key, d_model=D_REAL, n_spks=N_SPK, d_ff=FF):
    """Synthetic parameters at the true (unpadded) PyTorch shapes."""
    def lin(k, fan_in, fan_out, scale=0.05):
        kw, kb = jax.random.split(k)
        w = jax.random.normal(kw, (fan_in, fan_out), jnp.float32) * scale
        b = jax.random.normal(kb, (fan_out,), jnp.float32) * scale
        return w, b

    keys = jax.random.split(key, 9)
    p = {}
    p["prenet_w"], p["prenet_b"] = lin(keys[0], FEAT, d_model)
    p["wq"], p["bq"] = lin(keys[1], d_model, d_model)
    p["wk"], p["bk"] = lin(keys[2], d_model, d_model)
    p["wv"], p["bv"] = lin(keys[3], d_model, d_model)
    p["wo"], p["bo"] = lin(keys[4], d_model, d_model)
    p["ln1_g"] = jnp.ones((d_model,), jnp.float32)
    p["ln1_b"] = jnp.zeros((d_model,), jnp.float32)
    p["ff1_w"], p["ff1_b"] = lin(keys[5], d_model, d_ff)
    p["ff2_w"], p["ff2_b"] = lin(keys[6], d_ff, d_model)
    p["ln2_g"] = jnp.ones((d_model,), jnp.float32)
    p["ln2_b"] = jnp.zeros((d_model,), jnp.float32)
    p["pred1_w"], p["pred1_b"] = lin(keys[7], d_model, d_model)
    p["pred2_w"], p["pred2_b"] = lin(keys[8], d_model, n_spks)
    return p


def _pad_to(x, shape):
    return jnp.pad(x, [(0, t - s) for s, t in zip(x.shape, shape)])


def pack_params(p, dh_real=DH_REAL):
    """Zero-pad to lane-dense shapes, stack attention weights per head, and fold the
    attention scale 1/sqrt(head_dim) into Wq/bq."""
    pk = {}
    pk["w_pre"] = _pad_to(p["prenet_w"], (FEAT, D_PAD))
    pk["b_pre"] = _pad_to(p["prenet_b"], (D_PAD,)).reshape(1, D_PAD)

    def pack_proj(w, b, scale=1.0):
        # output-dim head split: head h owns columns [h*60, (h+1)*60)
        w = (w * scale).reshape(D_REAL, H, DH_REAL)
        w = jnp.pad(w, ((0, D_PAD - D_REAL), (0, 0), (0, DH_PAD - DH_REAL)))
        w = w.transpose(1, 0, 2)                                   # (H, D_PAD, DH_PAD)
        b = jnp.pad((b * scale).reshape(H, DH_REAL), ((0, 0), (0, DH_PAD - DH_REAL)))
        return w, b.reshape(H, 1, DH_PAD)

    q_scale = 1.0 / (float(dh_real) ** 0.5)
    pk["wq"], pk["bq"] = pack_proj(p["wq"], p["bq"], scale=q_scale)
    pk["wk"], pk["bk"] = pack_proj(p["wk"], p["bk"])
    pk["wv"], pk["bv"] = pack_proj(p["wv"], p["bv"])

    wo = p["wo"].reshape(H, DH_REAL, D_REAL)                       # input-dim head split
    pk["wo"] = jnp.pad(wo, ((0, 0), (0, DH_PAD - DH_REAL), (0, D_PAD - D_REAL)))
    pk["bo"] = _pad_to(p["bo"], (D_PAD,)).reshape(1, D_PAD)

    pk["ln1_g"] = _pad_to(p["ln1_g"], (D_PAD,)).reshape(1, D_PAD)
    pk["ln1_b"] = _pad_to(p["ln1_b"], (D_PAD,)).reshape(1, D_PAD)
    pk["w_ff1"] = _pad_to(p["ff1_w"], (D_PAD, FF))
    pk["b_ff1"] = p["ff1_b"].reshape(1, FF)
    pk["w_ff2"] = _pad_to(p["ff2_w"], (FF, D_PAD))
    pk["b_ff2"] = _pad_to(p["ff2_b"], (D_PAD,)).reshape(1, D_PAD)
    pk["ln2_g"] = _pad_to(p["ln2_g"], (D_PAD,)).reshape(1, D_PAD)
    pk["ln2_b"] = _pad_to(p["ln2_b"], (D_PAD,)).reshape(1, D_PAD)
    pk["w_p1"] = _pad_to(p["pred1_w"], (D_PAD, D_PAD))
    pk["b_p1"] = _pad_to(p["pred1_b"], (D_PAD,)).reshape(1, D_PAD)
    pk["w_p2"] = _pad_to(p["pred2_w"], (D_PAD, N_SPK_PAD))
    pk["b_p2"] = _pad_to(p["pred2_b"], (N_SPK_PAD,)).reshape(1, N_SPK_PAD)
    return pk


# ------------------------------- forward ------------------------------------ #

def classifier1_forward(mels, pk, *, batch, length, n_heads=H,
                        d_real=D_REAL, n_spks=N_SPK, eps=1e-5):
    """mels: (B, L, 40), pk: packed/padded params -> logits (B, n_spks)."""
    M = batch * length
    kernel = functools.partial(
        _classifier1_kernel, batch=batch, length=length, n_heads=n_heads,
        d_real=d_real, eps=eps)
    logits_pad = pl.pallas_call(
        kernel,
        out_shape=jax.ShapeDtypeStruct((batch, N_SPK_PAD), jnp.float32),
    )(mels.reshape(M, FEAT),
      pk["w_pre"], pk["b_pre"],
      pk["wq"], pk["bq"], pk["wk"], pk["bk"], pk["wv"], pk["bv"],
      pk["wo"], pk["bo"], pk["ln1_g"], pk["ln1_b"],
      pk["w_ff1"], pk["b_ff1"], pk["w_ff2"], pk["b_ff2"],
      pk["ln2_g"], pk["ln2_b"],
      pk["w_p1"], pk["b_p1"], pk["w_p2"], pk["b_p2"])
    return logits_pad[:, :n_spks]


# --------------------------- plain-JAX reference ----------------------------- #

def classifier1_reference(mels, p, n_heads=H):
    B, L, feat = mels.shape
    D = p["prenet_w"].shape[1]
    dh = D // n_heads
    x = mels.reshape(B * L, feat) @ p["prenet_w"] + p["prenet_b"]

    def ln(v, g, b):
        m = jnp.mean(v, axis=-1, keepdims=True)
        var = jnp.mean((v - m) ** 2, axis=-1, keepdims=True)
        return (v - m) / jnp.sqrt(var + 1e-5) * g + b

    q = (x @ p["wq"] + p["bq"]).reshape(B, L, n_heads, dh).transpose(0, 2, 1, 3)
    k = (x @ p["wk"] + p["bk"]).reshape(B, L, n_heads, dh).transpose(0, 2, 1, 3)
    v = (x @ p["wv"] + p["bv"]).reshape(B, L, n_heads, dh).transpose(0, 2, 1, 3)
    s = jnp.einsum("bhqd,bhkd->bhqk", q, k) / jnp.sqrt(float(dh))
    a = jax.nn.softmax(s, axis=-1)
    ctx = jnp.einsum("bhqk,bhkd->bhqd", a, v)
    ctx = ctx.transpose(0, 2, 1, 3).reshape(B * L, D)
    x = ln(x + ctx @ p["wo"] + p["bo"], p["ln1_g"], p["ln1_b"])
    hid = jnp.maximum(x @ p["ff1_w"] + p["ff1_b"], 0.0)
    x = ln(x + hid @ p["ff2_w"] + p["ff2_b"], p["ln2_g"], p["ln2_b"])
    stats = jnp.mean(x.reshape(B, L, D), axis=1)
    h1 = jax.nn.sigmoid(stats @ p["pred1_w"] + p["pred1_b"])
    return h1 @ p["pred2_w"] + p["pred2_b"]


if __name__ == "__main__":
    key = jax.random.PRNGKey(0)
    kx, kp = jax.random.split(key)
    B, L = 2, 8
    mels = jax.random.normal(kx, (B, L, FEAT), jnp.float32)
    params = init_params(kp)
    packed = pack_params(params)

    fwd = jax.jit(functools.partial(classifier1_forward, batch=B, length=L))
    out = jax.block_until_ready(fwd(mels, packed))
    assert out.shape == (B, N_SPK) and out.dtype == jnp.float32

    ref = classifier1_reference(mels, params)
    assert bool(jnp.allclose(out, ref, atol=5e-2, rtol=5e-2))
    print("KERNEL_OK")
</pallas_src>

<mosaic_0001>
module attributes {stable_mosaic.version = 11 : i64} {
  func.func @_classifier1_kernel(%arg0: memref<16x40xf32, #tpu.memory_space<vmem>>, %arg1: memref<40x256xf32, #tpu.memory_space<vmem>>, %arg2: memref<1x256xf32, #tpu.memory_space<vmem>>, %arg3: memref<4x256x64xf32, #tpu.memory_space<vmem>>, %arg4: memref<4x1x64xf32, #tpu.memory_space<vmem>>, %arg5: memref<4x256x64xf32, #tpu.memory_space<vmem>>, %arg6: memref<4x1x64xf32, #tpu.memory_space<vmem>>, %arg7: memref<4x256x64xf32, #tpu.memory_space<vmem>>, %arg8: memref<4x1x64xf32, #tpu.memory_space<vmem>>, %arg9: memref<4x64x256xf32, #tpu.memory_space<vmem>>, %arg10: memref<1x256xf32, #tpu.memory_space<vmem>>, %arg11: memref<1x256xf32, #tpu.memory_space<vmem>>, %arg12: memref<1x256xf32, #tpu.memory_space<vmem>>, %arg13: memref<256x256xf32, #tpu.memory_space<vmem>>, %arg14: memref<1x256xf32, #tpu.memory_space<vmem>>, %arg15: memref<256x256xf32, #tpu.memory_space<vmem>>, %arg16: memref<1x256xf32, #tpu.memory_space<vmem>>, %arg17: memref<1x256xf32, #tpu.memory_space<vmem>>, %arg18: memref<1x256xf32, #tpu.memory_space<vmem>>, %arg19: memref<256x256xf32, #tpu.memory_space<vmem>>, %arg20: memref<1x256xf32, #tpu.memory_space<vmem>>, %arg21: memref<256x640xf32, #tpu.memory_space<vmem>>, %arg22: memref<1x640xf32, #tpu.memory_space<vmem>>, %arg23: memref<2x640xf32, #tpu.memory_space<vmem>>) attributes {dimension_semantics = [], scalar_prefetch = 0 : i64, scratch_operands = 0 : i64, tpu.core_type = #tpu.core_type<tc>} {
    %0 = tpu.iota {dimensions = array<i32: 1>} : vector<1x256xi32>
    %c240_i32 = arith.constant 240 : i32
    %1 = vector.broadcast %c240_i32 : i32 to vector<1x256xi32>
    %2 = arith.cmpi slt, %0, %1 : vector<1x256xi32>
    %3 = arith.extui %2 : vector<1x256xi1> to vector<1x256xi32>
    %4 = arith.sitofp %3 : vector<1x256xi32> to vector<1x256xf32>
    %c0 = arith.constant 0 : index
    %c0_0 = arith.constant 0 : index
    %5 = vector.load %arg0[%c0, %c0_0] : memref<16x40xf32, #tpu.memory_space<vmem>>, vector<16x40xf32>
    %c0_1 = arith.constant 0 : index
    %c0_2 = arith.constant 0 : index
    %6 = vector.load %arg1[%c0_1, %c0_2] : memref<40x256xf32, #tpu.memory_space<vmem>>, vector<40x256xf32>
    %cst = arith.constant dense<0.000000e+00> : vector<16x256xf32>
    %7 = tpu.matmul %5, %6, %cst {dimension_numbers = #tpu.dot_dimension_numbers<[1], [0], [0], [1], [0, 0, 1, 1], [], []>} : vector<16x40xf32>, vector<40x256xf32>, vector<16x256xf32> -> vector<16x256xf32>
    %c0_3 = arith.constant 0 : index
    %c0_4 = arith.constant 0 : index
    %8 = vector.load %arg2[%c0_3, %c0_4] : memref<1x256xf32, #tpu.memory_space<vmem>>, vector<1x256xf32>
    %9 = vector.broadcast %8 : vector<1x256xf32> to vector<16x256xf32>
    %10 = arith.addf %7, %9 : vector<16x256xf32>
    %cst_5 = arith.constant 0.000000e+00 : f32
    %11 = vector.broadcast %cst_5 : f32 to vector<16x256xf32>
    %c0_6 = arith.constant 0 : index
    %c0_7 = arith.constant 0 : index
    %c0_8 = arith.constant 0 : index
    %12 = vector.load %arg3[%c0_6, %c0_7, %c0_8] : memref<4x256x64xf32, #tpu.memory_space<vmem>>, vector<1x256x64xf32>
    %13 = vector.shape_cast %12 : vector<1x256x64xf32> to vector<256x64xf32>
    %cst_9 = arith.constant dense<0.000000e+00> : vector<16x64xf32>
    %14 = tpu.matmul %10, %13, %cst_9 {dimension_numbers = #tpu.dot_dimension_numbers<[1], [0], [0], [1], [0, 0, 1, 1], [], []>} : vector<16x256xf32>, vector<256x64xf32>, vector<16x64xf32> -> vector<16x64xf32>
    %c0_10 = arith.constant 0 : index
    %c0_11 = arith.constant 0 : index
    %c0_12 = arith.constant 0 : index
    %15 = vector.load %arg4[%c0_10, %c0_11, %c0_12] : memref<4x1x64xf32, #tpu.memory_space<vmem>>, vector<1x1x64xf32>
    %16 = vector.shape_cast %15 : vector<1x1x64xf32> to vector<1x64xf32>
    %17 = vector.broadcast %16 : vector<1x64xf32> to vector<16x64xf32>
    %18 = arith.addf %14, %17 : vector<16x64xf32>
    %c0_13 = arith.constant 0 : index
    %c0_14 = arith.constant 0 : index
    %c0_15 = arith.constant 0 : index
    %19 = vector.load %arg5[%c0_13, %c0_14, %c0_15] : memref<4x256x64xf32, #tpu.memory_space<vmem>>, vector<1x256x64xf32>
    %20 = vector.shape_cast %19 : vector<1x256x64xf32> to vector<256x64xf32>
    %cst_16 = arith.constant dense<0.000000e+00> : vector<16x64xf32>
    %21 = tpu.matmul %10, %20, %cst_16 {dimension_numbers = #tpu.dot_dimension_numbers<[1], [0], [0], [1], [0, 0, 1, 1], [], []>} : vector<16x256xf32>, vector<256x64xf32>, vector<16x64xf32> -> vector<16x64xf32>
    %c0_17 = arith.constant 0 : index
    %c0_18 = arith.constant 0 : index
    %c0_19 = arith.constant 0 : index
    %22 = vector.load %arg6[%c0_17, %c0_18, %c0_19] : memref<4x1x64xf32, #tpu.memory_space<vmem>>, vector<1x1x64xf32>
    %23 = vector.shape_cast %22 : vector<1x1x64xf32> to vector<1x64xf32>
    %24 = vector.broadcast %23 : vector<1x64xf32> to vector<16x64xf32>
    %25 = arith.addf %21, %24 : vector<16x64xf32>
    %c0_20 = arith.constant 0 : index
    %c0_21 = arith.constant 0 : index
    %c0_22 = arith.constant 0 : index
    %26 = vector.load %arg7[%c0_20, %c0_21, %c0_22] : memref<4x256x64xf32, #tpu.memory_space<vmem>>, vector<1x256x64xf32>
    %27 = vector.shape_cast %26 : vector<1x256x64xf32> to vector<256x64xf32>
    %cst_23 = arith.constant dense<0.000000e+00> : vector<16x64xf32>
    %28 = tpu.matmul %10, %27, %cst_23 {dimension_numbers = #tpu.dot_dimension_numbers<[1], [0], [0], [1], [0, 0, 1, 1], [], []>} : vector<16x256xf32>, vector<256x64xf32>, vector<16x64xf32> -> vector<16x64xf32>
    %c0_24 = arith.constant 0 : index
    %c0_25 = arith.constant 0 : index
    %c0_26 = arith.constant 0 : index
    %29 = vector.load %arg8[%c0_24, %c0_25, %c0_26] : memref<4x1x64xf32, #tpu.memory_space<vmem>>, vector<1x1x64xf32>
    %30 = vector.shape_cast %29 : vector<1x1x64xf32> to vector<1x64xf32>
    %31 = vector.broadcast %30 : vector<1x64xf32> to vector<16x64xf32>
    %32 = arith.addf %28, %31 : vector<16x64xf32>
    %33 = vector.shape_cast %18 : vector<16x64xf32> to vector<2x8x64xf32>
    %34 = vector.shape_cast %25 : vector<16x64xf32> to vector<2x8x64xf32>
    %35 = vector.shape_cast %32 : vector<16x64xf32> to vector<2x8x64xf32>
    %cst_27 = arith.constant dense<0.000000e+00> : vector<2x8x8xf32>
    %36 = tpu.matmul %33, %34, %cst_27 {dimension_numbers = #tpu.dot_dimension_numbers<[2], [2], [1], [1], [0, 0, 0, 1, 1, 1], [0], [0]>} : vector<2x8x64xf32>, vector<2x8x64xf32>, vector<2x8x8xf32> -> vector<2x8x8xf32>
    %cst_28 = arith.constant dense<0xFF800000> : vector<2x8xf32>
    %37 = vector.multi_reduction <maximumf>, %36, %cst_28 [2] : vector<2x8x8xf32> to vector<2x8xf32>
    %38 = vector.shape_cast %37 : vector<2x8xf32> to vector<2x8x1xf32>
    %39 = vector.broadcast %38 : vector<2x8x1xf32> to vector<2x8x8xf32>
    %40 = arith.subf %36, %39 : vector<2x8x8xf32>
    %41 = math.exp %40 : vector<2x8x8xf32>
    %cst_29 = arith.constant dense<0.000000e+00> : vector<2x8xf32>
    %42 = vector.multi_reduction <add>, %41, %cst_29 [2] : vector<2x8x8xf32> to vector<2x8xf32>
    %43 = vector.shape_cast %42 : vector<2x8xf32> to vector<2x8x1xf32>
    %44 = tpu.reciprocal %43 {approx = true} : vector<2x8x1xf32> -> vector<2x8x1xf32>
    %45 = vector.broadcast %44 : vector<2x8x1xf32> to vector<2x8x8xf32>
    %46 = arith.mulf %41, %45 : vector<2x8x8xf32>
    %cst_30 = arith.constant dense<0.000000e+00> : vector<2x8x64xf32>
    %47 = tpu.matmul %46, %35, %cst_30 {dimension_numbers = #tpu.dot_dimension_numbers<[2], [1], [1], [2], [0, 0, 0, 1, 1, 2], [0], [0]>} : vector<2x8x8xf32>, vector<2x8x64xf32>, vector<2x8x64xf32> -> vector<2x8x64xf32>
    %48 = vector.shape_cast %47 : vector<2x8x64xf32> to vector<16x64xf32>
    %c0_31 = arith.constant 0 : index
    %c0_32 = arith.constant 0 : index
    %c0_33 = arith.constant 0 : index
    %49 = vector.load %arg9[%c0_31, %c0_32, %c0_33] : memref<4x64x256xf32, #tpu.memory_space<vmem>>, vector<1x64x256xf32>
    %50 = vector.shape_cast %49 : vector<1x64x256xf32> to vector<64x256xf32>
    %cst_34 = arith.constant dense<0.000000e+00> : vector<16x256xf32>
    %51 = tpu.matmul %48, %50, %cst_34 {dimension_numbers = #tpu.dot_dimension_numbers<[1], [0], [0], [1], [0, 0, 1, 1], [], []>} : vector<16x64xf32>, vector<64x256xf32>, vector<16x256xf32> -> vector<16x256xf32>
    %52 = arith.addf %11, %51 : vector<16x256xf32>
    %c1 = arith.constant 1 : index
    %c0_35 = arith.constant 0 : index
    %c0_36 = arith.constant 0 : index
    %53 = vector.load %arg3[%c1, %c0_35, %c0_36] : memref<4x256x64xf32, #tpu.memory_space<vmem>>, vector<1x256x64xf32>
    %54 = vector.shape_cast %53 : vector<1x256x64xf32> to vector<256x64xf32>
    %cst_37 = arith.constant dense<0.000000e+00> : vector<16x64xf32>
    %55 = tpu.matmul %10, %54, %cst_37 {dimension_numbers = #tpu.dot_dimension_numbers<[1], [0], [0], [1], [0, 0, 1, 1], [], []>} : vector<16x256xf32>, vector<256x64xf32>, vector<16x64xf32> -> vector<16x64xf32>
    %c1_38 = arith.constant 1 : index
    %c0_39 = arith.constant 0 : index
    %c0_40 = arith.constant 0 : index
    %56 = vector.load %arg4[%c1_38, %c0_39, %c0_40] : memref<4x1x64xf32, #tpu.memory_space<vmem>>, vector<1x1x64xf32>
    %57 = vector.shape_cast %56 : vector<1x1x64xf32> to vector<1x64xf32>
    %58 = vector.broadcast %57 : vector<1x64xf32> to vector<16x64xf32>
    %59 = arith.addf %55, %58 : vector<16x64xf32>
    %c1_41 = arith.constant 1 : index
    %c0_42 = arith.constant 0 : index
    %c0_43 = arith.constant 0 : index
    %60 = vector.load %arg5[%c1_41, %c0_42, %c0_43] : memref<4x256x64xf32, #tpu.memory_space<vmem>>, vector<1x256x64xf32>
    %61 = vector.shape_cast %60 : vector<1x256x64xf32> to vector<256x64xf32>
    %cst_44 = arith.constant dense<0.000000e+00> : vector<16x64xf32>
    %62 = tpu.matmul %10, %61, %cst_44 {dimension_numbers = #tpu.dot_dimension_numbers<[1], [0], [0], [1], [0, 0, 1, 1], [], []>} : vector<16x256xf32>, vector<256x64xf32>, vector<16x64xf32> -> vector<16x64xf32>
    %c1_45 = arith.constant 1 : index
    %c0_46 = arith.constant 0 : index
    %c0_47 = arith.constant 0 : index
    %63 = vector.load %arg6[%c1_45, %c0_46, %c0_47] : memref<4x1x64xf32, #tpu.memory_space<vmem>>, vector<1x1x64xf32>
    %64 = vector.shape_cast %63 : vector<1x1x64xf32> to vector<1x64xf32>
    %65 = vector.broadcast %64 : vector<1x64xf32> to vector<16x64xf32>
    %66 = arith.addf %62, %65 : vector<16x64xf32>
    %c1_48 = arith.constant 1 : index
    %c0_49 = arith.constant 0 : index
    %c0_50 = arith.constant 0 : index
    %67 = vector.load %arg7[%c1_48, %c0_49, %c0_50] : memref<4x256x64xf32, #tpu.memory_space<vmem>>, vector<1x256x64xf32>
    %68 = vector.shape_cast %67 : vector<1x256x64xf32> to vector<256x64xf32>
    %cst_51 = arith.constant dense<0.000000e+00> : vector<16x64xf32>
    %69 = tpu.matmul %10, %68, %cst_51 {dimension_numbers = #tpu.dot_dimension_numbers<[1], [0], [0], [1], [0, 0, 1, 1], [], []>} : vector<16x256xf32>, vector<256x64xf32>, vector<16x64xf32> -> vector<16x64xf32>
    %c1_52 = arith.constant 1 : index
    %c0_53 = arith.constant 0 : index
    %c0_54 = arith.constant 0 : index
    %70 = vector.load %arg8[%c1_52, %c0_53, %c0_54] : memref<4x1x64xf32, #tpu.memory_space<vmem>>, vector<1x1x64xf32>
    %71 = vector.shape_cast %70 : vector<1x1x64xf32> to vector<1x64xf32>
    %72 = vector.broadcast %71 : vector<1x64xf32> to vector<16x64xf32>
    %73 = arith.addf %69, %72 : vector<16x64xf32>
    %74 = vector.shape_cast %59 : vector<16x64xf32> to vector<2x8x64xf32>
    %75 = vector.shape_cast %66 : vector<16x64xf32> to vector<2x8x64xf32>
    %76 = vector.shape_cast %73 : vector<16x64xf32> to vector<2x8x64xf32>
    %cst_55 = arith.constant dense<0.000000e+00> : vector<2x8x8xf32>
    %77 = tpu.matmul %74, %75, %cst_55 {dimension_numbers = #tpu.dot_dimension_numbers<[2], [2], [1], [1], [0, 0, 0, 1, 1, 1], [0], [0]>} : vector<2x8x64xf32>, vector<2x8x64xf32>, vector<2x8x8xf32> -> vector<2x8x8xf32>
    %cst_56 = arith.constant dense<0xFF800000> : vector<2x8xf32>
    %78 = vector.multi_reduction <maximumf>, %77, %cst_56 [2] : vector<2x8x8xf32> to vector<2x8xf32>
    %79 = vector.shape_cast %78 : vector<2x8xf32> to vector<2x8x1xf32>
    %80 = vector.broadcast %79 : vector<2x8x1xf32> to vector<2x8x8xf32>
    %81 = arith.subf %77, %80 : vector<2x8x8xf32>
    %82 = math.exp %81 : vector<2x8x8xf32>
    %cst_57 = arith.constant dense<0.000000e+00> : vector<2x8xf32>
    %83 = vector.multi_reduction <add>, %82, %cst_57 [2] : vector<2x8x8xf32> to vector<2x8xf32>
    %84 = vector.shape_cast %83 : vector<2x8xf32> to vector<2x8x1xf32>
    %85 = tpu.reciprocal %84 {approx = true} : vector<2x8x1xf32> -> vector<2x8x1xf32>
    %86 = vector.broadcast %85 : vector<2x8x1xf32> to vector<2x8x8xf32>
    %87 = arith.mulf %82, %86 : vector<2x8x8xf32>
    %cst_58 = arith.constant dense<0.000000e+00> : vector<2x8x64xf32>
    %88 = tpu.matmul %87, %76, %cst_58 {dimension_numbers = #tpu.dot_dimension_numbers<[2], [1], [1], [2], [0, 0, 0, 1, 1, 2], [0], [0]>} : vector<2x8x8xf32>, vector<2x8x64xf32>, vector<2x8x64xf32> -> vector<2x8x64xf32>
    %89 = vector.shape_cast %88 : vector<2x8x64xf32> to vector<16x64xf32>
    %c1_59 = arith.constant 1 : index
    %c0_60 = arith.constant 0 : index
    %c0_61 = arith.constant 0 : index
    %90 = vector.load %arg9[%c1_59, %c0_60, %c0_61] : memref<4x64x256xf32, #tpu.memory_space<vmem>>, vector<1x64x256xf32>
    %91 = vector.shape_cast %90 : vector<1x64x256xf32> to vector<64x256xf32>
    %cst_62 = arith.constant dense<0.000000e+00> : vector<16x256xf32>
    %92 = tpu.matmul %89, %91, %cst_62 {dimension_numbers = #tpu.dot_dimension_numbers<[1], [0], [0], [1], [0, 0, 1, 1], [], []>} : vector<16x64xf32>, vector<64x256xf32>, vector<16x256xf32> -> vector<16x256xf32>
    %93 = arith.addf %52, %92 : vector<16x256xf32>
    %c2 = arith.constant 2 : index
    %c0_63 = arith.constant 0 : index
    %c0_64 = arith.constant 0 : index
    %94 = vector.load %arg3[%c2, %c0_63, %c0_64] : memref<4x256x64xf32, #tpu.memory_space<vmem>>, vector<1x256x64xf32>
    %95 = vector.shape_cast %94 : vector<1x256x64xf32> to vector<256x64xf32>
    %cst_65 = arith.constant dense<0.000000e+00> : vector<16x64xf32>
    %96 = tpu.matmul %10, %95, %cst_65 {dimension_numbers = #tpu.dot_dimension_numbers<[1], [0], [0], [1], [0, 0, 1, 1], [], []>} : vector<16x256xf32>, vector<256x64xf32>, vector<16x64xf32> -> vector<16x64xf32>
    %c2_66 = arith.constant 2 : index
    %c0_67 = arith.constant 0 : index
    %c0_68 = arith.constant 0 : index
    %97 = vector.load %arg4[%c2_66, %c0_67, %c0_68] : memref<4x1x64xf32, #tpu.memory_space<vmem>>, vector<1x1x64xf32>
    %98 = vector.shape_cast %97 : vector<1x1x64xf32> to vector<1x64xf32>
    %99 = vector.broadcast %98 : vector<1x64xf32> to vector<16x64xf32>
    %100 = arith.addf %96, %99 : vector<16x64xf32>
    %c2_69 = arith.constant 2 : index
    %c0_70 = arith.constant 0 : index
    %c0_71 = arith.constant 0 : index
    %101 = vector.load %arg5[%c2_69, %c0_70, %c0_71] : memref<4x256x64xf32, #tpu.memory_space<vmem>>, vector<1x256x64xf32>
    %102 = vector.shape_cast %101 : vector<1x256x64xf32> to vector<256x64xf32>
    %cst_72 = arith.constant dense<0.000000e+00> : vector<16x64xf32>
    %103 = tpu.matmul %10, %102, %cst_72 {dimension_numbers = #tpu.dot_dimension_numbers<[1], [0], [0], [1], [0, 0, 1, 1], [], []>} : vector<16x256xf32>, vector<256x64xf32>, vector<16x64xf32> -> vector<16x64xf32>
    %c2_73 = arith.constant 2 : index
    %c0_74 = arith.constant 0 : index
    %c0_75 = arith.constant 0 : index
    %104 = vector.load %arg6[%c2_73, %c0_74, %c0_75] : memref<4x1x64xf32, #tpu.memory_space<vmem>>, vector<1x1x64xf32>
    %105 = vector.shape_cast %104 : vector<1x1x64xf32> to vector<1x64xf32>
    %106 = vector.broadcast %105 : vector<1x64xf32> to vector<16x64xf32>
    %107 = arith.addf %103, %106 : vector<16x64xf32>
    %c2_76 = arith.constant 2 : index
    %c0_77 = arith.constant 0 : index
    %c0_78 = arith.constant 0 : index
    %108 = vector.load %arg7[%c2_76, %c0_77, %c0_78] : memref<4x256x64xf32, #tpu.memory_space<vmem>>, vector<1x256x64xf32>
    %109 = vector.shape_cast %108 : vector<1x256x64xf32> to vector<256x64xf32>
    %cst_79 = arith.constant dense<0.000000e+00> : vector<16x64xf32>
    %110 = tpu.matmul %10, %109, %cst_79 {dimension_numbers = #tpu.dot_dimension_numbers<[1], [0], [0], [1], [0, 0, 1, 1], [], []>} : vector<16x256xf32>, vector<256x64xf32>, vector<16x64xf32> -> vector<16x64xf32>
    %c2_80 = arith.constant 2 : index
    %c0_81 = arith.constant 0 : index
    %c0_82 = arith.constant 0 : index
    %111 = vector.load %arg8[%c2_80, %c0_81, %c0_82] : memref<4x1x64xf32, #tpu.memory_space<vmem>>, vector<1x1x64xf32>
    %112 = vector.shape_cast %111 : vector<1x1x64xf32> to vector<1x64xf32>
    %113 = vector.broadcast %112 : vector<1x64xf32> to vector<16x64xf32>
    %114 = arith.addf %110, %113 : vector<16x64xf32>
    %115 = vector.shape_cast %100 : vector<16x64xf32> to vector<2x8x64xf32>
    %116 = vector.shape_cast %107 : vector<16x64xf32> to vector<2x8x64xf32>
    %117 = vector.shape_cast %114 : vector<16x64xf32> to vector<2x8x64xf32>
    %cst_83 = arith.constant dense<0.000000e+00> : vector<2x8x8xf32>
    %118 = tpu.matmul %115, %116, %cst_83 {dimension_numbers = #tpu.dot_dimension_numbers<[2], [2], [1], [1], [0, 0, 0, 1, 1, 1], [0], [0]>} : vector<2x8x64xf32>, vector<2x8x64xf32>, vector<2x8x8xf32> -> vector<2x8x8xf32>
    %cst_84 = arith.constant dense<0xFF800000> : vector<2x8xf32>
    %119 = vector.multi_reduction <maximumf>, %118, %cst_84 [2] : vector<2x8x8xf32> to vector<2x8xf32>
    %120 = vector.shape_cast %119 : vector<2x8xf32> to vector<2x8x1xf32>
    %121 = vector.broadcast %120 : vector<2x8x1xf32> to vector<2x8x8xf32>
    %122 = arith.subf %118, %121 : vector<2x8x8xf32>
    %123 = math.exp %122 : vector<2x8x8xf32>
    %cst_85 = arith.constant dense<0.000000e+00> : vector<2x8xf32>
    %124 = vector.multi_reduction <add>, %123, %cst_85 [2] : vector<2x8x8xf32> to vector<2x8xf32>
    %125 = vector.shape_cast %124 : vector<2x8xf32> to vector<2x8x1xf32>
    %126 = tpu.reciprocal %125 {approx = true} : vector<2x8x1xf32> -> vector<2x8x1xf32>
    %127 = vector.broadcast %126 : vector<2x8x1xf32> to vector<2x8x8xf32>
    %128 = arith.mulf %123, %127 : vector<2x8x8xf32>
    %cst_86 = arith.constant dense<0.000000e+00> : vector<2x8x64xf32>
    %129 = tpu.matmul %128, %117, %cst_86 {dimension_numbers = #tpu.dot_dimension_numbers<[2], [1], [1], [2], [0, 0, 0, 1, 1, 2], [0], [0]>} : vector<2x8x8xf32>, vector<2x8x64xf32>, vector<2x8x64xf32> -> vector<2x8x64xf32>
    %130 = vector.shape_cast %129 : vector<2x8x64xf32> to vector<16x64xf32>
    %c2_87 = arith.constant 2 : index
    %c0_88 = arith.constant 0 : index
    %c0_89 = arith.constant 0 : index
    %131 = vector.load %arg9[%c2_87, %c0_88, %c0_89] : memref<4x64x256xf32, #tpu.memory_space<vmem>>, vector<1x64x256xf32>
    %132 = vector.shape_cast %131 : vector<1x64x256xf32> to vector<64x256xf32>
    %cst_90 = arith.constant dense<0.000000e+00> : vector<16x256xf32>
    %133 = tpu.matmul %130, %132, %cst_90 {dimension_numbers = #tpu.dot_dimension_numbers<[1], [0], [0], [1], [0, 0, 1, 1], [], []>} : vector<16x64xf32>, vector<64x256xf32>, vector<16x256xf32> -> vector<16x256xf32>
    %134 = arith.addf %93, %133 : vector<16x256xf32>
    %c3 = arith.constant 3 : index
    %c0_91 = arith.constant 0 : index
    %c0_92 = arith.constant 0 : index
    %135 = vector.load %arg3[%c3, %c0_91, %c0_92] : memref<4x256x64xf32, #tpu.memory_space<vmem>>, vector<1x256x64xf32>
    %136 = vector.shape_cast %135 : vector<1x256x64xf32> to vector<256x64xf32>
    %cst_93 = arith.constant dense<0.000000e+00> : vector<16x64xf32>
    %137 = tpu.matmul %10, %136, %cst_93 {dimension_numbers = #tpu.dot_dimension_numbers<[1], [0], [0], [1], [0, 0, 1, 1], [], []>} : vector<16x256xf32>, vector<256x64xf32>, vector<16x64xf32> -> vector<16x64xf32>
    %c3_94 = arith.constant 3 : index
    %c0_95 = arith.constant 0 : index
    %c0_96 = arith.constant 0 : index
    %138 = vector.load %arg4[%c3_94, %c0_95, %c0_96] : memref<4x1x64xf32, #tpu.memory_space<vmem>>, vector<1x1x64xf32>
    %139 = vector.shape_cast %138 : vector<1x1x64xf32> to vector<1x64xf32>
    %140 = vector.broadcast %139 : vector<1x64xf32> to vector<16x64xf32>
    %141 = arith.addf %137, %140 : vector<16x64xf32>
    %c3_97 = arith.constant 3 : index
    %c0_98 = arith.constant 0 : index
    %c0_99 = arith.constant 0 : index
    %142 = vector.load %arg5[%c3_97, %c0_98, %c0_99] : memref<4x256x64xf32, #tpu.memory_space<vmem>>, vector<1x256x64xf32>
    %143 = vector.shape_cast %142 : vector<1x256x64xf32> to vector<256x64xf32>
    %cst_100 = arith.constant dense<0.000000e+00> : vector<16x64xf32>
    %144 = tpu.matmul %10, %143, %cst_100 {dimension_numbers = #tpu.dot_dimension_numbers<[1], [0], [0], [1], [0, 0, 1, 1], [], []>} : vector<16x256xf32>, vector<256x64xf32>, vector<16x64xf32> -> vector<16x64xf32>
    %c3_101 = arith.constant 3 : index
    %c0_102 = arith.constant 0 : index
    %c0_103 = arith.constant 0 : index
    %145 = vector.load %arg6[%c3_101, %c0_102, %c0_103] : memref<4x1x64xf32, #tpu.memory_space<vmem>>, vector<1x1x64xf32>
    %146 = vector.shape_cast %145 : vector<1x1x64xf32> to vector<1x64xf32>
    %147 = vector.broadcast %146 : vector<1x64xf32> to vector<16x64xf32>
    %148 = arith.addf %144, %147 : vector<16x64xf32>
    %c3_104 = arith.constant 3 : index
    %c0_105 = arith.constant 0 : index
    %c0_106 = arith.constant 0 : index
    %149 = vector.load %arg7[%c3_104, %c0_105, %c0_106] : memref<4x256x64xf32, #tpu.memory_space<vmem>>, vector<1x256x64xf32>
    %150 = vector.shape_cast %149 : vector<1x256x64xf32> to vector<256x64xf32>
    %cst_107 = arith.constant dense<0.000000e+00> : vector<16x64xf32>
    %151 = tpu.matmul %10, %150, %cst_107 {dimension_numbers = #tpu.dot_dimension_numbers<[1], [0], [0], [1], [0, 0, 1, 1], [], []>} : vector<16x256xf32>, vector<256x64xf32>, vector<16x64xf32> -> vector<16x64xf32>
    %c3_108 = arith.constant 3 : index
    %c0_109 = arith.constant 0 : index
    %c0_110 = arith.constant 0 : index
    %152 = vector.load %arg8[%c3_108, %c0_109, %c0_110] : memref<4x1x64xf32, #tpu.memory_space<vmem>>, vector<1x1x64xf32>
    %153 = vector.shape_cast %152 : vector<1x1x64xf32> to vector<1x64xf32>
    %154 = vector.broadcast %153 : vector<1x64xf32> to vector<16x64xf32>
    %155 = arith.addf %151, %154 : vector<16x64xf32>
    %156 = vector.shape_cast %141 : vector<16x64xf32> to vector<2x8x64xf32>
    %157 = vector.shape_cast %148 : vector<16x64xf32> to vector<2x8x64xf32>
    %158 = vector.shape_cast %155 : vector<16x64xf32> to vector<2x8x64xf32>
    %cst_111 = arith.constant dense<0.000000e+00> : vector<2x8x8xf32>
    %159 = tpu.matmul %156, %157, %cst_111 {dimension_numbers = #tpu.dot_dimension_numbers<[2], [2], [1], [1], [0, 0, 0, 1, 1, 1], [0], [0]>} : vector<2x8x64xf32>, vector<2x8x64xf32>, vector<2x8x8xf32> -> vector<2x8x8xf32>
    %cst_112 = arith.constant dense<0xFF800000> : vector<2x8xf32>
    %160 = vector.multi_reduction <maximumf>, %159, %cst_112 [2] : vector<2x8x8xf32> to vector<2x8xf32>
    %161 = vector.shape_cast %160 : vector<2x8xf32> to vector<2x8x1xf32>
    %162 = vector.broadcast %161 : vector<2x8x1xf32> to vector<2x8x8xf32>
    %163 = arith.subf %159, %162 : vector<2x8x8xf32>
    %164 = math.exp %163 : vector<2x8x8xf32>
    %cst_113 = arith.constant dense<0.000000e+00> : vector<2x8xf32>
    %165 = vector.multi_reduction <add>, %164, %cst_113 [2] : vector<2x8x8xf32> to vector<2x8xf32>
    %166 = vector.shape_cast %165 : vector<2x8xf32> to vector<2x8x1xf32>
    %167 = tpu.reciprocal %166 {approx = true} : vector<2x8x1xf32> -> vector<2x8x1xf32>
    %168 = vector.broadcast %167 : vector<2x8x1xf32> to vector<2x8x8xf32>
    %169 = arith.mulf %164, %168 : vector<2x8x8xf32>
    %cst_114 = arith.constant dense<0.000000e+00> : vector<2x8x64xf32>
    %170 = tpu.matmul %169, %158, %cst_114 {dimension_numbers = #tpu.dot_dimension_numbers<[2], [1], [1], [2], [0, 0, 0, 1, 1, 2], [0], [0]>} : vector<2x8x8xf32>, vector<2x8x64xf32>, vector<2x8x64xf32> -> vector<2x8x64xf32>
    %171 = vector.shape_cast %170 : vector<2x8x64xf32> to vector<16x64xf32>
    %c3_115 = arith.constant 3 : index
    %c0_116 = arith.constant 0 : index
    %c0_117 = arith.constant 0 : index
    %172 = vector.load %arg9[%c3_115, %c0_116, %c0_117] : memref<4x64x256xf32, #tpu.memory_space<vmem>>, vector<1x64x256xf32>
    %173 = vector.shape_cast %172 : vector<1x64x256xf32> to vector<64x256xf32>
    %cst_118 = arith.constant dense<0.000000e+00> : vector<16x256xf32>
    %174 = tpu.matmul %171, %173, %cst_118 {dimension_numbers = #tpu.dot_dimension_numbers<[1], [0], [0], [1], [0, 0, 1, 1], [], []>} : vector<16x64xf32>, vector<64x256xf32>, vector<16x256xf32> -> vector<16x256xf32>
    %175 = arith.addf %134, %174 : vector<16x256xf32>
    %c0_119 = arith.constant 0 : index
    %c0_120 = arith.constant 0 : index
    %176 = vector.load %arg10[%c0_119, %c0_120] : memref<1x256xf32, #tpu.memory_space<vmem>>, vector<1x256xf32>
    %177 = vector.broadcast %176 : vector<1x256xf32> to vector<16x256xf32>
    %178 = arith.addf %175, %177 : vector<16x256xf32>
    %179 = arith.addf %10, %178 : vector<16x256xf32>
    %c0_121 = arith.constant 0 : index
    %c0_122 = arith.constant 0 : index
    %180 = vector.load %arg11[%c0_121, %c0_122] : memref<1x256xf32, #tpu.memory_space<vmem>>, vector<1x256xf32>
    %c0_123 = arith.constant 0 : index
    %c0_124 = arith.constant 0 : index
    %181 = vector.load %arg12[%c0_123, %c0_124] : memref<1x256xf32, #tpu.memory_space<vmem>>, vector<1x256xf32>
    %cst_125 = arith.constant dense<0.000000e+00> : vector<16xf32>
    %182 = vector.multi_reduction <add>, %179, %cst_125 [1] : vector<16x256xf32> to vector<16xf32>
    %183 = vector.shape_cast %182 : vector<16xf32> to vector<16x1xf32>
    %cst_126 = arith.constant 0.00416666688 : f32
    %184 = vector.broadcast %cst_126 : f32 to vector<16x1xf32>
    %185 = arith.mulf %183, %184 : vector<16x1xf32>
    %186 = vector.broadcast %185 : vector<16x1xf32> to vector<16x256xf32>
    %187 = arith.subf %179, %186 : vector<16x256xf32>
    %188 = vector.broadcast %4 : vector<1x256xf32> to vector<16x256xf32>
    %189 = arith.mulf %187, %188 : vector<16x256xf32>
    %190 = arith.mulf %189, %189 : vector<16x256xf32>
    %cst_127 = arith.constant dense<0.000000e+00> : vector<16xf32>
    %191 = vector.multi_reduction <add>, %190, %cst_127 [1] : vector<16x256xf32> to vector<16xf32>
    %192 = vector.shape_cast %191 : vector<16xf32> to vector<16x1xf32>
    %cst_128 = arith.constant 0.00416666688 : f32
    %193 = vector.broadcast %cst_128 : f32 to vector<16x1xf32>
    %194 = arith.mulf %192, %193 : vector<16x1xf32>
    %cst_129 = arith.constant 9.99999974E-6 : f32
    %195 = vector.broadcast %cst_129 : f32 to vector<16x1xf32>
    %196 = arith.addf %194, %195 : vector<16x1xf32>
    %197 = math.rsqrt %196 : vector<16x1xf32>
    %198 = vector.broadcast %197 : vector<16x1xf32> to vector<16x256xf32>
    %199 = arith.mulf %189, %198 : vector<16x256xf32>
    %200 = vector.broadcast %180 : vector<1x256xf32> to vector<16x256xf32>
    %201 = arith.mulf %199, %200 : vector<16x256xf32>
    %202 = vector.broadcast %181 : vector<1x256xf32> to vector<16x256xf32>
    %203 = arith.addf %201, %202 : vector<16x256xf32>
    %c0_130 = arith.constant 0 : index
    %c0_131 = arith.constant 0 : index
    %204 = vector.load %arg13[%c0_130, %c0_131] : memref<256x256xf32, #tpu.memory_space<vmem>>, vector<256x256xf32>
    %cst_132 = arith.constant dense<0.000000e+00> : vector<16x256xf32>
    %205 = tpu.matmul %203, %204, %cst_132 {dimension_numbers = #tpu.dot_dimension_numbers<[1], [0], [0], [1], [0, 0, 1, 1], [], []>} : vector<16x256xf32>, vector<256x256xf32>, vector<16x256xf32> -> vector<16x256xf32>
    %c0_133 = arith.constant 0 : index
    %c0_134 = arith.constant 0 : index
    %206 = vector.load %arg14[%c0_133, %c0_134] : memref<1x256xf32, #tpu.memory_space<vmem>>, vector<1x256xf32>
    %207 = vector.broadcast %206 : vector<1x256xf32> to vector<16x256xf32>
    %208 = arith.addf %205, %207 : vector<16x256xf32>
    %cst_135 = arith.constant 0.000000e+00 : f32
    %209 = vector.broadcast %cst_135 : f32 to vector<16x256xf32>
    %210 = arith.maximumf %208, %209 : vector<16x256xf32>
    %c0_136 = arith.constant 0 : index
    %c0_137 = arith.constant 0 : index
    %211 = vector.load %arg15[%c0_136, %c0_137] : memref<256x256xf32, #tpu.memory_space<vmem>>, vector<256x256xf32>
    %cst_138 = arith.constant dense<0.000000e+00> : vector<16x256xf32>
    %212 = tpu.matmul %210, %211, %cst_138 {dimension_numbers = #tpu.dot_dimension_numbers<[1], [0], [0], [1], [0, 0, 1, 1], [], []>} : vector<16x256xf32>, vector<256x256xf32>, vector<16x256xf32> -> vector<16x256xf32>
    %c0_139 = arith.constant 0 : index
    %c0_140 = arith.constant 0 : index
    %213 = vector.load %arg16[%c0_139, %c0_140] : memref<1x256xf32, #tpu.memory_space<vmem>>, vector<1x256xf32>
    %214 = vector.broadcast %213 : vector<1x256xf32> to vector<16x256xf32>
    %215 = arith.addf %212, %214 : vector<16x256xf32>
    %216 = arith.addf %203, %215 : vector<16x256xf32>
    %c0_141 = arith.constant 0 : index
    %c0_142 = arith.constant 0 : index
    %217 = vector.load %arg17[%c0_141, %c0_142] : memref<1x256xf32, #tpu.memory_space<vmem>>, vector<1x256xf32>
    %c0_143 = arith.constant 0 : index
    %c0_144 = arith.constant 0 : index
    %218 = vector.load %arg18[%c0_143, %c0_144] : memref<1x256xf32, #tpu.memory_space<vmem>>, vector<1x256xf32>
    %cst_145 = arith.constant dense<0.000000e+00> : vector<16xf32>
    %219 = vector.multi_reduction <add>, %216, %cst_145 [1] : vector<16x256xf32> to vector<16xf32>
    %220 = vector.shape_cast %219 : vector<16xf32> to vector<16x1xf32>
    %cst_146 = arith.constant 0.00416666688 : f32
    %221 = vector.broadcast %cst_146 : f32 to vector<16x1xf32>
    %222 = arith.mulf %220, %221 : vector<16x1xf32>
    %223 = vector.broadcast %222 : vector<16x1xf32> to vector<16x256xf32>
    %224 = arith.subf %216, %223 : vector<16x256xf32>
    %225 = vector.broadcast %4 : vector<1x256xf32> to vector<16x256xf32>
    %226 = arith.mulf %224, %225 : vector<16x256xf32>
    %227 = arith.mulf %226, %226 : vector<16x256xf32>
    %cst_147 = arith.constant dense<0.000000e+00> : vector<16xf32>
    %228 = vector.multi_reduction <add>, %227, %cst_147 [1] : vector<16x256xf32> to vector<16xf32>
    %229 = vector.shape_cast %228 : vector<16xf32> to vector<16x1xf32>
    %cst_148 = arith.constant 0.00416666688 : f32
    %230 = vector.broadcast %cst_148 : f32 to vector<16x1xf32>
    %231 = arith.mulf %229, %230 : vector<16x1xf32>
    %cst_149 = arith.constant 9.99999974E-6 : f32
    %232 = vector.broadcast %cst_149 : f32 to vector<16x1xf32>
    %233 = arith.addf %231, %232 : vector<16x1xf32>
    %234 = math.rsqrt %233 : vector<16x1xf32>
    %235 = vector.broadcast %234 : vector<16x1xf32> to vector<16x256xf32>
    %236 = arith.mulf %226, %235 : vector<16x256xf32>
    %237 = vector.broadcast %217 : vector<1x256xf32> to vector<16x256xf32>
    %238 = arith.mulf %236, %237 : vector<16x256xf32>
    %239 = vector.broadcast %218 : vector<1x256xf32> to vector<16x256xf32>
    %240 = arith.addf %238, %239 : vector<16x256xf32>
    %241 = vector.shape_cast %240 : vector<16x256xf32> to vector<2x8x256xf32>
    %cst_150 = arith.constant dense<0.000000e+00> : vector<2x256xf32>
    %242 = vector.multi_reduction <add>, %241, %cst_150 [1] : vector<2x8x256xf32> to vector<2x256xf32>
    %cst_151 = arith.constant 8.000000e+00 : f32
    %243 = vector.broadcast %cst_151 : f32 to vector<2x256xf32>
    %244 = arith.divf %242, %243 : vector<2x256xf32>
    %c0_152 = arith.constant 0 : index
    %c0_153 = arith.constant 0 : index
    %245 = vector.load %arg19[%c0_152, %c0_153] : memref<256x256xf32, #tpu.memory_space<vmem>>, vector<256x256xf32>
    %cst_154 = arith.constant dense<0.000000e+00> : vector<2x256xf32>
    %246 = tpu.matmul %244, %245, %cst_154 {dimension_numbers = #tpu.dot_dimension_numbers<[1], [0], [0], [1], [0, 0, 1, 1], [], []>} : vector<2x256xf32>, vector<256x256xf32>, vector<2x256xf32> -> vector<2x256xf32>
    %c0_155 = arith.constant 0 : index
    %c0_156 = arith.constant 0 : index
    %247 = vector.load %arg20[%c0_155, %c0_156] : memref<1x256xf32, #tpu.memory_space<vmem>>, vector<1x256xf32>
    %248 = vector.broadcast %247 : vector<1x256xf32> to vector<2x256xf32>
    %249 = arith.addf %246, %248 : vector<2x256xf32>
    %250 = arith.negf %249 : vector<2x256xf32>
    %251 = math.exp %250 : vector<2x256xf32>
    %cst_157 = arith.constant 1.000000e+00 : f32
    %252 = vector.broadcast %cst_157 : f32 to vector<2x256xf32>
    %253 = arith.addf %252, %251 : vector<2x256xf32>
    %254 = arith.divf %252, %253 : vector<2x256xf32>
    %c0_158 = arith.constant 0 : index
    %c0_159 = arith.constant 0 : index
    %255 = vector.load %arg21[%c0_158, %c0_159] : memref<256x640xf32, #tpu.memory_space<vmem>>, vector<256x640xf32>
    %cst_160 = arith.constant dense<0.000000e+00> : vector<2x640xf32>
    %256 = tpu.matmul %254, %255, %cst_160 {dimension_numbers = #tpu.dot_dimension_numbers<[1], [0], [0], [1], [0, 0, 1, 1], [], []>} : vector<2x256xf32>, vector<256x640xf32>, vector<2x640xf32> -> vector<2x640xf32>
    %c0_161 = arith.constant 0 : index
    %c0_162 = arith.constant 0 : index
    %257 = vector.load %arg22[%c0_161, %c0_162] : memref<1x640xf32, #tpu.memory_space<vmem>>, vector<1x640xf32>
    %258 = vector.broadcast %257 : vector<1x640xf32> to vector<2x640xf32>
    %259 = arith.addf %256, %258 : vector<2x640xf32>
    %c0_163 = arith.constant 0 : index
    %c0_164 = arith.constant 0 : index
    %260 = vector.load %arg23[%c0_163, %c0_164] : memref<2x640xf32, #tpu.memory_space<vmem>>, vector<2x640xf32>
    tpu.vector_store %arg23[%c0_163, %c0_164], %259 {strides = array<i32>} : memref<2x640xf32, #tpu.memory_space<vmem>>, vector<2x640xf32>,
    return
  }
}

</mosaic_0001>

<bundles_post_ra>
// kernel: classifier1_forward.1
= control target key start
LH: loop header
LB: loop body
LE: loop exit
PB: predicated region body
PF: predicated region fallthrough
CT: control target
= control target key end

     0   :  { %s9229_s0 = inlined_call_operand.vmem [shape: f32[16,40], index: 0, kind: input, shape index: {}]   ;;  %s9230_s1 = inlined_call_operand.vmem [shape: f32[40,256], index: 1, kind: input, shape index: {}]   ;;  %s9231_s2 = inlined_call_operand.vmem [shape: f32[1,256], index: 2, kind: input, shape index: {}]   ;;  %s9232_s3 = inlined_call_operand.vmem [shape: f32[4,256,64], index: 3, kind: input, shape index: {}]   ;;  %s9233_s4 = inlined_call_operand.vmem [shape: f32[4,1,64], index: 4, kind: input, shape index: {}]   ;;  %s9234_s5 = inlined_call_operand.vmem [shape: f32[4,256,64], index: 5, kind: input, shape index: {}]   ;;  %s9235_s6 = inlined_call_operand.vmem [shape: f32[4,1,64], index: 6, kind: input, shape index: {}]   ;;  %s9236_s7 = inlined_call_operand.vmem [shape: f32[4,256,64], index: 7, kind: input, shape index: {}]   ;;  %s9237_s8 = inlined_call_operand.vmem [shape: f32[4,1,64], index: 8, kind: input, shape index: {}]   ;;  %s9238_s9 = inlined_call_operand.vmem [shape: f32[4,64,256], index: 9, kind: input, shape index: {}]   ;;  %s9239_s10 = inlined_call_operand.vmem [shape: f32[1,256], index: 10, kind: input, shape index: {}]   ;;  %s9240_s11 = inlined_call_operand.vmem [shape: f32[1,256], index: 11, kind: input, shape index: {}]   ;;  %s9241_s12 = inlined_call_operand.vmem [shape: f32[1,256], index: 12, kind: input, shape index: {}]   ;;  %s9242_s13 = inlined_call_operand.vmem [shape: f32[256,256], index: 13, kind: input, shape index: {}]   ;;  %s9243_s14 = inlined_call_operand.vmem [shape: f32[1,256], index: 14, kind: input, shape index: {}]   ;;  %s9244_s15 = inlined_call_operand.vmem [shape: f32[256,256], index: 15, kind: input, shape index: {}]   ;;  %s9245_s16 = inlined_call_operand.vmem [shape: f32[1,256], index: 16, kind: input, shape index: {}]   ;;  %s9246_s17 = inlined_call_operand.vmem [shape: f32[1,256], index: 17, kind: input, shape index: {}]   ;;  %s9247_s18 = inlined_call_operand.vmem [shape: f32[1,256], index: 18, kind: input, shape index: {}]   ;;  %s9248_s19 = inlined_call_operand.vmem [shape: f32[256,256], index: 19, kind: input, shape index: {}]   ;;  %s9249_s20 = inlined_call_operand.vmem [shape: f32[1,256], index: 20, kind: input, shape index: {}]   ;;  %s9250_s21 = inlined_call_operand.vmem [shape: f32[256,640], index: 21, kind: input, shape index: {}]   ;;  %s9251_s22 = inlined_call_operand.vmem [shape: f32[1,640], index: 22, kind: input, shape index: {}]   ;;  %s9252_s23 = inlined_call_operand.hbm [shape: f32[2,640], index: 23, kind: output, shape index: {}]  }
   0x1   :  { %9260 = sst [smem:[#allocation5_spill]] %s9229_s0 }
   0x2   :  { %9261 = sst [smem:[#allocation6_spill]] %s9230_s1 }
   0x3   :  { %9262 = sst [smem:[#allocation7_spill]] %s9231_s2 }
   0x4   :  { %9263 = sst [smem:[#allocation8_spill]] %s9232_s3 }
   0x5   :  { %9264 = sst [smem:[#allocation9_spill]] %s9233_s4 }
   0x6   :  { %9265 = sst [smem:[#allocation10_spill]] %s9234_s5 }
   0x7   :  { %9266 = sst [smem:[#allocation11_spill]] %s9235_s6 }
   0x8   :  { %9267 = sst [smem:[#allocation12_spill]] %s9236_s7 }
   0x9   :  { %s9268_s24 = sld [smem:[#allocation6_spill]]  ;;  %v6274_v7 = vmov 0.0   ;;  %s9269_s2 = sld [smem:[#allocation8_spill]]  ;;  %vm108_vm0 = vcmask 326656  }
   0xa   :  { %179 = vmatprep.mubr.f32.mxu0 %v6274_v7  ;;  %s9270_s30 = sld [smem:[#allocation10_spill]]  ;;  %s9271_s1 = sld [smem:[#allocation5_spill]] }
   0xf   :  { %v87_v0 = vld [vmem:[%s9268_s24 + $0x8] sm:$0xff]  ;;  %v89_v1 = vld [vmem:[%s9268_s24 + $0x18] sm:$0xff]  ;;  %v86_v2 = vld [vmem:[%s9268_s24] sm:$0xff] }
  0x10   :  { %v5378_v3 = vpack.c.bf16 %v89_v1, %v87_v0  ;;  %v88_v4 = vld [vmem:[%s9268_s24 + $0x10] sm:$0xff]  ;;  %v91_v5 = vld [vmem:[%s9268_s24 + $0x28] sm:$0xff]  ;;  %v93_v6 = vld [vmem:[%s9268_s24 + $0x38] sm:$0xff] }
  0x11   :  { %v5380_v8 = vpack.c.bf16 %v88_v4, %v86_v2  ;;  %v5382_v9 = vpack.c.bf16 %v93_v6, %v91_v5  ;;  %v90_v10 = vld [vmem:[%s9268_s24 + $0x20] sm:$0xff]  ;;  %v92_v11 = vld [vmem:[%s9268_s24 + $0x30] sm:$0xff]  ;;  %v95_v13 = vld [vmem:[%s9268_s24 + $0x48] sm:$0xff] }
  0x12   :  { %5379 = vmatprep.subr.bf16.mxu0 %v5378_v3  ;;  %v5384_v12 = vpack.c.bf16 %v92_v11, %v90_v10  ;;  %v208_v14 = vld [vmem:[%s9269_s2 + $0x80] sm:$0xff]  ;;  %v209_v15 = vld [vmem:[%s9269_s2 + $0x88] sm:$0xff]  ;;  %v210_v24 = vld [vmem:[%s9269_s2 + $0x90] sm:$0xff] }
  0x13   :  { %5381 = vmatpush1.bf16.msra.mxu0 %v5380_v8  ;;  %v192_v16 = vld [vmem:[%s9269_s2] sm:$0xff]  ;;  %v5386_v17 = vpack.c.bf16 %v209_v15, %v208_v14  ;;  %v193_v18 = vld [vmem:[%s9269_s2 + $0x8] sm:$0xff]  ;;  %v211_v25 = vld [vmem:[%s9269_s2 + $0x98] sm:$0xff] }
  0x14   :  { %5383 = vmatprep.subr.bf16.mxu0 %v5382_v9  ;;  %v322_v19 = vld [vmem:[%s9270_s30 + $0x80] sm:$0xff]  ;;  %v323_v20 = vld [vmem:[%s9270_s30 + $0x88] sm:$0xff]  ;;  %v5388_v21 = vpack.c.bf16 %v193_v18, %v192_v16  ;;  %v194_v26 = vld [vmem:[%s9269_s2 + $0x10] sm:$0xff]  ;;  %v5390_v28 = vpack.c.bf16 %v211_v25, %v210_v24 }
  0x15   :  { %v306_v22 = vld [vmem:[%s9270_s30] sm:$0xff]  ;;  %v307_v23 = vld [vmem:[%s9270_s30 + $0x8] sm:$0xff]  ;;  %5387 = vmatprep.subr.bf16.mxu1 %v5386_v17  ;;  %v195_v27 = vld [vmem:[%s9269_s2 + $0x18] sm:$0xff]  ;;  %v5418_v33 = vpack.c.bf16 %v323_v20, %v322_v19 }
  0x16   :  { %5389 = vmatpush3.bf16.msra.mxu1 %v5388_v21  ;;  %v5392_v29 = vpack.c.bf16 %v195_v27, %v194_v26  ;;  %v324_v30 = vld [vmem:[%s9270_s30 + $0x90] sm:$0xff]  ;;  %v325_v31 = vld [vmem:[%s9270_s30 + $0x98] sm:$0xff]  ;;  %v94_v32 = vld [vmem:[%s9268_s24 + $0x40] sm:$0xff]  ;;  %v5420_v37 = vpack.c.bf16 %v307_v23, %v306_v22 }
  0x17   :  { %5385 = vmatpush1.bf16.msra.mxu0 %v5384_v12  ;;  %v212_v34 = vld [vmem:[%s9269_s2 + $0xa0] sm:$0xff]  ;;  %v213_v35 = vld [vmem:[%s9269_s2 + $0xa8] sm:$0xff]  ;;  %5391 = vmatprep.subr.bf16.mxu1 %v5390_v28  ;;  %v5422_v40 = vpack.c.bf16 %v325_v31, %v324_v30  ;;  %v308_v41 = vld [vmem:[%s9270_s30 + $0x10] sm:$0xff] }
  0x18   :  { %123 = vmatprep.subr.mxu0 %v95_v13  ;;  %v84_v36 = vld [vmem:[%s9271_s1] sm:$0xff]  ;;  %v197_v39 = vld [vmem:[%s9269_s2 + $0x28] sm:$0xff]  ;;  %v309_v42 = vld [vmem:[%s9270_s30 + $0x18] sm:$0xff]  ;;  %v5394_v43 = vpack.c.bf16 %v213_v35, %v212_v34 }
  0x19   :  { %v196_v38 = vld [vmem:[%s9269_s2 + $0x20] sm:$0xff]  ;;  %v327_v46 = vld [vmem:[%s9270_s30 + $0xa8] sm:$0xff]  ;;  %v214_v47 = vld [vmem:[%s9269_s2 + $0xb0] sm:$0xff]  ;;  %v5424_v53 = vpack.c.bf16 %v309_v42, %v308_v41 }
  0x1a   :  { %v326_v44 = vld [vmem:[%s9270_s30 + $0xa0] sm:$0xff]  ;;  %5393 = vmatpush3.bf16.msra.mxu1 %v5392_v29  ;;  %v5396_v45 = vpack.c.bf16 %v197_v39, %v196_v38  ;;  %v215_v48 = vld [vmem:[%s9269_s2 + $0xb8] sm:$0xff]  ;;  %v198_v50 = vld [vmem:[%s9269_s2 + $0x30] sm:$0xff] }
  0x1b   :  { %124 = vmatpush1.msra.mxu0 %v94_v32  ;;  %v5398_v49 = vpack.c.bf16 %v215_v48, %v214_v47  ;;  %v199_v51 = vld [vmem:[%s9269_s2 + $0x38] sm:$0xff]  ;;  %v85_v52 = vld [vmem:[%s9271_s1 + $0x8] sm:$0xff]  ;;  %v216_v54 = vld [vmem:[%s9269_s2 + $0xc0] sm:$0xff]  ;;  %5395 = vmatprep.subr.bf16.mxu1 %v5394_v43  ;;  %v5426_v55 = vpack.c.bf16 %v327_v46, %v326_v44 }
  0x1c   :  { %4381 = vmatmul.mubr.msk.f32.vlgmr.msra.gmra.mrb[0].mxu0 %vm108_vm0, %v84_v36  ;;  %5419 = vmatprep.subr.bf16.mxu0 %v5418_v33  ;;  %v310_v56 = vld [vmem:[%s9270_s30 + $0x20] sm:$0xff]  ;;  %v311_v57 = vld [vmem:[%s9270_s30 + $0x28] sm:$0xff]  ;;  %v5400_v59 = vpack.c.bf16 %v199_v51, %v198_v50  ;;  %v328_v60 = vld [vmem:[%s9270_s30 + $0xb0] sm:$0xff] }
  0x1d   :  { %185 = vmatprep.mubr.f32.mxu0 %v6274_v7  ;;  %5421 = vmatpush3.bf16.msra.mxu0 %v5420_v37  ;;  %v217_v58 = vld [vmem:[%s9269_s2 + $0xc8] sm:$0xff]  ;;  %v329_v61 = vld [vmem:[%s9270_s30 + $0xb8] sm:$0xff]  ;;  %v200_v63 = vld [vmem:[%s9269_s2 + $0x40] sm:$0xff]  ;;  %v5428_v1 = vpack.c.bf16 %v311_v57, %v310_v56 }
  0x1e   :  { %5423 = vmatprep.subr.bf16.mxu0 %v5422_v40  ;;  %5397 = vmatpush3.bf16.msra.mxu1 %v5396_v45  ;;  %v5402_v62 = vpack.c.bf16 %v217_v58, %v216_v54  ;;  %v201_v0 = vld [vmem:[%s9269_s2 + $0x48] sm:$0xff]  ;;  %v218_v2 = vld [vmem:[%s9269_s2 + $0xd0] sm:$0xff]  ;;  %v219_v3 = vld [vmem:[%s9269_s2 + $0xd8] sm:$0xff]  ;;  %v5430_v4 = vpack.c.bf16 %v329_v61, %v328_v60 }
  0x1f   :  { %5399 = vmatprep.subr.bf16.mxu1 %v5398_v49  ;;  %v312_v5 = vld [vmem:[%s9270_s30 + $0x30] sm:$0xff]  ;;  %v313_v6 = vld [vmem:[%s9270_s30 + $0x38] sm:$0xff]  ;;  %v5404_v8 = vpack.c.bf16 %v201_v0, %v200_v63  ;;  %v330_v9 = vld [vmem:[%s9270_s30 + $0xc0] sm:$0xff]  ;;  %v5406_v11 = vpack.c.bf16 %v219_v3, %v218_v2 }
  0x20   :  { %4382 = vmatmul.mubr.msk.f32.gmra.mrb[2].mxu0 %vm108_vm0, %v85_v52  ;;  %v331_v10 = vld [vmem:[%s9270_s30 + $0xc8] sm:$0xff]  ;;  %v202_v12 = vld [vmem:[%s9269_s2 + $0x50] sm:$0xff]  ;;  %v203_v13 = vld [vmem:[%s9269_s2 + $0x58] sm:$0xff]  ;;  %v5432_v14 = vpack.c.bf16 %v313_v6, %v312_v5 }
  0x21   :  { %5425 = vmatpush3.bf16.msra.mxu0 %v5424_v53  ;;  %v220_v15 = vld [vmem:[%s9269_s2 + $0xe0] sm:$0xff]  ;;  %v221_v16 = vld [vmem:[%s9269_s2 + $0xe8] sm:$0xff]  ;;  %v5434_v17 = vpack.c.bf16 %v331_v10, %v330_v9 }
  0x22   :  { %5427 = vmatprep.subr.bf16.mxu0 %v5426_v55  ;;  %5401 = vmatpush3.bf16.msra.mxu1 %v5400_v59  ;;  %v314_v18 = vld [vmem:[%s9270_s30 + $0x40] sm:$0xff]  ;;  %v315_v19 = vld [vmem:[%s9270_s30 + $0x48] sm:$0xff] }
  0x23   :  { %5403 = vmatprep.subr.bf16.mxu1 %v5402_v62 }
  0x25   :  { %5429 = vmatpush3.bf16.msra.mxu0 %v5428_v1 }
  0x26   :  { %5431 = vmatprep.subr.bf16.mxu0 %v5430_v4 }
  0x27   :  { %28 = vsyncpa [#allocation3], 0  ;;  %5405 = vmatpush3.bf16.msra.mxu1 %v5404_v8  ;;  %v5408_v20 = vpack.c.bf16 %v203_v13, %v202_v12  ;;  %v332_v21 = vld [vmem:[%s9270_s30 + $0xd0] sm:$0xff]  ;;  %v333_v22 = vld [vmem:[%s9270_s30 + $0xd8] sm:$0xff]  ;;  %v5410_v23 = vpack.c.bf16 %v221_v16, %v220_v15  ;;  %v5436_v26 = vpack.c.bf16 %v315_v19, %v314_v18  ;;  %s9272_s25 = sld [smem:[#allocation12_spill]]  ;;  %v75_v53 = vlaneseq  ;;  %s9273_s27 = sld [smem:[#allocation7_spill]] }
  0x28   :  { %5407 = vmatprep.subr.bf16.mxu1 %v5406_v11  ;;  %v204_v24 = vld [vmem:[%s9269_s2 + $0x60] sm:$0xff]  ;;  %v205_v25 = vld [vmem:[%s9269_s2 + $0x68] sm:$0xff]  ;;  %v5438_v27 = vpack.c.bf16 %v333_v22, %v332_v21  ;;  %v316_v28 = vld [vmem:[%s9270_s30 + $0x50] sm:$0xff]  ;;  %vm6275_vm1 = vmmov 0   ;;  %s9274_s4 = sld [smem:[#allocation11_spill]]  ;;  %vm534_vm2 = vcmask 523264  }
  0x29   :  { %5433 = vmatpush3.bf16.msra.mxu0 %v5432_v14  ;;  %v317_v29 = vld [vmem:[%s9270_s30 + $0x58] sm:$0xff]  ;;  %v5412_v30 = vpack.c.bf16 %v205_v25, %v204_v24  ;;  %v334_v31 = vld [vmem:[%s9270_s30 + $0xe0] sm:$0xff]  ;;  %v335_v32 = vld [vmem:[%s9270_s30 + $0xe8] sm:$0xff]  ;;  %v6638_v54 = vshrl.u32 %v75_v53, 7  ;;  %s9275_s6 = sld [smem:[#allocation9_spill]]  ;;  %vm687_vm3 = vcmask 64512  }
  0x2a   :  { %5435 = vmatprep.subr.bf16.mxu0 %v5434_v17  ;;  %v5440_v33 = vpack.c.bf16 %v317_v29, %v316_v28  ;;  %v5442_v34 = vpack.c.bf16 %v335_v32, %v334_v31  ;;  %v318_v35 = vld [vmem:[%s9270_s30 + $0x60] sm:$0xff]  ;;  %v319_v36 = vld [vmem:[%s9270_s30 + $0x68] sm:$0xff]  ;;  %v222_v38 = vld [vmem:[%s9269_s2 + $0xf0] sm:$0xff]  ;;  %vm3846_vm5 = vcmask 1041409  }
  0x2b   :  { %5409 = vmatpush3.bf16.msra.mxu1 %v5408_v20  ;;  %v5444_v37 = vpack.c.bf16 %v319_v36, %v318_v35  ;;  %v223_v39 = vld [vmem:[%s9269_s2 + $0xf8] sm:$0xff]  ;;  %v206_v41 = vld [vmem:[%s9269_s2 + $0x70] sm:$0xff]  ;;  %v6641_v55 = vsub.s32 1, %v6638_v54  ;;  %v6647_v57 = vsub.s32 0, %v6638_v54 }
  0x2c   :  { %5411 = vmatprep.subr.bf16.mxu1 %v5410_v23  ;;  %v5414_v40 = vpack.c.bf16 %v223_v39, %v222_v38  ;;  %v207_v42 = vld [vmem:[%s9269_s2 + $0x78] sm:$0xff]  ;;  %v336_v43 = vld [vmem:[%s9270_s30 + $0xf0] sm:$0xff] }
  0x2d   :  { %5437 = vmatpush3.bf16.msra.mxu0 %v5436_v26  ;;  %v5416_v44 = vpack.c.bf16 %v207_v42, %v206_v41  ;;  %v337_v45 = vld [vmem:[%s9270_s30 + $0xf8] sm:$0xff]  ;;  %v320_v46 = vld [vmem:[%s9270_s30 + $0x70] sm:$0xff]  ;;  %v436_v50 = vld [vmem:[%s9272_s25 + $0x80] sm:$0xff] }
  0x2e   :  { %5439 = vmatprep.subr.bf16.mxu0 %v5438_v27  ;;  %v321_v47 = vld [vmem:[%s9270_s30 + $0x78] sm:$0xff]  ;;  %v5446_v48 = vpack.c.bf16 %v337_v45, %v336_v43  ;;  %v437_v51 = vld [vmem:[%s9272_s25 + $0x88] sm:$0xff]  ;;  %v96_v56 = vld [vmem:[%s9273_s27] sm:$0x3] }
  0x2f   :  { %5413 = vmatpush3.bf16.msra.mxu1 %v5412_v30  ;;  %v5448_v49 = vpack.c.bf16 %v321_v47, %v320_v46  ;;  %v5450_v52 = vpack.c.bf16 %v437_v51, %v436_v50  ;;  %v105_v58 = vrot.slane %v96_v56, %v6641_v55  ;;  %v101_v59 = vrot.slane %v96_v56, %v6647_v57  ;;  %v420_v60 = vld [vmem:[%s9272_s25] sm:$0xff]  ;;  %v421_v61 = vld [vmem:[%s9272_s25 + $0x8] sm:$0xff]  ;;  %v438_v63 = vld [vmem:[%s9272_s25 + $0x90] sm:$0xff] }
  0x30   :  { %5415 = vmatprep.subr.bf16.mxu1 %v5414_v40  ;;  %v439_v0 = vld [vmem:[%s9272_s25 + $0x98] sm:$0xff]  ;;  %v5452_v3 = vpack.c.bf16 %v421_v61, %v420_v60  ;;  %v422_v6 = vld [vmem:[%s9272_s25 + $0x10] sm:$0xff]  ;;  %v440_v10 = vld [vmem:[%s9272_s25 + $0xa0] sm:$0xff] }
  0x31   :  { %5441 = vmatpush3.bf16.msra.mxu0 %v5440_v33  ;;  %v5454_v5 = vpack.c.bf16 %v439_v0, %v438_v63  ;;  %v423_v8 = vld [vmem:[%s9272_s25 + $0x18] sm:$0xff]  ;;  %v441_v11 = vld [vmem:[%s9272_s25 + $0xa8] sm:$0xff]  ;;  %v424_v17 = vld [vmem:[%s9272_s25 + $0x20] sm:$0xff] }
  0x32   :  { %5443 = vmatprep.subr.bf16.mxu0 %v5442_v34  ;;  %v5456_v14 = vpack.c.bf16 %v423_v8, %v422_v6  ;;  %v5458_v16 = vpack.c.bf16 %v441_v11, %v440_v10  ;;  %v425_v18 = vld [vmem:[%s9272_s25 + $0x28] sm:$0xff]  ;;  %v442_v19 = vld [vmem:[%s9272_s25 + $0xb0] sm:$0xff]  ;;  %v443_v20 = vld [vmem:[%s9272_s25 + $0xb8] sm:$0xff] }
  0x33   :  { %5417 = vmatpush3.bf16.msra.mxu1 %v5416_v44  ;;  %v5460_v21 = vpack.c.bf16 %v425_v18, %v424_v17  ;;  %v5462_v22 = vpack.c.bf16 %v443_v20, %v442_v19  ;;  %v426_v23 = vld [vmem:[%s9272_s25 + $0x30] sm:$0xff]  ;;  %v427_v24 = vld [vmem:[%s9272_s25 + $0x38] sm:$0xff]  ;;  %v444_v25 = vld [vmem:[%s9272_s25 + $0xc0] sm:$0xff] }
  0x34   :  { %5451 = vmatprep.subr.bf16.mxu1 %v5450_v52  ;;  %v445_v26 = vld [vmem:[%s9272_s25 + $0xc8] sm:$0xff]  ;;  %v5464_v27 = vpack.c.bf16 %v427_v24, %v426_v23  ;;  %v428_v29 = vld [vmem:[%s9272_s25 + $0x40] sm:$0xff]  ;;  %v446_v31 = vld [vmem:[%s9272_s25 + $0xd0] sm:$0xff] }
  0x35   :  { %5445 = vmatpush3.bf16.msra.mxu0 %v5444_v37  ;;  %v5466_v28 = vpack.c.bf16 %v445_v26, %v444_v25  ;;  %v429_v30 = vld [vmem:[%s9272_s25 + $0x48] sm:$0xff]  ;;  %v447_v32 = vld [vmem:[%s9272_s25 + $0xd8] sm:$0xff]  ;;  %v430_v35 = vld [vmem:[%s9272_s25 + $0x50] sm:$0xff] }
  0x36   :  { %5447 = vmatprep.subr.bf16.mxu0 %v5446_v48  ;;  %v5468_v33 = vpack.c.bf16 %v429_v30, %v428_v29  ;;  %v5470_v34 = vpack.c.bf16 %v447_v32, %v446_v31  ;;  %v431_v36 = vld [vmem:[%s9272_s25 + $0x58] sm:$0xff]  ;;  %v448_v37 = vld [vmem:[%s9272_s25 + $0xe0] sm:$0xff]  ;;  %v449_v38 = vld [vmem:[%s9272_s25 + $0xe8] sm:$0xff] }
  0x37   :  { %v5472_v39 = vpack.c.bf16 %v431_v36, %v430_v35  ;;  %v5474_v40 = vpack.c.bf16 %v449_v38, %v448_v37  ;;  %v432_v41 = vld [vmem:[%s9272_s25 + $0x60] sm:$0xff]  ;;  %v433_v42 = vld [vmem:[%s9272_s25 + $0x68] sm:$0xff]  ;;  %v450_v43 = vld [vmem:[%s9272_s25 + $0xf0] sm:$0xff] }
  0x38   :  { %v451_v44 = vld [vmem:[%s9272_s25 + $0xf8] sm:$0xff]  ;;  %v5476_v45 = vpack.c.bf16 %v433_v42, %v432_v41  ;;  %v434_v47 = vld [vmem:[%s9272_s25 + $0x70] sm:$0xff]  ;;  %v4443_v50 = vld [vmem:[%s9270_s30 + $0x188] sm:$0xff] }
  0x39   :  { %5449 = vmatpush3.bf16.msra.mxu0 %v5448_v49  ;;  %v5478_v46 = vpack.c.bf16 %v451_v44, %v450_v43  ;;  %v435_v48 = vld [vmem:[%s9272_s25 + $0x78] sm:$0xff]  ;;  %v4442_v49 = vld [vmem:[%s9270_s30 + $0x180] sm:$0xff]  ;;  %v4428_v63 = vld [vmem:[%s9270_s30 + $0x110] sm:$0xff] }
  0x3a   :  { %5298 = vmatprep.subr.mxu0 %v6274_v7  ;;  %v5480_v51 = vpack.c.bf16 %v435_v48, %v434_v47  ;;  %v5514_v52 = vpack.c.bf16 %v4443_v50, %v4442_v49  ;;  %v4426_v56 = vld [vmem:[%s9270_s30 + $0x100] sm:$0xff]  ;;  %v4445_v60 = vld [vmem:[%s9270_s30 + $0x198] sm:$0xff]  ;;  %v4448_v10 = vld [vmem:[%s9270_s30 + $0x1b0] sm:$0xff] }
  0x3b   :  { %v4429_v0 = vld [vmem:[%s9270_s30 + $0x118] sm:$0xff]  ;;  %v4430_v8 = vld [vmem:[%s9270_s30 + $0x120] sm:$0xff]  ;;  %v4451_v19 = vld [vmem:[%s9270_s30 + $0x1c8] sm:$0xff] }
  0x3c   :  { %v4449_v11 = vld [vmem:[%s9270_s30 + $0x1b8] sm:$0xff]  ;;  %v4450_v18 = vld [vmem:[%s9270_s30 + $0x1c0] sm:$0xff]  ;;  %v4435_v23 = vld [vmem:[%s9270_s30 + $0x148] sm:$0xff] }
  0x3d   :  { %v4433_v17 = vld [vmem:[%s9270_s30 + $0x138] sm:$0xff]  ;;  %v4452_v24 = vld [vmem:[%s9270_s30 + $0x1d0] sm:$0xff]  ;;  %v4454_v30 = vld [vmem:[%s9270_s30 + $0x1e0] sm:$0xff] }
  0x3e   :  { %v4453_v25 = vld [vmem:[%s9270_s30 + $0x1d8] sm:$0xff]  ;;  %v4455_v31 = vld [vmem:[%s9270_s30 + $0x1e8] sm:$0xff]  ;;  %v4456_v36 = vld [vmem:[%s9270_s30 + $0x1f0] sm:$0xff] }
  0x3f   :  { %v4437_v29 = vld [vmem:[%s9270_s30 + $0x158] sm:$0xff]  ;;  %v4439_v35 = vld [vmem:[%s9270_s30 + $0x168] sm:$0xff]  ;;  %v4383_v50 = vld [vmem:[%s9275_s6] ss:$0 sm:$0xff] }
  0x40   :  { %v4457_v37 = vld [vmem:[%s9270_s30 + $0x1f8] sm:$0xff] }
  0x41   :  { %v4441_v41 = vld [vmem:[%s9270_s30 + $0x178] sm:$0xff] }
  0xef   :  { %v181_v62 = vpop.f32.mrb[0].mxu0 }
  0xf0   :  { %v183_v1 = vpop.f32.mrb[1].mxu0  ;;  %v6665_v4 = vadd.f32 %v181_v62, %v101_v59 }
  0xf1   :  { %v6663_v2 = vadd.f32 %v183_v1, %v105_v58  ;;  %v4446_v1 = vld [vmem:[%s9270_s30 + $0x1a0] sm:$0xff] }
  0xf3   :  { %v187_v9 = vpop.f32.mrb[2].mxu0  ;;  %295 = vmatprep.mubr.f32.mxu1 %v6663_v2  ;;  %409 = vmatprep.mubr.f32.mxu0 %v6663_v2 }
  0xf4   :  { %v189_v12 = vpop.f32.mrb[3].mxu0  ;;  %296 = vmatmul.mubr.f32.vlgmr.msra.gmra.mrb[0].mxu1 %v6665_v4  ;;  %410 = vmatmul.mubr.f32.vlgmr.msra.gmra.mrb[4].mxu0 %v6665_v4  ;;  %v6685_v15 = vadd.f32 %v187_v9, %v101_v59  ;;  %v4444_v59 = vld [vmem:[%s9270_s30 + $0x190] sm:$0xff]  ;;  %v4431_v9 = vld [vmem:[%s9270_s30 + $0x128] sm:$0xff] }
  0xf5   :  { %v6683_v13 = vadd.f32 %v189_v12, %v105_v58  ;;  %5453 = vmatpush3.bf16.msra.mxu1 %v5452_v3  ;;  %v4427_v58 = vld [vmem:[%s9270_s30 + $0x108] sm:$0xff]  ;;  %v5518_v62 = vpack.c.bf16 %v4445_v60, %v4444_v59  ;;  %v5524_v12 = vpack.c.bf16 %v4431_v9, %v4430_v8 }
  0xf6   :  { %5455 = vmatprep.subr.bf16.mxu1 %v5454_v5  ;;  %v5516_v61 = vpack.c.bf16 %v4427_v58, %v4426_v56  ;;  %v4447_v3 = vld [vmem:[%s9270_s30 + $0x1a8] sm:$0xff]  ;;  %v5520_v5 = vpack.c.bf16 %v4429_v0, %v4428_v63 }
  0xf7   :  { %300 = vmatprep.mubr.f32.mxu1 %v6683_v13  ;;  %414 = vmatprep.mubr.f32.mxu0 %v6683_v13  ;;  %v5522_v6 = vpack.c.bf16 %v4447_v3, %v4446_v1  ;;  %v4385_v3 = vld [vmem:[%s9237_s8] ss:$0 sm:$0xff] }
  0xf8   :  { %301 = vmatmul.mubr.f32.gmra.mrb[2].mxu1 %v6685_v15  ;;  %415 = vmatmul.mubr.f32.gmra.mrb[6].mxu0 %v6685_v15 }
  0xf9   :  { %5457 = vmatpush3.bf16.msra.mxu1 %v5456_v14  ;;  %523 = vmatprep.mubr.f32.mxu1 %v6663_v2  ;;  %v5526_v14 = vpack.c.bf16 %v4449_v11, %v4448_v10 }
  0xfa   :  { %5459 = vmatprep.subr.bf16.mxu1 %v5458_v16  ;;  %v4432_v16 = vld [vmem:[%s9270_s30 + $0x130] sm:$0xff]  ;;  %5300 = vmatprep.mubr.msk.f32.mxu0 %vm6275_vm1, %v6274_v7 }
  0xfb   :  { %v5528_v20 = vpack.c.bf16 %v4433_v17, %v4432_v16  ;;  %v4459_v16 = vld [vmem:[%s9274_s4 + $0x1] ss:$0 sm:$0xff] }
  0xfd   :  { %5461 = vmatpush3.bf16.msra.mxu1 %v5460_v21  ;;  %v5530_v21 = vpack.c.bf16 %v4451_v19, %v4450_v18 }
  0xfe   :  { %5463 = vmatprep.subr.bf16.mxu1 %v5462_v22  ;;  %v4434_v22 = vld [vmem:[%s9270_s30 + $0x140] sm:$0xff] }
  0xff   :  { %v5532_v26 = vpack.c.bf16 %v4435_v23, %v4434_v22 }
 0x101   :  { %5465 = vmatpush3.bf16.msra.mxu1 %v5464_v27  ;;  %v5534_v27 = vpack.c.bf16 %v4453_v25, %v4452_v24 }
 0x102   :  { %5467 = vmatprep.subr.bf16.mxu1 %v5466_v28  ;;  %v4436_v28 = vld [vmem:[%s9270_s30 + $0x150] sm:$0xff] }
 0x103   :  { %v5536_v32 = vpack.c.bf16 %v4437_v29, %v4436_v28 }
 0x105   :  { %5469 = vmatpush3.bf16.msra.mxu1 %v5468_v33  ;;  %v5538_v33 = vpack.c.bf16 %v4455_v31, %v4454_v30 }
 0x106   :  { %5471 = vmatprep.subr.bf16.mxu1 %v5470_v34  ;;  %v4438_v34 = vld [vmem:[%s9270_s30 + $0x160] sm:$0xff] }
 0x107   :  { %v5540_v38 = vpack.c.bf16 %v4439_v35, %v4438_v34 }
 0x109   :  { %5473 = vmatpush3.bf16.msra.mxu1 %v5472_v39  ;;  %v5542_v39 = vpack.c.bf16 %v4457_v37, %v4456_v36 }
 0x10a   :  { %5475 = vmatprep.subr.bf16.mxu1 %v5474_v40  ;;  %v4440_v40 = vld [vmem:[%s9270_s30 + $0x170] sm:$0xff] }
 0x10b   :  { %v5544_v42 = vpack.c.bf16 %v4441_v41, %v4440_v40 }
 0x10d   :  { %5477 = vmatpush3.bf16.msra.mxu1 %v5476_v45 }
 0x10e   :  { %5479 = vmatprep.subr.bf16.mxu1 %v5478_v46  ;;  %v4384_v46 = vld [vmem:[%s9274_s4] ss:$0 sm:$0xff] }
 0x111   :  { %5481 = vmatpush3.bf16.msra.mxu1 %v5480_v51 }
 0x112   :  { %5515 = vmatprep.subr.bf16.mxu1 %v5514_v52 }
 0x114   :  { %524 = vmatmul.mubr.f32.vlgmr.msra.gmra.mrb[4].mxu1 %v6665_v4 }
 0x115   :  { %528 = vmatprep.mubr.f32.mxu1 %v6683_v13  ;;  %5517 = vmatpush3.bf16.msra.mxu1 %v5516_v61 }
 0x116   :  { %5519 = vmatprep.subr.bf16.mxu1 %v5518_v62 }
 0x118   :  { %529 = vmatmul.mubr.f32.gmra.mrb[6].mxu1 %v6685_v15 }
 0x119   :  { %5521 = vmatpush3.bf16.msra.mxu1 %v5520_v5  ;;  %1093 = vmatprep.mubr.f32.mxu1 %v6663_v2 }
 0x11a   :  { %5523 = vmatprep.subr.bf16.mxu1 %v5522_v6 }
 0x11d   :  { %5525 = vmatpush3.bf16.msra.mxu1 %v5524_v12 }
 0x11e   :  { %5527 = vmatprep.subr.bf16.mxu1 %v5526_v14 }
 0x121   :  { %5529 = vmatpush3.bf16.msra.mxu1 %v5528_v20 }
 0x122   :  { %5531 = vmatprep.subr.bf16.mxu1 %v5530_v21 }
 0x125   :  { %5533 = vmatpush3.bf16.msra.mxu1 %v5532_v26 }
 0x126   :  { %5535 = vmatprep.subr.bf16.mxu1 %v5534_v27 }
 0x129   :  { %5537 = vmatpush3.bf16.msra.mxu1 %v5536_v32 }
 0x12a   :  { %5539 = vmatprep.subr.bf16.mxu1 %v5538_v33 }
 0x12d   :  { %5541 = vmatpush3.bf16.msra.mxu1 %v5540_v38 }
 0x12e   :  { %5543 = vmatprep.subr.bf16.mxu1 %v5542_v39 }
 0x131   :  { %5545 = vmatpush3.bf16.msra.mxu1 %v5544_v42  ;;  %v4408_v42 = vld [vmem:[%s9269_s2 + $0x180] sm:$0xff] }
 0x132   :  { %5318 = vmatprep.subr.mxu1 %v6274_v7 }
 0x134   :  { %1094 = vmatmul.mubr.f32.vlgmr.msra.gmra.mrb[8].mxu1 %v6665_v4 }
 0x135   :  { %1098 = vmatprep.mubr.f32.mxu1 %v6683_v13 }
 0x138   :  { %1099 = vmatmul.mubr.f32.gmra.mrb[10].mxu1 %v6685_v15 }
 0x139   :  { %5320 = vmatprep.mubr.msk.f32.mxu1 %vm6275_vm1, %v6274_v7 }
 0x1c7   :  { %v4807_v43 = vpop.f32.mrb[0].mxu1  ;;  %v4845_v44 = vpop.f32.mrb[4].mxu0 }
 0x1c8   :  { %v4808_v45 = vpop.f32.mrb[1].mxu1  ;;  %v4846_v47 = vpop.f32.mrb[5].mxu0 }
 0x1c9   :  { %v4809_v48 = vadd.f32 %v4808_v45, %v4807_v43  ;;  %v4847_v49 = vadd.f32 %v4846_v47, %v4845_v44  ;;  %v4409_v43 = vld [vmem:[%s9269_s2 + $0x188] sm:$0xff]  ;;  %v4392_v47 = vld [vmem:[%s9269_s2 + $0x100] sm:$0xff] }
 0x1cb   :  { %v412_v51 = vadd.f32 %v4847_v49, %v4384_v46  ;;  %v4810_v52 = vpop.f32.mrb[2].mxu1  ;;  %v4848_v56 = vpop.f32.mrb[6].mxu0  ;;  %v298_v62 = vadd.f32 %v4809_v48, %v4383_v50  ;;  %v4393_v48 = vld [vmem:[%s9269_s2 + $0x108] sm:$0xff]  ;;  %v4410_v49 = vld [vmem:[%s9269_s2 + $0x190] sm:$0xff] }
 0x1cc   :  { %v4811_v58 = vpop.f32.mrb[3].mxu1  ;;  %v4849_v59 = vpop.f32.mrb[7].mxu0 }
 0x1cd   :  { %v4812_v60 = vadd.f32 %v4811_v58, %v4810_v52  ;;  %v4850_v61 = vadd.f32 %v4849_v59, %v4848_v56  ;;  %5299 = vmatpush3.xpose.msk.msra.mxu0 %vm534_vm2, %v412_v51  ;;  %v5484_v52 = vpack.c.bf16 %v4393_v48, %v4392_v47  ;;  %v4394_v59 = vld [vmem:[%s9269_s2 + $0x110] sm:$0xff] }
 0x1ce   :  { %5303 = vmatprep.subr.mxu0 %v6274_v7 }
 0x1cf   :  { %v417_v63 = vadd.f32 %v4850_v61, %v4384_v46  ;;  %v303_v0 = vadd.f32 %v4812_v60, %v4383_v50  ;;  %v5482_v46 = vpack.c.bf16 %v4409_v43, %v4408_v42  ;;  %v4411_v50 = vld [vmem:[%s9269_s2 + $0x198] sm:$0xff]  ;;  %v4412_v61 = vld [vmem:[%s9269_s2 + $0x1a0] sm:$0xff] }
 0x1d0   :  { %5301 = vmatmul.mubr.msk.f32.vlgmr.msra.gmra.mrb[8].mxu0 %vm534_vm2, %v298_v62  ;;  %v5486_v58 = vpack.c.bf16 %v4411_v50, %v4410_v49  ;;  %v4395_v60 = vld [vmem:[%s9269_s2 + $0x118] sm:$0xff]  ;;  %v4413_v62 = vld [vmem:[%s9269_s2 + $0x1a8] sm:$0xff]  ;;  %v4460_v43 = vld [vmem:[%s9272_s25 + $0x100] sm:$0xff] }
 0x1d1   :  { %5304 = vmatpush3.xpose.msk.msra.mxu0 %vm534_vm2, %v417_v63  ;;  %5305 = vmatprep.mubr.msk.f32.mxu0 %vm6275_vm1, %v6274_v7  ;;  %v5488_v63 = vpack.c.bf16 %v4395_v60, %v4394_v59  ;;  %v4462_v49 = vld [vmem:[%s9272_s25 + $0x110] sm:$0xff]  ;;  %v4463_v50 = vld [vmem:[%s9272_s25 + $0x118] sm:$0xff]  ;;  %v4464_v59 = vld [vmem:[%s9272_s25 + $0x120] sm:$0xff] }
 0x1d2   :  { %5308 = vmatprep.subr.mxu0 %v6274_v7  ;;  %v4465_v60 = vld [vmem:[%s9272_s25 + $0x128] sm:$0xff] }
 0x1d4   :  { %5306 = vmatmul.mubr.msk.f32.vlgmr.msra.gmra.mrb[10].mxu0 %vm534_vm2, %v303_v0  ;;  %v5490_v0 = vpack.c.bf16 %v4413_v62, %v4412_v61  ;;  %v4482_v61 = vld [vmem:[%s9272_s25 + $0x1b0] sm:$0xff]  ;;  %v4483_v62 = vld [vmem:[%s9272_s25 + $0x1b8] sm:$0xff] }
 0x1d5   :  { %5310 = vmatprep.mubr.msk.f32.mxu0 %vm6275_vm1, %v6274_v7 }
 0x1e7   :  { %v4883_v1 = vpop.f32.mrb[4].mxu1 }
 0x1e8   :  { %v4884_v5 = vpop.f32.mrb[5].mxu1 }
 0x1e9   :  { %v4885_v6 = vadd.f32 %v4884_v5, %v4883_v1  ;;  %v4396_v1 = vld [vmem:[%s9269_s2 + $0x120] sm:$0xff]  ;;  %v4414_v5 = vld [vmem:[%s9269_s2 + $0x1b0] sm:$0xff] }
 0x1eb   :  { %v526_v8 = vadd.f32 %v4885_v6, %v4385_v3  ;;  %v4886_v9 = vpop.f32.mrb[6].mxu1  ;;  %v4415_v6 = vld [vmem:[%s9269_s2 + $0x1b8] sm:$0xff] }
 0x1ec   :  { %v4887_v10 = vpop.f32.mrb[7].mxu1 }
 0x1ed   :  { %v4888_v11 = vadd.f32 %v4887_v10, %v4886_v9  ;;  %5309 = vmatpush3.msra.mxu0 %v526_v8  ;;  %v5494_v9 = vpack.c.bf16 %v4415_v6, %v4414_v5  ;;  %v4398_v10 = vld [vmem:[%s9269_s2 + $0x130] sm:$0xff]  ;;  %v4484_v5 = vld [vmem:[%s9272_s25 + $0x1c0] sm:$0xff]  ;;  %v4485_v6 = vld [vmem:[%s9272_s25 + $0x1c8] sm:$0xff] }
 0x1ee   :  { %5313 = vmatprep.subr.mxu0 %v6274_v7 }
 0x1ef   :  { %v531_v12 = vadd.f32 %v4888_v11, %v4385_v3  ;;  %v4397_v3 = vld [vmem:[%s9269_s2 + $0x128] sm:$0xff]  ;;  %v4399_v11 = vld [vmem:[%s9269_s2 + $0x138] sm:$0xff] }
 0x1f0   :  { %v5492_v8 = vpack.c.bf16 %v4397_v3, %v4396_v1  ;;  %v4466_v1 = vld [vmem:[%s9272_s25 + $0x130] sm:$0xff]  ;;  %v4467_v3 = vld [vmem:[%s9272_s25 + $0x138] sm:$0xff] }
 0x207   :  { %v4967_v14 = vpop.f32.mrb[8].mxu1 }
 0x208   :  { %v4968_v17 = vpop.f32.mrb[9].mxu1 }
 0x209   :  { %v4969_v18 = vadd.f32 %v4968_v17, %v4967_v14  ;;  %v4417_v14 = vld [vmem:[%s9269_s2 + $0x1c8] sm:$0xff] }
 0x20b   :  { %v1096_v19 = vadd.f32 %v4969_v18, %v4459_v16  ;;  %v4970_v20 = vpop.f32.mrb[10].mxu1  ;;  %v4400_v18 = vld [vmem:[%s9269_s2 + $0x140] sm:$0xff] }
 0x20c   :  { %v4971_v21 = vpop.f32.mrb[11].mxu1 }
 0x20d   :  { %v4972_v22 = vadd.f32 %v4971_v21, %v4970_v20  ;;  %5319 = vmatpush3.xpose.msk.msra.mxu1 %vm534_vm2, %v1096_v19  ;;  %v4401_v19 = vld [vmem:[%s9269_s2 + $0x148] sm:$0xff]  ;;  %v4418_v20 = vld [vmem:[%s9269_s2 + $0x1d0] sm:$0xff]  ;;  %v4419_v21 = vld [vmem:[%s9269_s2 + $0x1d8] sm:$0xff] }
 0x20e   :  { %5323 = vmatprep.subr.mxu1 %v6274_v7 }
 0x20f   :  { %v6891_v23 = vadd.f32 %v4972_v22, %v4459_v16  ;;  %v5496_v16 = vpack.c.bf16 %v4399_v11, %v4398_v10  ;;  %v5500_v22 = vpack.c.bf16 %v4401_v19, %v4400_v18  ;;  %v4468_v10 = vld [vmem:[%s9272_s25 + $0x140] sm:$0xff]  ;;  %v4469_v11 = vld [vmem:[%s9272_s25 + $0x148] sm:$0xff]  ;;  %v4470_v18 = vld [vmem:[%s9272_s25 + $0x150] sm:$0xff] }
 0x210   :  { %v4471_v19 = vld [vmem:[%s9272_s25 + $0x158] sm:$0xff] }
 0x2a3   :  { %v607_v24 = vpop.f32.mrb[8].mxu0 }
 0x2a4   :  { %v5302_v25 = vpop.f32.mrb[9].mxu0  ;;  %v688_v26 = vsel %vm687_vm3, %v607_v24, -inf }
 0x2a5   :  { %689 = vmax.xlane.f32.xlu0 %v688_v26  ;;  %v4402_v25 = vld [vmem:[%s9269_s2 + $0x150] sm:$0xff]  ;;  %v4403_v26 = vld [vmem:[%s9269_s2 + $0x158] sm:$0xff] }
 0x2a7   :  { %v683_v27 = vpop.f32.mrb[10].mxu0 }
 0x2a8   :  { %v5307_v28 = vpop.f32.mrb[11].mxu0  ;;  %v691_v29 = vsel %vm687_vm3, %v683_v27, -inf }
 0x2a9   :  { %692 = vmax.xlane.f32.xlu0 %v691_v29  ;;  %v4421_v28 = vld [vmem:[%s9269_s2 + $0x1e8] sm:$0xff]  ;;  %v5504_v29 = vpack.c.bf16 %v4403_v26, %v4402_v25  ;;  %v4472_v25 = vld [vmem:[%s9272_s25 + $0x160] sm:$0xff] }
 0x2aa   :  { %v4473_v26 = vld [vmem:[%s9272_s25 + $0x168] sm:$0xff] }
 0x332   :  { %v690_v30 = vpop.xlane.xlu0 %689 }
 0x333   :  { %v694_v31 = vsub.f32 %v607_v24, %v690_v30  ;;  %v5502_v24 = vpack.c.bf16 %v4419_v21, %v4418_v20  ;;  %v4488_v20 = vld [vmem:[%s9272_s25 + $0x1e0] sm:$0xff]  ;;  %v4489_v21 = vld [vmem:[%s9272_s25 + $0x1e8] sm:$0xff] }
 0x335   :  { %v696_v32 = vmul.f32 1.442695, %v694_v31  ;;  %v4404_v31 = vld [vmem:[%s9269_s2 + $0x160] sm:$0xff] }
 0x336   :  { %v693_v33 = vpop.xlane.xlu0 %692 }
 0x337   :  { %6202 = vpow2.f32 %v696_v32  ;;  %v695_v34 = vsub.f32 %v683_v27, %v693_v33  ;;  %v4420_v27 = vld [vmem:[%s9269_s2 + $0x1e0] sm:$0xff]  ;;  %v4405_v32 = vld [vmem:[%s9269_s2 + $0x168] sm:$0xff]  ;;  %v4422_v33 = vld [vmem:[%s9269_s2 + $0x1f0] sm:$0xff] }
 0x338   :  { %v5506_v30 = vpack.c.bf16 %v4421_v28, %v4420_v27  ;;  %v4490_v27 = vld [vmem:[%s9272_s25 + $0x1f0] sm:$0xff]  ;;  %v4491_v28 = vld [vmem:[%s9272_s25 + $0x1f8] sm:$0xff] }
 0x339   :  { %v698_v35 = vmul.f32 1.442695, %v695_v34  ;;  %v4423_v34 = vld [vmem:[%s9269_s2 + $0x1f8] sm:$0xff] }
 0x33b   :  { %6204 = vpow2.f32 %v698_v35  ;;  %v5508_v35 = vpack.c.bf16 %v4405_v32, %v4404_v31  ;;  %v4474_v31 = vld [vmem:[%s9272_s25 + $0x170] sm:$0xff]  ;;  %v4475_v32 = vld [vmem:[%s9272_s25 + $0x178] sm:$0xff] }
 0x341   :  { %v6203_v36 = vpop.eup %6202 }
 0x342   :  { %v700_v37 = vsel %vm687_vm3, %v6203_v36, 0.0 }
 0x343   :  { %701 = vadd.xlane.f32.xlu1 %v700_v37  ;;  %v4406_v37 = vld [vmem:[%s9269_s2 + $0x170] sm:$0xff] }
 0x345   :  { %v6205_v38 = vpop.eup %6204 }
 0x346   :  { %v703_v39 = vsel %vm687_vm3, %v6205_v38, 0.0 }
 0x347   :  { %704 = vadd.xlane.f32.xlu1 %v703_v39  ;;  %v4476_v39 = vld [vmem:[%s9272_s25 + $0x180] sm:$0xff] }
 0x3d0   :  { %v702_v40 = vpop.xlane.xlu1 %701 }
 0x3d1   :  { %6206 = vrcp.f32 %v702_v40  ;;  %v4477_v40 = vld [vmem:[%s9272_s25 + $0x188] sm:$0xff] }
 0x3d2   :  { %v5546_v42 = vpack.c.bf16 %v4477_v40, %v4476_v39  ;;  %v4538_v39 = vld [vmem:[%s9269_s2 + $0x290] sm:$0xff]  ;;  %v4539_v40 = vld [vmem:[%s9269_s2 + $0x298] sm:$0xff] }
 0x3d4   :  { %v705_v41 = vpop.xlane.xlu1 %704 }
 0x3d5   :  { %6208 = vrcp.f32 %v705_v41 }
 0x3db   :  { %v6207_v44 = vpop.eup %6206 }
 0x3dc   :  { %v708_v45 = vmul.f32 %v6207_v44, %v6203_v36  ;;  %v5510_v36 = vpack.c.bf16 %v4423_v34, %v4422_v33  ;;  %v4461_v44 = vld [vmem:[%s9272_s25 + $0x108] sm:$0xff]  ;;  %v4536_v33 = vld [vmem:[%s9269_s2 + $0x280] sm:$0xff] }
 0x3dd   :  { %v5548_v47 = vpack.c.bf16 %v4461_v44, %v4460_v43  ;;  %v4537_v34 = vld [vmem:[%s9269_s2 + $0x288] sm:$0xff]  ;;  %v4522_v43 = vld [vmem:[%s9269_s2 + $0x210] sm:$0xff]  ;;  %v4523_v44 = vld [vmem:[%s9269_s2 + $0x218] sm:$0xff] }
 0x3de   :  { %5311 = vmatmul.mubr.msk.f32.vlgmr.msra.gmra.mrb[12].mxu0 %vm687_vm3, %v708_v45  ;;  %v4478_v45 = vld [vmem:[%s9272_s25 + $0x190] sm:$0xff] }
 0x3df   :  { %v6209_v51 = vpop.eup %6208  ;;  %5314 = vmatpush3.msra.mxu0 %v531_v12  ;;  %5315 = vmatprep.mubr.msk.f32.mxu0 %vm6275_vm1, %v6274_v7  ;;  %v4416_v12 = vld [vmem:[%s9269_s2 + $0x1c0] sm:$0xff] }
 0x3e0   :  { %v709_v56 = vmul.f32 %v6209_v51, %v6205_v38  ;;  %5483 = vmatprep.subr.bf16.mxu0 %v5482_v46  ;;  %v5498_v17 = vpack.c.bf16 %v4417_v14, %v4416_v12  ;;  %v4407_v38 = vld [vmem:[%s9269_s2 + $0x178] sm:$0xff]  ;;  %v4480_v51 = vld [vmem:[%s9272_s25 + $0x1a0] sm:$0xff]  ;;  %v4486_v12 = vld [vmem:[%s9272_s25 + $0x1d0] sm:$0xff] }
 0x3e1   :  { %v5512_v41 = vpack.c.bf16 %v4407_v38, %v4406_v37  ;;  %v4479_v46 = vld [vmem:[%s9272_s25 + $0x198] sm:$0xff]  ;;  %v4520_v37 = vld [vmem:[%s9269_s2 + $0x200] sm:$0xff]  ;;  %v4521_v38 = vld [vmem:[%s9269_s2 + $0x208] sm:$0xff] }
 0x3e2   :  { %5316 = vmatmul.mubr.msk.f32.vlgmr.msra.gmra.mrb[14].mxu0 %vm687_vm3, %v709_v56  ;;  %v5550_v48 = vpack.c.bf16 %v4479_v46, %v4478_v45  ;;  %v5552_v56 = vpack.c.bf16 %v4463_v50, %v4462_v49  ;;  %v4487_v14 = vld [vmem:[%s9272_s25 + $0x1d8] sm:$0xff]  ;;  %v4540_v45 = vld [vmem:[%s9269_s2 + $0x2a0] sm:$0xff]  ;;  %v4541_v46 = vld [vmem:[%s9269_s2 + $0x2a8] sm:$0xff] }
 0x3e3   :  { %5485 = vmatpush3.bf16.msra.mxu0 %v5484_v52  ;;  %977 = vmatprep.mubr.f32.mxu0 %v6663_v2  ;;  %v4481_v52 = vld [vmem:[%s9272_s25 + $0x1a8] sm:$0xff]  ;;  %v4524_v49 = vld [vmem:[%s9269_s2 + $0x220] sm:$0xff] }
 0x3e4   :  { %5487 = vmatprep.subr.bf16.mxu0 %v5486_v58  ;;  %v5554_v58 = vpack.c.bf16 %v4481_v52, %v4480_v51  ;;  %v4525_v50 = vld [vmem:[%s9269_s2 + $0x228] sm:$0xff]  ;;  %v4542_v51 = vld [vmem:[%s9269_s2 + $0x2b0] sm:$0xff]  ;;  %v4543_v52 = vld [vmem:[%s9269_s2 + $0x2b8] sm:$0xff] }
 0x3e7   :  { %5489 = vmatpush3.bf16.msra.mxu0 %v5488_v63  ;;  %v5556_v63 = vpack.c.bf16 %v4465_v60, %v4464_v59  ;;  %v4526_v59 = vld [vmem:[%s9269_s2 + $0x230] sm:$0xff]  ;;  %v4527_v60 = vld [vmem:[%s9269_s2 + $0x238] sm:$0xff] }
 0x3e8   :  { %5491 = vmatprep.subr.bf16.mxu0 %v5490_v0  ;;  %v5558_v0 = vpack.c.bf16 %v4483_v62, %v4482_v61  ;;  %v4544_v61 = vld [vmem:[%s9269_s2 + $0x2c0] sm:$0xff]  ;;  %v4545_v62 = vld [vmem:[%s9269_s2 + $0x2c8] sm:$0xff] }
 0x3eb   :  { %5493 = vmatpush3.bf16.msra.mxu0 %v5492_v8  ;;  %v5560_v8 = vpack.c.bf16 %v4467_v3, %v4466_v1  ;;  %v4528_v1 = vld [vmem:[%s9269_s2 + $0x240] sm:$0xff]  ;;  %v4529_v3 = vld [vmem:[%s9269_s2 + $0x248] sm:$0xff] }
 0x3ec   :  { %5495 = vmatprep.subr.bf16.mxu0 %v5494_v9  ;;  %v5562_v9 = vpack.c.bf16 %v4485_v6, %v4484_v5  ;;  %v4546_v5 = vld [vmem:[%s9269_s2 + $0x2d0] sm:$0xff]  ;;  %v4547_v6 = vld [vmem:[%s9269_s2 + $0x2d8] sm:$0xff] }
 0x3ef   :  { %5497 = vmatpush3.bf16.msra.mxu0 %v5496_v16  ;;  %v5564_v16 = vpack.c.bf16 %v4469_v11, %v4468_v10  ;;  %v4530_v10 = vld [vmem:[%s9269_s2 + $0x250] sm:$0xff]  ;;  %v4531_v11 = vld [vmem:[%s9269_s2 + $0x258] sm:$0xff] }
 0x3f0   :  { %5499 = vmatprep.subr.bf16.mxu0 %v5498_v17  ;;  %v5566_v17 = vpack.c.bf16 %v4487_v14, %v4486_v12  ;;  %v4548_v12 = vld [vmem:[%s9269_s2 + $0x2e0] sm:$0xff]  ;;  %v4549_v14 = vld [vmem:[%s9269_s2 + $0x2e8] sm:$0xff] }
 0x3f3   :  { %5501 = vmatpush3.bf16.msra.mxu0 %v5500_v22  ;;  %v5568_v22 = vpack.c.bf16 %v4471_v19, %v4470_v18  ;;  %v4532_v18 = vld [vmem:[%s9269_s2 + $0x260] sm:$0xff]  ;;  %v4533_v19 = vld [vmem:[%s9269_s2 + $0x268] sm:$0xff] }
 0x3f4   :  { %5503 = vmatprep.subr.bf16.mxu0 %v5502_v24  ;;  %v5570_v24 = vpack.c.bf16 %v4489_v21, %v4488_v20  ;;  %v4550_v20 = vld [vmem:[%s9269_s2 + $0x2f0] sm:$0xff]  ;;  %v4551_v21 = vld [vmem:[%s9269_s2 + $0x2f8] sm:$0xff] }
 0x3f7   :  { %5505 = vmatpush3.bf16.msra.mxu0 %v5504_v29  ;;  %v5572_v29 = vpack.c.bf16 %v4473_v26, %v4472_v25  ;;  %v4534_v25 = vld [vmem:[%s9269_s2 + $0x270] sm:$0xff]  ;;  %v4535_v26 = vld [vmem:[%s9269_s2 + $0x278] sm:$0xff] }
 0x3f8   :  { %5507 = vmatprep.subr.bf16.mxu0 %v5506_v30  ;;  %v5574_v30 = vpack.c.bf16 %v4491_v28, %v4490_v27  ;;  %v4604_v27 = vld [vmem:[%s9272_s25 + $0x280] sm:$0xff]  ;;  %v4605_v28 = vld [vmem:[%s9272_s25 + $0x288] sm:$0xff] }
 0x3fb   :  { %5509 = vmatpush3.bf16.msra.mxu0 %v5508_v35  ;;  %v5576_v35 = vpack.c.bf16 %v4475_v32, %v4474_v31  ;;  %v4588_v31 = vld [vmem:[%s9272_s25 + $0x200] sm:$0xff]  ;;  %v4589_v32 = vld [vmem:[%s9272_s25 + $0x208] sm:$0xff] }
 0x3fc   :  { %5511 = vmatprep.subr.bf16.mxu0 %v5510_v36  ;;  %v5610_v36 = vpack.c.bf16 %v4537_v34, %v4536_v33  ;;  %v4606_v33 = vld [vmem:[%s9272_s25 + $0x290] sm:$0xff]  ;;  %v4607_v34 = vld [vmem:[%s9272_s25 + $0x298] sm:$0xff] }
 0x3ff   :  { %5513 = vmatpush3.bf16.msra.mxu0 %v5512_v41  ;;  %v5612_v41 = vpack.c.bf16 %v4521_v38, %v4520_v37  ;;  %v4590_v37 = vld [vmem:[%s9272_s25 + $0x210] sm:$0xff]  ;;  %v4591_v38 = vld [vmem:[%s9272_s25 + $0x218] sm:$0xff] }
 0x400   :  { %5547 = vmatprep.subr.bf16.mxu0 %v5546_v42  ;;  %v5614_v42 = vpack.c.bf16 %v4539_v40, %v4538_v39  ;;  %v4608_v39 = vld [vmem:[%s9272_s25 + $0x2a0] sm:$0xff]  ;;  %v4609_v40 = vld [vmem:[%s9272_s25 + $0x2a8] sm:$0xff] }
 0x402   :  { %978 = vmatmul.mubr.f32.vlgmr.msra.gmra.mrb[16].mxu0 %v6665_v4 }
 0x403   :  { %982 = vmatprep.mubr.f32.mxu0 %v6683_v13  ;;  %5549 = vmatpush3.bf16.msra.mxu0 %v5548_v47  ;;  %v5616_v47 = vpack.c.bf16 %v4523_v44, %v4522_v43  ;;  %v4592_v43 = vld [vmem:[%s9272_s25 + $0x220] sm:$0xff]  ;;  %v4593_v44 = vld [vmem:[%s9272_s25 + $0x228] sm:$0xff] }
 0x404   :  { %5551 = vmatprep.subr.bf16.mxu0 %v5550_v48  ;;  %v5618_v48 = vpack.c.bf16 %v4541_v46, %v4540_v45  ;;  %v4610_v45 = vld [vmem:[%s9272_s25 + $0x2b0] sm:$0xff]  ;;  %v4611_v46 = vld [vmem:[%s9272_s25 + $0x2b8] sm:$0xff] }
 0x406   :  { %983 = vmatmul.mubr.f32.gmra.mrb[18].mxu0 %v6685_v15 }
 0x407   :  { %5553 = vmatpush3.bf16.msra.mxu0 %v5552_v56  ;;  %1209 = vmatprep.mubr.f32.mxu0 %v6663_v2  ;;  %v5620_v56 = vpack.c.bf16 %v4525_v50, %v4524_v49  ;;  %v4594_v49 = vld [vmem:[%s9272_s25 + $0x230] sm:$0xff]  ;;  %v4595_v50 = vld [vmem:[%s9272_s25 + $0x238] sm:$0xff] }
 0x408   :  { %5555 = vmatprep.subr.bf16.mxu0 %v5554_v58  ;;  %v5622_v58 = vpack.c.bf16 %v4543_v52, %v4542_v51  ;;  %v4612_v51 = vld [vmem:[%s9272_s25 + $0x2c0] sm:$0xff]  ;;  %v4613_v52 = vld [vmem:[%s9272_s25 + $0x2c8] sm:$0xff] }
 0x40b   :  { %5557 = vmatpush3.bf16.msra.mxu0 %v5556_v63  ;;  %v5624_v63 = vpack.c.bf16 %v4527_v60, %v4526_v59  ;;  %v4596_v59 = vld [vmem:[%s9272_s25 + $0x240] sm:$0xff]  ;;  %v4597_v60 = vld [vmem:[%s9272_s25 + $0x248] sm:$0xff] }
 0x40c   :  { %5559 = vmatprep.subr.bf16.mxu0 %v5558_v0  ;;  %v5626_v0 = vpack.c.bf16 %v4545_v62, %v4544_v61  ;;  %v4614_v61 = vld [vmem:[%s9272_s25 + $0x2d0] sm:$0xff]  ;;  %v4615_v62 = vld [vmem:[%s9272_s25 + $0x2d8] sm:$0xff] }
 0x40f   :  { %5561 = vmatpush3.bf16.msra.mxu0 %v5560_v8  ;;  %v5628_v8 = vpack.c.bf16 %v4529_v3, %v4528_v1  ;;  %v4598_v1 = vld [vmem:[%s9272_s25 + $0x250] sm:$0xff]  ;;  %v4599_v3 = vld [vmem:[%s9272_s25 + $0x258] sm:$0xff] }
 0x410   :  { %5563 = vmatprep.subr.bf16.mxu0 %v5562_v9  ;;  %v5630_v9 = vpack.c.bf16 %v4547_v6, %v4546_v5  ;;  %v4616_v5 = vld [vmem:[%s9272_s25 + $0x2e0] sm:$0xff]  ;;  %v4617_v6 = vld [vmem:[%s9272_s25 + $0x2e8] sm:$0xff] }
 0x413   :  { %5565 = vmatpush3.bf16.msra.mxu0 %v5564_v16  ;;  %v5632_v16 = vpack.c.bf16 %v4531_v11, %v4530_v10  ;;  %v4600_v10 = vld [vmem:[%s9272_s25 + $0x260] sm:$0xff]  ;;  %v4601_v11 = vld [vmem:[%s9272_s25 + $0x268] sm:$0xff] }
 0x414   :  { %5567 = vmatprep.subr.bf16.mxu0 %v5566_v17  ;;  %v5634_v17 = vpack.c.bf16 %v4549_v14, %v4548_v12  ;;  %v4618_v12 = vld [vmem:[%s9272_s25 + $0x2f0] sm:$0xff]  ;;  %v4619_v14 = vld [vmem:[%s9272_s25 + $0x2f8] sm:$0xff] }
 0x417   :  { %5569 = vmatpush3.bf16.msra.mxu0 %v5568_v22  ;;  %v5636_v22 = vpack.c.bf16 %v4533_v19, %v4532_v18  ;;  %v4602_v18 = vld [vmem:[%s9272_s25 + $0x270] sm:$0xff]  ;;  %v4603_v19 = vld [vmem:[%s9272_s25 + $0x278] sm:$0xff] }
 0x418   :  { %5571 = vmatprep.subr.bf16.mxu0 %v5570_v24  ;;  %v5638_v24 = vpack.c.bf16 %v4551_v21, %v4550_v20  ;;  %v4662_v20 = vld [vmem:[%s9269_s2 + $0x380] sm:$0xff]  ;;  %v4663_v21 = vld [vmem:[%s9269_s2 + $0x388] sm:$0xff] }
 0x41b   :  { %5573 = vmatpush3.bf16.msra.mxu0 %v5572_v29  ;;  %v5640_v29 = vpack.c.bf16 %v4535_v26, %v4534_v25  ;;  %v4646_v25 = vld [vmem:[%s9269_s2 + $0x300] sm:$0xff]  ;;  %v4647_v26 = vld [vmem:[%s9269_s2 + $0x308] sm:$0xff] }
 0x41c   :  { %5575 = vmatprep.subr.bf16.mxu0 %v5574_v30  ;;  %v5674_v30 = vpack.c.bf16 %v4605_v28, %v4604_v27  ;;  %v4664_v27 = vld [vmem:[%s9269_s2 + $0x390] sm:$0xff]  ;;  %v4665_v28 = vld [vmem:[%s9269_s2 + $0x398] sm:$0xff] }
 0x41f   :  { %5577 = vmatpush3.bf16.msra.mxu0 %v5576_v35  ;;  %v5676_v35 = vpack.c.bf16 %v4589_v32, %v4588_v31  ;;  %v4648_v31 = vld [vmem:[%s9269_s2 + $0x310] sm:$0xff]  ;;  %v4649_v32 = vld [vmem:[%s9269_s2 + $0x318] sm:$0xff] }
 0x420   :  { %5611 = vmatprep.subr.bf16.mxu0 %v5610_v36  ;;  %v5678_v36 = vpack.c.bf16 %v4607_v34, %v4606_v33  ;;  %v4666_v33 = vld [vmem:[%s9269_s2 + $0x3a0] sm:$0xff]  ;;  %v4667_v34 = vld [vmem:[%s9269_s2 + $0x3a8] sm:$0xff] }
 0x422   :  { %1210 = vmatmul.mubr.f32.vlgmr.msra.gmra.mrb[20].mxu0 %v6665_v4 }
 0x423   :  { %1214 = vmatprep.mubr.f32.mxu0 %v6683_v13  ;;  %5613 = vmatpush3.bf16.msra.mxu0 %v5612_v41  ;;  %v5680_v41 = vpack.c.bf16 %v4591_v38, %v4590_v37  ;;  %v4650_v37 = vld [vmem:[%s9269_s2 + $0x320] sm:$0xff]  ;;  %v4651_v38 = vld [vmem:[%s9269_s2 + $0x328] sm:$0xff] }
 0x424   :  { %5615 = vmatprep.subr.bf16.mxu0 %v5614_v42  ;;  %v5682_v42 = vpack.c.bf16 %v4609_v40, %v4608_v39  ;;  %v4668_v39 = vld [vmem:[%s9269_s2 + $0x3b0] sm:$0xff]  ;;  %v4669_v40 = vld [vmem:[%s9269_s2 + $0x3b8] sm:$0xff] }
 0x426   :  { %1215 = vmatmul.mubr.f32.gmra.mrb[22].mxu0 %v6685_v15 }
 0x427   :  { %5617 = vmatpush3.bf16.msra.mxu0 %v5616_v47  ;;  %1828 = vmatprep.mubr.f32.mxu0 %v6663_v2  ;;  %v5684_v47 = vpack.c.bf16 %v4593_v44, %v4592_v43  ;;  %v4652_v43 = vld [vmem:[%s9269_s2 + $0x330] sm:$0xff]  ;;  %v4653_v44 = vld [vmem:[%s9269_s2 + $0x338] sm:$0xff] }
 0x428   :  { %5619 = vmatprep.subr.bf16.mxu0 %v5618_v48  ;;  %v5686_v48 = vpack.c.bf16 %v4611_v46, %v4610_v45  ;;  %v4670_v45 = vld [vmem:[%s9269_s2 + $0x3c0] sm:$0xff]  ;;  %v4671_v46 = vld [vmem:[%s9269_s2 + $0x3c8] sm:$0xff] }
 0x42b   :  { %5621 = vmatpush3.bf16.msra.mxu0 %v5620_v56  ;;  %v5688_v56 = vpack.c.bf16 %v4595_v50, %v4594_v49  ;;  %v4654_v49 = vld [vmem:[%s9269_s2 + $0x340] sm:$0xff]  ;;  %v4655_v50 = vld [vmem:[%s9269_s2 + $0x348] sm:$0xff] }
 0x42c   :  { %5623 = vmatprep.subr.bf16.mxu0 %v5622_v58  ;;  %v5690_v58 = vpack.c.bf16 %v4613_v52, %v4612_v51  ;;  %v4672_v51 = vld [vmem:[%s9269_s2 + $0x3d0] sm:$0xff]  ;;  %v4673_v52 = vld [vmem:[%s9269_s2 + $0x3d8] sm:$0xff] }
 0x42f   :  { %5625 = vmatpush3.bf16.msra.mxu0 %v5624_v63  ;;  %v5692_v63 = vpack.c.bf16 %v4597_v60, %v4596_v59  ;;  %v4656_v59 = vld [vmem:[%s9269_s2 + $0x350] sm:$0xff]  ;;  %v4657_v60 = vld [vmem:[%s9269_s2 + $0x358] sm:$0xff] }
 0x430   :  { %5627 = vmatprep.subr.bf16.mxu0 %v5626_v0  ;;  %v5694_v0 = vpack.c.bf16 %v4615_v62, %v4614_v61  ;;  %v4674_v61 = vld [vmem:[%s9269_s2 + $0x3e0] sm:$0xff]  ;;  %v4675_v62 = vld [vmem:[%s9269_s2 + $0x3e8] sm:$0xff] }
 0x433   :  { %5629 = vmatpush3.bf16.msra.mxu0 %v5628_v8  ;;  %v5696_v8 = vpack.c.bf16 %v4599_v3, %v4598_v1  ;;  %v4658_v1 = vld [vmem:[%s9269_s2 + $0x360] sm:$0xff]  ;;  %v4659_v3 = vld [vmem:[%s9269_s2 + $0x368] sm:$0xff] }
 0x434   :  { %5631 = vmatprep.subr.bf16.mxu0 %v5630_v9  ;;  %v5698_v9 = vpack.c.bf16 %v4617_v6, %v4616_v5  ;;  %v4676_v5 = vld [vmem:[%s9269_s2 + $0x3f0] sm:$0xff]  ;;  %v4677_v6 = vld [vmem:[%s9269_s2 + $0x3f8] sm:$0xff] }
 0x437   :  { %5633 = vmatpush3.bf16.msra.mxu0 %v5632_v16  ;;  %v5700_v16 = vpack.c.bf16 %v4601_v11, %v4600_v10  ;;  %v4660_v10 = vld [vmem:[%s9269_s2 + $0x370] sm:$0xff]  ;;  %v4661_v11 = vld [vmem:[%s9269_s2 + $0x378] sm:$0xff] }
 0x438   :  { %5635 = vmatprep.subr.bf16.mxu0 %v5634_v17  ;;  %v5702_v17 = vpack.c.bf16 %v4619_v14, %v4618_v12  ;;  %v4730_v12 = vld [vmem:[%s9272_s25 + $0x380] sm:$0xff]  ;;  %v4731_v14 = vld [vmem:[%s9272_s25 + $0x388] sm:$0xff] }
 0x43b   :  { %5637 = vmatpush3.bf16.msra.mxu0 %v5636_v22  ;;  %v5704_v22 = vpack.c.bf16 %v4603_v19, %v4602_v18  ;;  %v4714_v18 = vld [vmem:[%s9272_s25 + $0x300] sm:$0xff]  ;;  %v4715_v19 = vld [vmem:[%s9272_s25 + $0x308] sm:$0xff] }
 0x43c   :  { %5639 = vmatprep.subr.bf16.mxu0 %v5638_v24  ;;  %v5722_v24 = vpack.c.bf16 %v4663_v21, %v4662_v20  ;;  %v4732_v20 = vld [vmem:[%s9272_s25 + $0x390] sm:$0xff]  ;;  %v4733_v21 = vld [vmem:[%s9272_s25 + $0x398] sm:$0xff] }
 0x43f   :  { %5641 = vmatpush3.bf16.msra.mxu0 %v5640_v29  ;;  %v5724_v29 = vpack.c.bf16 %v4647_v26, %v4646_v25  ;;  %v4716_v25 = vld [vmem:[%s9272_s25 + $0x310] sm:$0xff]  ;;  %v4717_v26 = vld [vmem:[%s9272_s25 + $0x318] sm:$0xff] }
 0x440   :  { %5675 = vmatprep.subr.bf16.mxu0 %v5674_v30  ;;  %v5726_v30 = vpack.c.bf16 %v4665_v28, %v4664_v27  ;;  %v4734_v27 = vld [vmem:[%s9272_s25 + $0x3a0] sm:$0xff]  ;;  %v4735_v28 = vld [vmem:[%s9272_s25 + $0x3a8] sm:$0xff] }
 0x442   :  { %1829 = vmatmul.mubr.f32.vlgmr.msra.gmra.mrb[24].mxu0 %v6665_v4 }
 0x443   :  { %1833 = vmatprep.mubr.f32.mxu0 %v6683_v13  ;;  %5677 = vmatpush3.bf16.msra.mxu0 %v5676_v35  ;;  %v5728_v35 = vpack.c.bf16 %v4649_v32, %v4648_v31  ;;  %v4718_v31 = vld [vmem:[%s9272_s25 + $0x320] sm:$0xff]  ;;  %v4719_v32 = vld [vmem:[%s9272_s25 + $0x328] sm:$0xff] }
 0x444   :  { %5679 = vmatprep.subr.bf16.mxu0 %v5678_v36  ;;  %v5730_v36 = vpack.c.bf16 %v4667_v34, %v4666_v33  ;;  %v4736_v33 = vld [vmem:[%s9272_s25 + $0x3b0] sm:$0xff]  ;;  %v4737_v34 = vld [vmem:[%s9272_s25 + $0x3b8] sm:$0xff] }
 0x446   :  { %1834 = vmatmul.mubr.f32.gmra.mrb[26].mxu0 %v6685_v15 }
 0x447   :  { %5681 = vmatpush3.bf16.msra.mxu0 %v5680_v41  ;;  %2060 = vmatprep.mubr.f32.mxu0 %v6663_v2  ;;  %v5732_v41 = vpack.c.bf16 %v4651_v38, %v4650_v37  ;;  %v4720_v37 = vld [vmem:[%s9272_s25 + $0x330] sm:$0xff]  ;;  %v4721_v38 = vld [vmem:[%s9272_s25 + $0x338] sm:$0xff] }
 0x448   :  { %5683 = vmatprep.subr.bf16.mxu0 %v5682_v42  ;;  %v5734_v42 = vpack.c.bf16 %v4669_v40, %v4668_v39  ;;  %v4738_v39 = vld [vmem:[%s9272_s25 + $0x3c0] sm:$0xff]  ;;  %v4739_v40 = vld [vmem:[%s9272_s25 + $0x3c8] sm:$0xff] }
 0x44b   :  { %5685 = vmatpush3.bf16.msra.mxu0 %v5684_v47  ;;  %v5736_v47 = vpack.c.bf16 %v4653_v44, %v4652_v43  ;;  %v4722_v43 = vld [vmem:[%s9272_s25 + $0x340] sm:$0xff]  ;;  %v4723_v44 = vld [vmem:[%s9272_s25 + $0x348] sm:$0xff] }
 0x44c   :  { %5687 = vmatprep.subr.bf16.mxu0 %v5686_v48  ;;  %v5738_v48 = vpack.c.bf16 %v4671_v46, %v4670_v45  ;;  %v4740_v45 = vld [vmem:[%s9272_s25 + $0x3d0] sm:$0xff]  ;;  %v4741_v46 = vld [vmem:[%s9272_s25 + $0x3d8] sm:$0xff] }
 0x44f   :  { %5689 = vmatpush3.bf16.msra.mxu0 %v5688_v56  ;;  %v5740_v56 = vpack.c.bf16 %v4655_v50, %v4654_v49  ;;  %v4724_v49 = vld [vmem:[%s9272_s25 + $0x350] sm:$0xff]  ;;  %v4725_v50 = vld [vmem:[%s9272_s25 + $0x358] sm:$0xff] }
 0x450   :  { %5691 = vmatprep.subr.bf16.mxu0 %v5690_v58  ;;  %v5742_v58 = vpack.c.bf16 %v4673_v52, %v4672_v51  ;;  %v4742_v51 = vld [vmem:[%s9272_s25 + $0x3e0] sm:$0xff]  ;;  %v4743_v52 = vld [vmem:[%s9272_s25 + $0x3e8] sm:$0xff] }
 0x453   :  { %5693 = vmatpush3.bf16.msra.mxu0 %v5692_v63  ;;  %v5744_v63 = vpack.c.bf16 %v4657_v60, %v4656_v59  ;;  %v4726_v59 = vld [vmem:[%s9272_s25 + $0x360] sm:$0xff]  ;;  %v4727_v60 = vld [vmem:[%s9272_s25 + $0x368] sm:$0xff] }
 0x454   :  { %5695 = vmatprep.subr.bf16.mxu0 %v5694_v0  ;;  %v5746_v0 = vpack.c.bf16 %v4675_v62, %v4674_v61  ;;  %v4744_v61 = vld [vmem:[%s9272_s25 + $0x3f0] sm:$0xff]  ;;  %v4745_v62 = vld [vmem:[%s9272_s25 + $0x3f8] sm:$0xff] }
 0x457   :  { %5697 = vmatpush3.bf16.msra.mxu0 %v5696_v8  ;;  %v5748_v8 = vpack.c.bf16 %v4659_v3, %v4658_v1  ;;  %v4728_v1 = vld [vmem:[%s9272_s25 + $0x370] sm:$0xff]  ;;  %v4729_v3 = vld [vmem:[%s9272_s25 + $0x378] sm:$0xff] }
 0x458   :  { %5699 = vmatprep.subr.bf16.mxu0 %v5698_v9  ;;  %v5750_v9 = vpack.c.bf16 %v4677_v6, %v4676_v5  ;;  %v5816_v5 = vpack.c.bf16 %v4729_v3, %v4728_v1 }
 0x45b   :  { %5701 = vmatpush3.bf16.msra.mxu0 %v5700_v16  ;;  %v5752_v16 = vpack.c.bf16 %v4661_v11, %v4660_v10 }
 0x45c   :  { %5703 = vmatprep.subr.bf16.mxu0 %v5702_v17  ;;  %v5786_v17 = vpack.c.bf16 %v4731_v14, %v4730_v12  ;;  %v4425_v12 = vld [vmem:[%s9275_s6 + $0x1] ss:$0 sm:$0xff] }
 0x45f   :  { %5705 = vmatpush3.bf16.msra.mxu0 %v5704_v22  ;;  %v5788_v22 = vpack.c.bf16 %v4715_v19, %v4714_v18 }
 0x460   :  { %5723 = vmatprep.subr.bf16.mxu0 %v5722_v24  ;;  %v5790_v24 = vpack.c.bf16 %v4733_v21, %v4732_v20 }
 0x462   :  { %2061 = vmatmul.mubr.f32.vlgmr.msra.gmra.mrb[28].mxu0 %v6665_v4 }
 0x463   :  { %2065 = vmatprep.mubr.f32.mxu0 %v6683_v13  ;;  %5725 = vmatpush3.bf16.msra.mxu0 %v5724_v29  ;;  %v5792_v29 = vpack.c.bf16 %v4717_v26, %v4716_v25 }
 0x464   :  { %5727 = vmatprep.subr.bf16.mxu0 %v5726_v30  ;;  %v5794_v30 = vpack.c.bf16 %v4735_v28, %v4734_v27 }
 0x466   :  { %2066 = vmatmul.mubr.f32.gmra.mrb[30].mxu0 %v6685_v15 }
 0x467   :  { %5729 = vmatpush3.bf16.msra.mxu0 %v5728_v35  ;;  %2600 = vmatprep.mubr.f32.mxu0 %v6663_v2  ;;  %v5796_v35 = vpack.c.bf16 %v4719_v32, %v4718_v31 }
 0x468   :  { %5731 = vmatprep.subr.bf16.mxu0 %v5730_v36  ;;  %v5798_v36 = vpack.c.bf16 %v4737_v34, %v4736_v33 }
 0x46b   :  { %5733 = vmatpush3.bf16.msra.mxu0 %v5732_v41  ;;  %v5800_v41 = vpack.c.bf16 %v4721_v38, %v4720_v37 }
 0x46c   :  { %5735 = vmatprep.subr.bf16.mxu0 %v5734_v42  ;;  %v5802_v42 = vpack.c.bf16 %v4739_v40, %v4738_v39 }
 0x46f   :  { %5737 = vmatpush3.bf16.msra.mxu0 %v5736_v47  ;;  %v5804_v47 = vpack.c.bf16 %v4723_v44, %v4722_v43  ;;  %v7532_v43 = vld [vmem:[%s9237_s8 + $0x2] ss:$0 sm:$0xff] }
 0x470   :  { %5739 = vmatprep.subr.bf16.mxu0 %v5738_v48  ;;  %v5806_v48 = vpack.c.bf16 %v4741_v46, %v4740_v45 }
 0x473   :  { %5741 = vmatpush3.bf16.msra.mxu0 %v5740_v56  ;;  %v5808_v56 = vpack.c.bf16 %v4725_v50, %v4724_v49 }
 0x474   :  { %5743 = vmatprep.subr.bf16.mxu0 %v5742_v58  ;;  %v5810_v58 = vpack.c.bf16 %v4743_v52, %v4742_v51 }
 0x477   :  { %5745 = vmatpush3.bf16.msra.mxu0 %v5744_v63  ;;  %v5812_v63 = vpack.c.bf16 %v4727_v60, %v4726_v59 }
 0x478   :  { %5747 = vmatprep.subr.bf16.mxu0 %v5746_v0  ;;  %v5814_v0 = vpack.c.bf16 %v4745_v62, %v4744_v61  ;;  %v7546_v61 = vld [vmem:[%s9237_s8 + $0x3] ss:$0 sm:$0xff] }
 0x47b   :  { %5749 = vmatpush3.bf16.msra.mxu0 %v5748_v8 }
 0x47c   :  { %5751 = vmatprep.subr.bf16.mxu0 %v5750_v9 }
 0x47f   :  { %5753 = vmatpush3.bf16.msra.mxu0 %v5752_v16 }
 0x480   :  { %5787 = vmatprep.subr.bf16.mxu0 %v5786_v17 }
 0x482   :  { %2601 = vmatmul.mubr.f32.vlgmr.msra.gmra.mrb[32].mxu0 %v6665_v4 }
 0x483   :  { %2605 = vmatprep.mubr.f32.mxu0 %v6683_v13  ;;  %5789 = vmatpush3.bf16.msra.mxu0 %v5788_v22 }
 0x484   :  { %5791 = vmatprep.subr.bf16.mxu0 %v5790_v24  ;;  %v4493_v24 = vld [vmem:[%s9237_s8 + $0x1] ss:$0 sm:$0xff] }
 0x486   :  { %2606 = vmatmul.mubr.f32.gmra.mrb[34].mxu0 %v6685_v15 }
 0x487   :  { %5793 = vmatpush3.bf16.msra.mxu0 %v5792_v29  ;;  %2832 = vmatprep.mubr.f32.mxu0 %v6663_v2 }
 0x488   :  { %5795 = vmatprep.subr.bf16.mxu0 %v5794_v30 }
 0x48b   :  { %5797 = vmatpush3.bf16.msra.mxu0 %v5796_v35 }
 0x48c   :  { %5799 = vmatprep.subr.bf16.mxu0 %v5798_v36 }
 0x48f   :  { %5801 = vmatpush3.bf16.msra.mxu0 %v5800_v41 }
 0x490   :  { %5803 = vmatprep.subr.bf16.mxu0 %v5802_v42 }
 0x493   :  { %5805 = vmatpush3.bf16.msra.mxu0 %v5804_v47 }
 0x494   :  { %5807 = vmatprep.subr.bf16.mxu0 %v5806_v48 }
 0x497   :  { %5809 = vmatpush3.bf16.msra.mxu0 %v5808_v56 }
 0x498   :  { %5811 = vmatprep.subr.bf16.mxu0 %v5810_v58 }
 0x49b   :  { %5813 = vmatpush3.bf16.msra.mxu0 %v5812_v63 }
 0x49c   :  { %5815 = vmatprep.subr.bf16.mxu0 %v5814_v0 }
 0x49f   :  { %5817 = vmatpush3.bf16.msra.mxu0 %v5816_v5 }
 0x4a2   :  { %2833 = vmatmul.mubr.f32.vlgmr.msra.gmra.mrb[36].mxu0 %v6665_v4 }
 0x4a3   :  { %2837 = vmatprep.mubr.f32.mxu0 %v6683_v13 }
 0x4a6   :  { %2838 = vmatmul.mubr.f32.gmra.mrb[38].mxu0 %v6685_v15 }
 0x4b1   :  { %v7501_v6 = vpop.f32.mrb[12].mxu0 }
 0x4b2   :  { %v5312_v8 = vpop.f32.mrb[13].mxu0 }
 0x4b5   :  { %v7503_v9 = vpop.f32.mrb[14].mxu0 }
 0x4b6   :  { %v5317_v10 = vpop.f32.mrb[15].mxu0 }
 0x4d5   :  { %v4929_v11 = vpop.f32.mrb[16].mxu0 }
 0x4d6   :  { %v4930_v14 = vpop.f32.mrb[17].mxu0 }
 0x4d7   :  { %v4931_v16 = vadd.f32 %v4930_v14, %v4929_v11 }
 0x4d9   :  { %v980_v17 = vadd.f32 %v4931_v16, %v4425_v12  ;;  %v4932_v18 = vpop.f32.mrb[18].mxu0 }
 0x4da   :  { %v4933_v19 = vpop.f32.mrb[19].mxu0 }
 0x4db   :  { %v4934_v20 = vadd.f32 %v4933_v19, %v4932_v18  ;;  %5321 = vmatmul.mubr.msk.f32.vlgmr.msra.gmra.mrb[12].mxu1 %vm534_vm2, %v980_v17 }
 0x4dc   :  { %5324 = vmatpush3.xpose.msk.msra.mxu1 %vm534_vm2, %v6891_v23  ;;  %5325 = vmatprep.mubr.msk.f32.mxu1 %vm6275_vm1, %v6274_v7 }
 0x4dd   :  { %v985_v21 = vadd.f32 %v4934_v20, %v4425_v12  ;;  %5328 = vmatprep.subr.mxu1 %v6274_v7 }
 0x4df   :  { %5326 = vmatmul.mubr.msk.f32.vlgmr.msra.gmra.mrb[14].mxu1 %vm534_vm2, %v985_v21 }
 0x4e0   :  { %5330 = vmatprep.mubr.msk.f32.mxu1 %vm6275_vm1, %v6274_v7 }
 0x4f5   :  { %v5005_v22 = vpop.f32.mrb[20].mxu0 }
 0x4f6   :  { %v5006_v25 = vpop.f32.mrb[21].mxu0 }
 0x4f7   :  { %v5007_v26 = vadd.f32 %v5006_v25, %v5005_v22  ;;  %v4501_v25 = vld [vmem:[%s9238_s9 + $0x88] sm:$0xff] }
 0x4f9   :  { %v1212_v27 = vadd.f32 %v5007_v26, %v4493_v24  ;;  %v5008_v23 = vpop.f32.mrb[22].mxu0  ;;  %v4503_v26 = vld [vmem:[%s9238_s9 + $0x98] sm:$0xff] }
 0x4fa   :  { %v5009_v28 = vpop.f32.mrb[23].mxu0 }
 0x4fb   :  { %v5010_v29 = vadd.f32 %v5009_v28, %v5008_v23  ;;  %5329 = vmatpush3.msra.mxu1 %v1212_v27  ;;  %v5578_v28 = vpack.c.bf16 %v4503_v26, %v4501_v25 }
 0x4fc   :  { %5333 = vmatprep.subr.mxu1 %v6274_v7 }
 0x4fd   :  { %v7521_v30 = vadd.f32 %v5010_v29, %v4493_v24  ;;  %v4500_v29 = vld [vmem:[%s9238_s9 + $0x80] sm:$0xff] }
 0x515   :  { %v5051_v31 = vpop.f32.mrb[24].mxu0 }
 0x516   :  { %v5052_v32 = vpop.f32.mrb[25].mxu0 }
 0x517   :  { %v7523_v33 = vadd.f32 %v5052_v32, %v5051_v31  ;;  %v4502_v31 = vld [vmem:[%s9238_s9 + $0x90] sm:$0xff]  ;;  %v4505_v32 = vld [vmem:[%s9238_s9 + $0xa8] sm:$0xff] }
 0x519   :  { %v5054_v34 = vpop.f32.mrb[26].mxu0 }
 0x51a   :  { %v5055_v35 = vpop.f32.mrb[27].mxu0 }
 0x51b   :  { %v7525_v36 = vadd.f32 %v5055_v35, %v5054_v34  ;;  %v4507_v34 = vld [vmem:[%s9238_s9 + $0xb8] sm:$0xff] }
 0x535   :  { %v5127_v37 = vpop.f32.mrb[28].mxu0 }
 0x536   :  { %v5128_v38 = vpop.f32.mrb[29].mxu0 }
 0x537   :  { %v7527_v39 = vadd.f32 %v5128_v38, %v5127_v37  ;;  %v5580_v37 = vpack.c.bf16 %v4502_v31, %v4500_v29  ;;  %v869_v29 = vld [vmem:[%s9238_s9 + $0x68] sm:$0xff]  ;;  %v871_v31 = vld [vmem:[%s9238_s9 + $0x78] sm:$0xff] }
 0x539   :  { %v5130_v40 = vpop.f32.mrb[30].mxu0 }
 0x53a   :  { %v5131_v41 = vpop.f32.mrb[31].mxu0 }
 0x53b   :  { %v5132_v42 = vadd.f32 %v5131_v41, %v5130_v40  ;;  %v5582_v40 = vpack.c.bf16 %v4507_v34, %v4505_v32  ;;  %v4504_v41 = vld [vmem:[%s9238_s9 + $0xa0] sm:$0xff] }
 0x53d   :  { %v7535_v44 = vadd.f32 %v5132_v42, %v7532_v43  ;;  %v4506_v42 = vld [vmem:[%s9238_s9 + $0xb0] sm:$0xff] }
 0x555   :  { %v5173_v45 = vpop.f32.mrb[32].mxu0 }
 0x556   :  { %v5174_v46 = vpop.f32.mrb[33].mxu0 }
 0x557   :  { %v7537_v47 = vadd.f32 %v5174_v46, %v5173_v45  ;;  %v4509_v45 = vld [vmem:[%s9238_s9 + $0xc8] sm:$0xff]  ;;  %v5584_v46 = vpack.c.bf16 %v4506_v42, %v4504_v41 }
 0x558   :  { %v4571_v41 = vld [vmem:[%s9270_s30 + $0x288] sm:$0xff] }
 0x559   :  { %v5176_v48 = vpop.f32.mrb[34].mxu0 }
 0x55a   :  { %v5177_v49 = vpop.f32.mrb[35].mxu0 }
 0x55b   :  { %v7539_v50 = vadd.f32 %v5177_v49, %v5176_v48  ;;  %v4508_v49 = vld [vmem:[%s9238_s9 + $0xc0] sm:$0xff] }
 0x575   :  { %v5249_v51 = vpop.f32.mrb[36].mxu0 }
 0x576   :  { %v5250_v52 = vpop.f32.mrb[37].mxu0 }
 0x577   :  { %v7541_v56 = vadd.f32 %v5250_v52, %v5249_v51  ;;  %v4510_v51 = vld [vmem:[%s9238_s9 + $0xd0] sm:$0xff]  ;;  %v4513_v52 = vld [vmem:[%s9238_s9 + $0xe8] sm:$0xff] }
 0x579   :  { %v5252_v58 = vpop.f32.mrb[38].mxu0 }
 0x57a   :  { %v5253_v59 = vpop.f32.mrb[39].mxu0 }
 0x57b   :  { %v5254_v60 = vadd.f32 %v5253_v59, %v5252_v58  ;;  %v4515_v58 = vld [vmem:[%s9238_s9 + $0xf8] sm:$0xff]  ;;  %v5588_v59 = vpack.c.bf16 %v4510_v51, %v4508_v49 }
 0x57c   :  { %v4573_v49 = vld [vmem:[%s9270_s30 + $0x298] sm:$0xff] }
 0x57d   :  { %v7549_v62 = vadd.f32 %v5254_v60, %v7546_v61  ;;  %v5590_v60 = vpack.c.bf16 %v4515_v58, %v4513_v52  ;;  %v4556_v58 = vld [vmem:[%s9270_s30 + $0x210] sm:$0xff] }
 0x5ae   :  { %v1292_v63 = vpop.f32.mrb[12].mxu1 }
 0x5af   :  { %v5322_v0 = vpop.f32.mrb[13].mxu1  ;;  %v1372_v1 = vsel %vm687_vm3, %v1292_v63, -inf }
 0x5b0   :  { %1373 = vmax.xlane.f32.xlu0 %v1372_v1  ;;  %v4514_v0 = vld [vmem:[%s9238_s9 + $0xf0] sm:$0xff] }
 0x5b2   :  { %v1368_v3 = vpop.f32.mrb[14].mxu1 }
 0x5b3   :  { %v5327_v5 = vpop.f32.mrb[15].mxu1  ;;  %v1375_v8 = vsel %vm687_vm3, %v1368_v3, -inf }
 0x5b4   :  { %1376 = vmax.xlane.f32.xlu1 %v1375_v8  ;;  %v859_v5 = vld [vmem:[%s9238_s9 + $0x18] sm:$0xff] }
 0x63d   :  { %v1374_v10 = vpop.xlane.xlu0 %1373 }
 0x63e   :  { %v1378_v11 = vsub.f32 %v1292_v63, %v1374_v10  ;;  %v4512_v63 = vld [vmem:[%s9238_s9 + $0xe0] sm:$0xff] }
 0x63f   :  { %v5592_v1 = vpack.c.bf16 %v4514_v0, %v4512_v63  ;;  %v856_v10 = vld [vmem:[%s9238_s9] sm:$0xff]  ;;  %v4575_v63 = vld [vmem:[%s9270_s30 + $0x2a8] sm:$0xff] }
 0x640   :  { %v1380_v12 = vmul.f32 1.442695, %v1378_v11  ;;  %v858_v11 = vld [vmem:[%s9238_s9 + $0x10] sm:$0xff] }
 0x641   :  { %v1377_v14 = vpop.xlane.xlu1 %1376 }
 0x642   :  { %6210 = vpow2.f32 %v1380_v12  ;;  %v1379_v16 = vsub.f32 %v1368_v3, %v1377_v14  ;;  %v857_v3 = vld [vmem:[%s9238_s9 + $0x8] sm:$0xff]  ;;  %v863_v14 = vld [vmem:[%s9238_s9 + $0x38] sm:$0xff] }
 0x643   :  { %v5594_v8 = vpack.c.bf16 %v859_v5, %v857_v3  ;;  %v861_v12 = vld [vmem:[%s9238_s9 + $0x28] sm:$0xff]  ;;  %v4558_v3 = vld [vmem:[%s9270_s30 + $0x220] sm:$0xff] }
 0x644   :  { %v1382_v17 = vmul.f32 1.442695, %v1379_v16  ;;  %v5596_v16 = vpack.c.bf16 %v858_v11, %v856_v10  ;;  %v4559_v5 = vld [vmem:[%s9270_s30 + $0x228] sm:$0xff] }
 0x645   :  { %v5652_v10 = vpack.c.bf16 %v4559_v5, %v4558_v3  ;;  %v2063_v3 = vadd.f32 %v7527_v39, %v7532_v43 }
 0x646   :  { %6212 = vpow2.f32 %v1382_v17  ;;  %v5598_v17 = vpack.c.bf16 %v863_v14, %v861_v12  ;;  %v4560_v12 = vld [vmem:[%s9270_s30 + $0x230] sm:$0xff]  ;;  %v4561_v14 = vld [vmem:[%s9270_s30 + $0x238] sm:$0xff] }
 0x64c   :  { %v6211_v18 = vpop.eup %6210 }
 0x64d   :  { %v1384_v19 = vsel %vm687_vm3, %v6211_v18, 0.0 }
 0x64e   :  { %1385 = vadd.xlane.f32.xlu0 %v1384_v19  ;;  %v862_v19 = vld [vmem:[%s9238_s9 + $0x30] sm:$0xff] }
 0x650   :  { %v6213_v20 = vpop.eup %6212 }
 0x651   :  { %v1387_v21 = vsel %vm687_vm3, %v6213_v20, 0.0 }
 0x652   :  { %1388 = vadd.xlane.f32.xlu1 %v1387_v21  ;;  %v865_v21 = vld [vmem:[%s9238_s9 + $0x48] sm:$0xff] }
 0x6db   :  { %v1386_v22 = vpop.xlane.xlu0 %1385 }
 0x6dc   :  { %6214 = vrcp.f32 %v1386_v22  ;;  %v867_v22 = vld [vmem:[%s9238_s9 + $0x58] sm:$0xff] }
 0x6dd   :  { %v5602_v26 = vpack.c.bf16 %v867_v22, %v865_v21  ;;  %v4580_v21 = vld [vmem:[%s9270_s30 + $0x2d0] sm:$0xff]  ;;  %v4581_v22 = vld [vmem:[%s9270_s30 + $0x2d8] sm:$0xff] }
 0x6df   :  { %v1389_v24 = vpop.xlane.xlu1 %1388 }
 0x6e0   :  { %6216 = vrcp.f32 %v1389_v24 }
 0x6e6   :  { %v6215_v27 = vpop.eup %6214 }
 0x6e7   :  { %v1392_v23 = vmul.f32 %v6215_v27, %v6211_v18  ;;  %v860_v18 = vld [vmem:[%s9238_s9 + $0x20] sm:$0xff] }
 0x6e8   :  { %v5600_v25 = vpack.c.bf16 %v862_v19, %v860_v18  ;;  %v864_v27 = vld [vmem:[%s9238_s9 + $0x40] sm:$0xff] }
 0x6e9   :  { %5331 = vmatmul.mubr.msk.f32.vlgmr.msra.gmra.mrb[16].mxu1 %vm687_vm3, %v1392_v23  ;;  %v866_v23 = vld [vmem:[%s9238_s9 + $0x50] sm:$0xff]  ;;  %v4562_v19 = vld [vmem:[%s9270_s30 + $0x240] sm:$0xff] }
 0x6ea   :  { %v6217_v35 = vpop.eup %6216  ;;  %5334 = vmatpush3.msra.mxu1 %v7521_v30  ;;  %5335 = vmatprep.mubr.msk.f32.mxu1 %vm6275_vm1, %v6274_v7  ;;  %v4511_v30 = vld [vmem:[%s9238_s9 + $0xd8] sm:$0xff]  ;;  %v5604_v34 = vpack.c.bf16 %v866_v23, %v864_v27  ;;  %v4582_v23 = vld [vmem:[%s9270_s30 + $0x2e0] sm:$0xff] }
 0x6eb   :  { %v1393_v38 = vmul.f32 %v6217_v35, %v6213_v20  ;;  %5579 = vmatprep.subr.bf16.mxu1 %v5578_v28  ;;  %v5586_v48 = vpack.c.bf16 %v4511_v30, %v4509_v45  ;;  %v5606_v35 = vpack.c.bf16 %v871_v31, %v869_v29  ;;  %v4554_v30 = vld [vmem:[%s9270_s30 + $0x200] sm:$0xff]  ;;  %v4565_v27 = vld [vmem:[%s9270_s30 + $0x258] sm:$0xff] }
 0x6ed   :  { %5336 = vmatmul.mubr.msk.f32.vlgmr.msra.gmra.mrb[18].mxu1 %vm687_vm3, %v1393_v38  ;;  %v870_v38 = vld [vmem:[%s9238_s9 + $0x70] sm:$0xff] }
 0x6ee   :  { %5581 = vmatpush1.bf16.msra.mxu1 %v5580_v37  ;;  %1627 = vmatprep.mubr.f32.mxu1 %v6274_v7  ;;  %v868_v37 = vld [vmem:[%s9238_s9 + $0x60] sm:$0xff] }
 0x6ef   :  { %5583 = vmatprep.subr.bf16.mxu1 %v5582_v40  ;;  %v4570_v40 = vld [vmem:[%s9270_s30 + $0x280] sm:$0xff]  ;;  %v5608_v42 = vpack.c.bf16 %v870_v38, %v868_v37  ;;  %v4585_v37 = vld [vmem:[%s9270_s30 + $0x2f8] sm:$0xff] }
 0x6f0   :  { %v5642_v45 = vpack.c.bf16 %v4571_v41, %v4570_v40  ;;  %v4568_v41 = vld [vmem:[%s9270_s30 + $0x270] sm:$0xff] }
 0x6f2   :  { %5585 = vmatpush1.bf16.msra.mxu1 %v5584_v46  ;;  %v4555_v46 = vld [vmem:[%s9270_s30 + $0x208] sm:$0xff] }
 0x6f3   :  { %5587 = vmatprep.subr.bf16.mxu1 %v5586_v48  ;;  %v4572_v48 = vld [vmem:[%s9270_s30 + $0x290] sm:$0xff]  ;;  %v5644_v51 = vpack.c.bf16 %v4555_v46, %v4554_v30  ;;  %v4587_v46 = vld [vmem:[%s9274_s4 + $0x2] ss:$0 sm:$0xff] }
 0x6f4   :  { %v5646_v52 = vpack.c.bf16 %v4573_v49, %v4572_v48 }
 0x6f6   :  { %5589 = vmatpush1.bf16.msra.mxu1 %v5588_v59  ;;  %v4557_v59 = vld [vmem:[%s9270_s30 + $0x218] sm:$0xff] }
 0x6f7   :  { %5591 = vmatprep.subr.bf16.mxu1 %v5590_v60  ;;  %v4574_v60 = vld [vmem:[%s9270_s30 + $0x2a0] sm:$0xff]  ;;  %v5648_v0 = vpack.c.bf16 %v4557_v59, %v4556_v58 }
 0x6fa   :  { %5593 = vmatpush1.bf16.msra.mxu1 %v5592_v1  ;;  %v5650_v1 = vpack.c.bf16 %v4575_v63, %v4574_v60 }
 0x6fb   :  { %5595 = vmatprep.subr.bf16.mxu1 %v5594_v8  ;;  %v4576_v8 = vld [vmem:[%s9270_s30 + $0x2b0] sm:$0xff] }
 0x7bc   :  { %v1463_v20 = vpop.f32.mrb[16].mxu1 }
 0x7bd   :  { %v5332_v24 = vpop.f32.mrb[17].mxu1  ;;  %4516 = vmatmul.mubr.msk.f32.vlgmr.msra.gmra.mrb[20].mxu1 %vm534_vm2, %v1463_v20  ;;  %v4563_v20 = vld [vmem:[%s9270_s30 + $0x248] sm:$0xff] }
 0x7be   :  { %5597 = vmatpush1.bf16.msra.mxu1 %v5596_v16  ;;  %1633 = vmatprep.mubr.f32.mxu1 %v6274_v7  ;;  %v4578_v16 = vld [vmem:[%s9270_s30 + $0x2c0] sm:$0xff]  ;;  %v5660_v24 = vpack.c.bf16 %v4563_v20, %v4562_v19 }
 0x7bf   :  { %5599 = vmatprep.subr.bf16.mxu1 %v5598_v17  ;;  %v5656_v17 = vpack.c.bf16 %v4561_v14, %v4560_v12 }
 0x7c0   :  { %v1536_v28 = vpop.f32.mrb[18].mxu1 }
 0x7c1   :  { %v5337_v32 = vpop.f32.mrb[19].mxu1  ;;  %4517 = vmatmul.mubr.msk.f32.gmra.mrb[22].mxu1 %vm534_vm2, %v1536_v28  ;;  %v4583_v28 = vld [vmem:[%s9270_s30 + $0x2e8] sm:$0xff] }
 0x7c2   :  { %5601 = vmatpush1.bf16.msra.mxu1 %v5600_v25  ;;  %1710 = vmatprep.mubr.f32.mxu1 %v6274_v7  ;;  %v5662_v25 = vpack.c.bf16 %v4581_v22, %v4580_v21  ;;  %v5666_v31 = vpack.c.bf16 %v4583_v28, %v4582_v23  ;;  %v4566_v32 = vld [vmem:[%s9270_s30 + $0x260] sm:$0xff]  ;;  %v4629_v22 = vld [vmem:[%s9238_s9 + $0x108] sm:$0xff]  ;;  %v4630_v28 = vld [vmem:[%s9238_s9 + $0x110] sm:$0xff] }
 0x7c3   :  { %5603 = vmatprep.subr.bf16.mxu1 %v5602_v26  ;;  %v4564_v26 = vld [vmem:[%s9270_s30 + $0x250] sm:$0xff]  ;;  %v4628_v23 = vld [vmem:[%s9238_s9 + $0x100] sm:$0xff] }
 0x7c4   :  { %v5664_v29 = vpack.c.bf16 %v4565_v27, %v4564_v26 }
 0x7c6   :  { %5605 = vmatpush1.bf16.msra.mxu1 %v5604_v34  ;;  %v4567_v34 = vld [vmem:[%s9270_s30 + $0x268] sm:$0xff] }
 0x7c7   :  { %5607 = vmatprep.subr.bf16.mxu1 %v5606_v35  ;;  %v4584_v35 = vld [vmem:[%s9270_s30 + $0x2f0] sm:$0xff]  ;;  %v5668_v38 = vpack.c.bf16 %v4567_v34, %v4566_v32  ;;  %v5708_v34 = vpack.c.bf16 %v4630_v28, %v4628_v23  ;;  %v4704_v23 = vld [vmem:[%s9270_s30 + $0x3c0] sm:$0xff]  ;;  %v4705_v28 = vld [vmem:[%s9270_s30 + $0x3c8] sm:$0xff] }
 0x7c8   :  { %v5670_v40 = vpack.c.bf16 %v4585_v37, %v4584_v35 }
 0x7ca   :  { %5609 = vmatpush1.bf16.msra.mxu1 %v5608_v42  ;;  %v4569_v42 = vld [vmem:[%s9270_s30 + $0x278] sm:$0xff] }
 0x7cb   :  { %5643 = vmatprep.subr.bf16.mxu1 %v5642_v45  ;;  %v5672_v45 = vpack.c.bf16 %v4569_v42, %v4568_v41  ;;  %v4637_v41 = vld [vmem:[%s9238_s9 + $0x148] sm:$0xff] }
 0x7cd   :  { %4518 = vmatmul.mubr.msk.f32.vlgmr.msra.gmra.mrb[20].mxu1 %vm534_vm2, %v7501_v6  ;;  %v4577_v6 = vld [vmem:[%s9270_s30 + $0x2b8] sm:$0xff] }
 0x7ce   :  { %5645 = vmatpush3.bf16.msra.mxu1 %v5644_v51  ;;  %1716 = vmatprep.mubr.f32.mxu1 %v6274_v7  ;;  %v5654_v11 = vpack.c.bf16 %v4577_v6, %v4576_v8  ;;  %v4553_v51 = vld [vmem:[%s9275_s6 + $0x2] ss:$0 sm:$0xff] }
 0x7cf   :  { %5647 = vmatprep.subr.bf16.mxu1 %v5646_v52  ;;  %v1831_v63 = vadd.f32 %v7523_v33, %v4553_v51 }
 0x7d1   :  { %4519 = vmatmul.mubr.msk.f32.gmra.mrb[22].mxu1 %vm534_vm2, %v7503_v9  ;;  %v4579_v9 = vld [vmem:[%s9270_s30 + $0x2c8] sm:$0xff] }
 0x7d2   :  { %5649 = vmatpush3.bf16.msra.mxu1 %v5648_v0  ;;  %1944 = vmatprep.mubr.f32.mxu1 %v6663_v2  ;;  %v5658_v18 = vpack.c.bf16 %v4579_v9, %v4578_v16 }
 0x7d3   :  { %5651 = vmatprep.subr.bf16.mxu1 %v5650_v1  ;;  %v1836_v1 = vadd.f32 %v7525_v36, %v4553_v51 }
 0x7d6   :  { %5653 = vmatpush3.bf16.msra.mxu1 %v5652_v10 }
 0x7d7   :  { %5655 = vmatprep.subr.bf16.mxu1 %v5654_v11 }
 0x7da   :  { %5657 = vmatpush3.bf16.msra.mxu1 %v5656_v17 }
 0x7db   :  { %5659 = vmatprep.subr.bf16.mxu1 %v5658_v18 }
 0x7de   :  { %5661 = vmatpush3.bf16.msra.mxu1 %v5660_v24  ;;  %v4631_v24 = vld [vmem:[%s9238_s9 + $0x118] sm:$0xff] }
 0x7df   :  { %5663 = vmatprep.subr.bf16.mxu1 %v5662_v25  ;;  %v5706_v27 = vpack.c.bf16 %v4631_v24, %v4629_v22 }
 0x7e2   :  { %5665 = vmatpush3.bf16.msra.mxu1 %v5664_v29  ;;  %v4633_v29 = vld [vmem:[%s9238_s9 + $0x128] sm:$0xff] }
 0x7e3   :  { %5667 = vmatprep.subr.bf16.mxu1 %v5666_v31  ;;  %v4635_v31 = vld [vmem:[%s9238_s9 + $0x138] sm:$0xff] }
 0x7e4   :  { %v5710_v37 = vpack.c.bf16 %v4635_v31, %v4633_v29  ;;  %v5770_v31 = vpack.c.bf16 %v4705_v28, %v4704_v23 }
 0x7e6   :  { %5669 = vmatpush3.bf16.msra.mxu1 %v5668_v38  ;;  %v4632_v38 = vld [vmem:[%s9238_s9 + $0x120] sm:$0xff] }
 0x7e7   :  { %5671 = vmatprep.subr.bf16.mxu1 %v5670_v40  ;;  %v4634_v40 = vld [vmem:[%s9238_s9 + $0x130] sm:$0xff] }
 0x7e8   :  { %v5712_v42 = vpack.c.bf16 %v4634_v40, %v4632_v38 }
 0x7ea   :  { %5673 = vmatpush3.bf16.msra.mxu1 %v5672_v45 }
 0x7eb   :  { %5338 = vmatprep.subr.mxu1 %v6274_v7 }
 0x7ed   :  { %1945 = vmatmul.mubr.f32.vlgmr.msra.gmra.mrb[24].mxu1 %v6665_v4 }
 0x7ee   :  { %1949 = vmatprep.mubr.f32.mxu1 %v6683_v13 }
 0x7f1   :  { %1950 = vmatmul.mubr.f32.gmra.mrb[26].mxu1 %v6685_v15 }
 0x7f2   :  { %5340 = vmatprep.mubr.msk.f32.mxu1 %vm6275_vm1, %v6274_v7 }
 0x8c0   :  { %v5089_v30 = vpop.f32.mrb[24].mxu1 }
 0x8c1   :  { %v5090_v48 = vpop.f32.mrb[25].mxu1 }
 0x8c2   :  { %v5091_v49 = vadd.f32 %v5090_v48, %v5089_v30  ;;  %v4636_v30 = vld [vmem:[%s9238_s9 + $0x140] sm:$0xff]  ;;  %v4641_v48 = vld [vmem:[%s9238_s9 + $0x168] sm:$0xff] }
 0x8c4   :  { %v1947_v52 = vadd.f32 %v5091_v49, %v4587_v46  ;;  %v5092_v58 = vpop.f32.mrb[26].mxu1  ;;  %v4643_v49 = vld [vmem:[%s9238_s9 + $0x178] sm:$0xff] }
 0x8c5   :  { %v5093_v59 = vpop.f32.mrb[27].mxu1 }
 0x8c6   :  { %v5094_v60 = vadd.f32 %v5093_v59, %v5092_v58  ;;  %5339 = vmatpush3.xpose.msk.msra.mxu1 %vm534_vm2, %v1947_v52  ;;  %v5718_v52 = vpack.c.bf16 %v4643_v49, %v4641_v48  ;;  %v4640_v58 = vld [vmem:[%s9238_s9 + $0x160] sm:$0xff]  ;;  %v4642_v59 = vld [vmem:[%s9238_s9 + $0x170] sm:$0xff]  ;;  %v4693_v49 = vld [vmem:[%s9270_s30 + $0x368] sm:$0xff] }
 0x8c7   :  { %5343 = vmatprep.subr.mxu1 %v6274_v7  ;;  %v4692_v48 = vld [vmem:[%s9270_s30 + $0x360] sm:$0xff] }
 0x8c8   :  { %v1952_v0 = vadd.f32 %v5094_v60, %v4587_v46  ;;  %v4638_v46 = vld [vmem:[%s9238_s9 + $0x150] sm:$0xff]  ;;  %v5720_v60 = vpack.c.bf16 %v4642_v59, %v4640_v58  ;;  %v5780_v58 = vpack.c.bf16 %v4693_v49, %v4692_v48  ;;  %v4763_v49 = vld [vmem:[%s9238_s9 + $0x1c8] sm:$0xff] }
 0x8c9   :  { %5341 = vmatmul.mubr.msk.f32.vlgmr.msra.gmra.mrb[28].mxu1 %vm534_vm2, %v1831_v63  ;;  %v5716_v51 = vpack.c.bf16 %v4638_v46, %v4636_v30  ;;  %v4696_v63 = vld [vmem:[%s9270_s30 + $0x380] sm:$0xff]  ;;  %v4760_v48 = vld [vmem:[%s9238_s9 + $0x1b0] sm:$0xff] }
 0x8ca   :  { %5344 = vmatpush3.xpose.msk.msra.mxu1 %vm534_vm2, %v1952_v0  ;;  %5345 = vmatprep.mubr.msk.f32.mxu1 %vm6275_vm1, %v6274_v7  ;;  %v4697_v0 = vld [vmem:[%s9270_s30 + $0x388] sm:$0xff] }
 0x8cb   :  { %5348 = vmatprep.subr.mxu1 %v6274_v7 }
 0x8cd   :  { %5346 = vmatmul.mubr.msk.f32.vlgmr.msra.gmra.mrb[30].mxu1 %vm534_vm2, %v1836_v1  ;;  %v5754_v1 = vpack.c.bf16 %v4697_v0, %v4696_v63  ;;  %v4695_v63 = vld [vmem:[%s9270_s30 + $0x378] sm:$0xff] }
 0x8ce   :  { %5349 = vmatpush3.msra.mxu1 %v2063_v3  ;;  %5350 = vmatprep.mubr.msk.f32.mxu1 %vm6275_vm1, %v6274_v7  ;;  %v4680_v3 = vld [vmem:[%s9270_s30 + $0x300] sm:$0xff] }
 0x8cf   :  { %5353 = vmatprep.subr.mxu1 %v6274_v7 }
 0x99c   :  { %v2143_v33 = vpop.f32.mrb[28].mxu1 }
 0x99d   :  { %v5342_v5 = vpop.f32.mrb[29].mxu1  ;;  %v2223_v8 = vsel %vm687_vm3, %v2143_v33, -inf }
 0x99e   :  { %2224 = vmax.xlane.f32.xlu0 %v2223_v8  ;;  %v4698_v5 = vld [vmem:[%s9270_s30 + $0x390] sm:$0xff]  ;;  %v4699_v8 = vld [vmem:[%s9270_s30 + $0x398] sm:$0xff] }
 0x9a0   :  { %v2219_v6 = vpop.f32.mrb[30].mxu1 }
 0x9a1   :  { %v5347_v36 = vpop.f32.mrb[31].mxu1  ;;  %v2226_v10 = vsel %vm687_vm3, %v2219_v6, -inf }
 0x9a2   :  { %2227 = vmax.xlane.f32.xlu1 %v2226_v10  ;;  %v5758_v36 = vpack.c.bf16 %v4699_v8, %v4698_v5  ;;  %v4682_v10 = vld [vmem:[%s9270_s30 + $0x310] sm:$0xff]  ;;  %v4679_v8 = vld [vmem:[%s9275_s6 + $0x3] ss:$0 sm:$0xff] }
 0xa2b   :  { %v2225_v11 = vpop.xlane.xlu0 %2224 }
 0xa2c   :  { %v2229_v39 = vsub.f32 %v2143_v33, %v2225_v11  ;;  %v4681_v33 = vld [vmem:[%s9270_s30 + $0x308] sm:$0xff]  ;;  %v4683_v11 = vld [vmem:[%s9270_s30 + $0x318] sm:$0xff] }
 0xa2e   :  { %v2231_v43 = vmul.f32 1.442695, %v2229_v39 }
 0xa2f   :  { %v2228_v12 = vpop.xlane.xlu1 %2227 }
 0xa30   :  { %6218 = vpow2.f32 %v2231_v43  ;;  %v2230_v14 = vsub.f32 %v2219_v6, %v2228_v12  ;;  %v5756_v6 = vpack.c.bf16 %v4681_v33, %v4680_v3  ;;  %v4700_v43 = vld [vmem:[%s9270_s30 + $0x3a0] sm:$0xff]  ;;  %v4701_v12 = vld [vmem:[%s9270_s30 + $0x3a8] sm:$0xff] }
 0xa31   :  { %v4713_v3 = vld [vmem:[%s9274_s4 + $0x3] ss:$0 sm:$0xff] }
 0xa32   :  { %v2233_v16 = vmul.f32 1.442695, %v2230_v14 }
 0xa34   :  { %6220 = vpow2.f32 %v2233_v16  ;;  %v5760_v16 = vpack.c.bf16 %v4683_v11, %v4682_v10 }
 0xa3a   :  { %v6219_v9 = vpop.eup %6218 }
 0xa3b   :  { %v2235_v17 = vsel %vm687_vm3, %v6219_v9, 0.0 }
 0xa3c   :  { %2236 = vadd.xlane.f32.xlu0 %v2235_v17  ;;  %v4684_v17 = vld [vmem:[%s9270_s30 + $0x320] sm:$0xff] }
 0xa3e   :  { %v6221_v18 = vpop.eup %6220 }
 0xa3f   :  { %v2238_v19 = vsel %vm687_vm3, %v6221_v18, 0.0 }
 0xa40   :  { %2239 = vadd.xlane.f32.xlu1 %v2238_v19 }
 0xac9   :  { %v2237_v20 = vpop.xlane.xlu0 %2236 }
 0xaca   :  { %6222 = vrcp.f32 %v2237_v20  ;;  %v4702_v20 = vld [vmem:[%s9270_s30 + $0x3b0] sm:$0xff] }
 0xacd   :  { %v2240_v21 = vpop.xlane.xlu1 %2239 }
 0xace   :  { %6224 = vrcp.f32 %v2240_v21  ;;  %v4703_v21 = vld [vmem:[%s9270_s30 + $0x3b8] sm:$0xff] }
 0xad4   :  { %v6223_v25 = vpop.eup %6222 }
 0xad5   :  { %v2243_v26 = vmul.f32 %v6223_v25, %v6219_v9  ;;  %v5762_v9 = vpack.c.bf16 %v4701_v12, %v4700_v43  ;;  %v5766_v25 = vpack.c.bf16 %v4703_v21, %v4702_v20  ;;  %v2608_v12 = vadd.f32 %v7539_v50, %v4679_v8 }
 0xad7   :  { %5351 = vmatmul.mubr.msk.f32.vlgmr.msra.gmra.mrb[32].mxu1 %vm687_vm3, %v2243_v26  ;;  %v4686_v26 = vld [vmem:[%s9270_s30 + $0x330] sm:$0xff] }
 0xad8   :  { %v6225_v32 = vpop.eup %6224  ;;  %5354 = vmatpush3.msra.mxu1 %v7535_v44  ;;  %5355 = vmatprep.mubr.msk.f32.mxu1 %vm6275_vm1, %v6274_v7  ;;  %v4639_v44 = vld [vmem:[%s9238_s9 + $0x158] sm:$0xff] }
 0xad9   :  { %v2244_v35 = vmul.f32 %v6225_v32, %v6221_v18  ;;  %5707 = vmatprep.subr.bf16.mxu1 %v5706_v27  ;;  %v5714_v45 = vpack.c.bf16 %v4639_v44, %v4637_v41  ;;  %v4685_v18 = vld [vmem:[%s9270_s30 + $0x328] sm:$0xff]  ;;  %v4687_v27 = vld [vmem:[%s9270_s30 + $0x338] sm:$0xff]  ;;  %v4688_v32 = vld [vmem:[%s9270_s30 + $0x340] sm:$0xff] }
 0xada   :  { %v5764_v24 = vpack.c.bf16 %v4685_v18, %v4684_v17  ;;  %v5768_v29 = vpack.c.bf16 %v4687_v27, %v4686_v26  ;;  %v4690_v41 = vld [vmem:[%s9270_s30 + $0x350] sm:$0xff]  ;;  %v4691_v44 = vld [vmem:[%s9270_s30 + $0x358] sm:$0xff] }
 0xadb   :  { %5356 = vmatmul.mubr.msk.f32.vlgmr.msra.gmra.mrb[34].mxu1 %vm687_vm3, %v2244_v35  ;;  %v4706_v35 = vld [vmem:[%s9270_s30 + $0x3d0] sm:$0xff]  ;;  %v5776_v30 = vpack.c.bf16 %v4691_v44, %v4690_v41  ;;  %v4761_v41 = vld [vmem:[%s9238_s9 + $0x1b8] sm:$0xff] }
 0xadc   :  { %5709 = vmatpush1.bf16.msra.mxu1 %v5708_v34  ;;  %2478 = vmatprep.mubr.f32.mxu1 %v6274_v7  ;;  %v4689_v34 = vld [vmem:[%s9270_s30 + $0x348] sm:$0xff] }
 0xadd   :  { %5711 = vmatprep.subr.bf16.mxu1 %v5710_v37  ;;  %v4707_v37 = vld [vmem:[%s9270_s30 + $0x3d8] sm:$0xff]  ;;  %v5772_v38 = vpack.c.bf16 %v4689_v34, %v4688_v32 }
 0xade   :  { %v5774_v40 = vpack.c.bf16 %v4707_v37, %v4706_v35  ;;  %v4754_v37 = vld [vmem:[%s9238_s9 + $0x180] sm:$0xff] }
 0xae0   :  { %5713 = vmatpush1.bf16.msra.mxu1 %v5712_v42  ;;  %v4708_v42 = vld [vmem:[%s9270_s30 + $0x3e0] sm:$0xff] }
 0xae1   :  { %5715 = vmatprep.subr.bf16.mxu1 %v5714_v45  ;;  %v4709_v45 = vld [vmem:[%s9270_s30 + $0x3e8] sm:$0xff] }
 0xae2   :  { %v5778_v46 = vpack.c.bf16 %v4709_v45, %v4708_v42 }
 0xae4   :  { %5717 = vmatpush1.bf16.msra.mxu1 %v5716_v51  ;;  %v4710_v51 = vld [vmem:[%s9270_s30 + $0x3f0] sm:$0xff] }
 0xae5   :  { %5719 = vmatprep.subr.bf16.mxu1 %v5718_v52  ;;  %v4711_v52 = vld [vmem:[%s9270_s30 + $0x3f8] sm:$0xff] }
 0xae6   :  { %v5782_v59 = vpack.c.bf16 %v4711_v52, %v4710_v51 }
 0xae8   :  { %5721 = vmatpush1.bf16.msra.mxu1 %v5720_v60  ;;  %v4694_v60 = vld [vmem:[%s9270_s30 + $0x370] sm:$0xff] }
 0xae9   :  { %5755 = vmatprep.subr.bf16.mxu1 %v5754_v1  ;;  %v5784_v0 = vpack.c.bf16 %v4695_v63, %v4694_v60  ;;  %v4767_v60 = vld [vmem:[%s9238_s9 + $0x1e8] sm:$0xff]  ;;  %v4769_v63 = vld [vmem:[%s9238_s9 + $0x1f8] sm:$0xff] }
 0xbaa   :  { %v2314_v39 = vpop.f32.mrb[32].mxu1 }
 0xbab   :  { %v5352_v14 = vpop.f32.mrb[33].mxu1  ;;  %4644 = vmatmul.mubr.msk.f32.vlgmr.msra.gmra.mrb[20].mxu1 %vm534_vm2, %v2314_v39  ;;  %v2603_v39 = vadd.f32 %v7537_v47, %v4679_v8 }
 0xbac   :  { %5757 = vmatpush3.bf16.msra.mxu1 %v5756_v6  ;;  %2484 = vmatprep.mubr.f32.mxu1 %v6274_v7  ;;  %v2835_v14 = vadd.f32 %v7541_v56, %v7546_v61 }
 0xbad   :  { %5759 = vmatprep.subr.bf16.mxu1 %v5758_v36 }
 0xbae   :  { %v2387_v19 = vpop.f32.mrb[34].mxu1 }
 0xbaf   :  { %v5357_v22 = vpop.f32.mrb[35].mxu1  ;;  %4645 = vmatmul.mubr.msk.f32.gmra.mrb[22].mxu1 %vm534_vm2, %v2387_v19 }
 0xbb0   :  { %5761 = vmatpush3.bf16.msra.mxu1 %v5760_v16  ;;  %2716 = vmatprep.mubr.f32.mxu1 %v6663_v2 }
 0xbb1   :  { %5763 = vmatprep.subr.bf16.mxu1 %v5762_v9 }
 0xbb4   :  { %5765 = vmatpush3.bf16.msra.mxu1 %v5764_v24 }
 0xbb5   :  { %5767 = vmatprep.subr.bf16.mxu1 %v5766_v25 }
 0xbb8   :  { %5769 = vmatpush3.bf16.msra.mxu1 %v5768_v29  ;;  %v4755_v29 = vld [vmem:[%s9238_s9 + $0x188] sm:$0xff] }
 0xbb9   :  { %5771 = vmatprep.subr.bf16.mxu1 %v5770_v31  ;;  %v4757_v31 = vld [vmem:[%s9238_s9 + $0x198] sm:$0xff] }
 0xbba   :  { %v5818_v35 = vpack.c.bf16 %v4757_v31, %v4755_v29  ;;  %v3361_v29 = vld [vmem:[%s9242_s13 + $0x30] sm:$0xff]  ;;  %v3364_v31 = vld [vmem:[%s9242_s13 + $0x48] sm:$0xff] }
 0xbbc   :  { %5773 = vmatpush3.bf16.msra.mxu1 %v5772_v38  ;;  %v4756_v38 = vld [vmem:[%s9238_s9 + $0x190] sm:$0xff] }
 0xbbd   :  { %5775 = vmatprep.subr.bf16.mxu1 %v5774_v40  ;;  %v4759_v40 = vld [vmem:[%s9238_s9 + $0x1a8] sm:$0xff]  ;;  %v5820_v42 = vpack.c.bf16 %v4756_v38, %v4754_v37  ;;  %v3363_v37 = vld [vmem:[%s9242_s13 + $0x40] sm:$0xff]  ;;  %v3365_v38 = vld [vmem:[%s9242_s13 + $0x50] sm:$0xff] }
 0xbc0   :  { %5777 = vmatpush3.bf16.msra.mxu1 %v5776_v30  ;;  %v5822_v30 = vpack.c.bf16 %v4761_v41, %v4759_v40  ;;  %v3368_v40 = vld [vmem:[%s9242_s13 + $0x68] sm:$0xff]  ;;  %v3370_v41 = vld [vmem:[%s9242_s13 + $0x78] sm:$0xff] }
 0xbc1   :  { %5779 = vmatprep.subr.bf16.mxu1 %v5778_v46  ;;  %v4758_v46 = vld [vmem:[%s9238_s9 + $0x1a0] sm:$0xff] }
 0xbc2   :  { %v5824_v51 = vpack.c.bf16 %v4760_v48, %v4758_v46  ;;  %v3372_v46 = vld [vmem:[%s9242_s13 + $0x88] sm:$0xff]  ;;  %v3374_v48 = vld [vmem:[%s9242_s13 + $0x98] sm:$0xff] }
 0xbc4   :  { %5781 = vmatpush3.bf16.msra.mxu1 %v5780_v58  ;;  %v4762_v58 = vld [vmem:[%s9238_s9 + $0x1c0] sm:$0xff] }
 0xbc5   :  { %5783 = vmatprep.subr.bf16.mxu1 %v5782_v59  ;;  %v4764_v59 = vld [vmem:[%s9238_s9 + $0x1d0] sm:$0xff] }
 0xbc8   :  { %5785 = vmatpush3.bf16.msra.mxu1 %v5784_v0  ;;  %v5828_v0 = vpack.c.bf16 %v4764_v59, %v4762_v58  ;;  %v3376_v58 = vld [vmem:[%s9242_s13 + $0xa8] sm:$0xff]  ;;  %v3378_v59 = vld [vmem:[%s9242_s13 + $0xb8] sm:$0xff] }
 0xbc9   :  { %5358 = vmatprep.subr.mxu1 %v6274_v7 }
 0xbcb   :  { %2717 = vmatmul.mubr.f32.vlgmr.msra.gmra.mrb[36].mxu1 %v6665_v4 }
 0xbcc   :  { %2721 = vmatprep.mubr.f32.mxu1 %v6683_v13 }
 0xbcf   :  { %2722 = vmatmul.mubr.f32.gmra.mrb[38].mxu1 %v6685_v15 }
 0xbd0   :  { %5360 = vmatprep.mubr.msk.f32.mxu1 %vm6275_vm1, %v6274_v7 }
 0xc9e   :  { %v5211_v1 = vpop.f32.mrb[36].mxu1 }
 0xc9f   :  { %v5212_v33 = vpop.f32.mrb[37].mxu1 }
 0xca0   :  { %v5213_v5 = vadd.f32 %v5212_v33, %v5211_v1  ;;  %v5830_v1 = vpack.c.bf16 %v4769_v63, %v4767_v60  ;;  %v4768_v33 = vld [vmem:[%s9238_s9 + $0x1f0] sm:$0xff]  ;;  %v5854_v63 = vpack.c.bf16 %v3378_v59, %v3376_v58  ;;  %v3404_v59 = vld [vmem:[%s9242_s13 + $0x188] sm:$0xff] }
 0xca2   :  { %v2719_v6 = vadd.f32 %v5213_v5, %v4713_v3  ;;  %v5214_v36 = vpop.f32.mrb[38].mxu1 }
 0xca3   :  { %v5215_v10 = vpop.f32.mrb[39].mxu1 }
 0xca4   :  { %v5216_v11 = vadd.f32 %v5215_v10, %v5214_v36  ;;  %5359 = vmatpush3.xpose.msk.msra.mxu1 %vm534_vm2, %v2719_v6 }
 0xca5   :  { %5363 = vmatprep.subr.mxu1 %v6274_v7 }
 0xca6   :  { %v2724_v43 = vadd.f32 %v5216_v11, %v4713_v3  ;;  %v4766_v3 = vld [vmem:[%s9238_s9 + $0x1e0] sm:$0xff] }
 0xca7   :  { %5361 = vmatmul.mubr.msk.f32.vlgmr.msra.gmra.mrb[40].mxu1 %vm534_vm2, %v2603_v39  ;;  %v5832_v5 = vpack.c.bf16 %v4768_v33, %v4766_v3  ;;  %v3267_v11 = vld [vmem:[%s9239_s10] sm:$0x3]  ;;  %v3380_v3 = vld [vmem:[%s9242_s13 + $0xc8] sm:$0xff]  ;;  %v3382_v33 = vld [vmem:[%s9242_s13 + $0xd8] sm:$0xff] }
 0xca8   :  { %5364 = vmatpush3.xpose.msk.msra.mxu1 %vm534_vm2, %v2724_v43  ;;  %5365 = vmatprep.mubr.msk.f32.mxu1 %vm6275_vm1, %v6274_v7  ;;  %v3272_v39 = vrot.slane %v3267_v11, %v6647_v57  ;;  %v3276_v43 = vrot.slane %v3267_v11, %v6641_v55  ;;  %v3386_v11 = vld [vmem:[%s9242_s13 + $0xf8] sm:$0xff] }
 0xca9   :  { %5368 = vmatprep.subr.mxu1 %v6274_v7 }
 0xcab   :  { %5366 = vmatmul.mubr.msk.f32.vlgmr.msra.gmra.mrb[42].mxu1 %vm534_vm2, %v2608_v12 }
 0xcac   :  { %5369 = vmatpush3.msra.mxu1 %v2835_v14  ;;  %5370 = vmatprep.mubr.msk.f32.mxu1 %vm6275_vm1, %v6274_v7 }
 0xcad   :  { %5373 = vmatprep.subr.mxu1 %v6274_v7 }
 0xd7a   :  { %v2915_v47 = vpop.f32.mrb[40].mxu1 }
 0xd7b   :  { %v5362_v16 = vpop.f32.mrb[41].mxu1  ;;  %v2995_v9 = vsel %vm687_vm3, %v2915_v47, -inf }
 0xd7c   :  { %2996 = vmax.xlane.f32.xlu0 %v2995_v9 }
 0xd7e   :  { %v2991_v17 = vpop.f32.mrb[42].mxu1 }
 0xd7f   :  { %v5367_v50 = vpop.f32.mrb[43].mxu1  ;;  %v2998_v18 = vsel %vm687_vm3, %v2991_v17, -inf }
 0xd80   :  { %2999 = vmax.xlane.f32.xlu1 %v2998_v18 }
 0xe09   :  { %v2997_v19 = vpop.xlane.xlu0 %2996 }
 0xe0a   :  { %v3001_v56 = vsub.f32 %v2915_v47, %v2997_v19 }
 0xe0c   :  { %v3003_v61 = vmul.f32 1.442695, %v3001_v56 }
 0xe0d   :  { %v3000_v20 = vpop.xlane.xlu1 %2999 }
 0xe0e   :  { %6226 = vpow2.f32 %v3003_v61  ;;  %v3002_v21 = vsub.f32 %v2991_v17, %v3000_v20 }
 0xe10   :  { %v3005_v22 = vmul.f32 1.442695, %v3002_v21 }
 0xe12   :  { %6228 = vpow2.f32 %v3005_v22  ;;  %v3358_v22 = vld [vmem:[%s9242_s13 + $0x18] sm:$0xff] }
 0xe18   :  { %v6227_v24 = vpop.eup %6226 }
 0xe19   :  { %v3007_v25 = vsel %vm687_vm3, %v6227_v24, 0.0 }
 0xe1a   :  { %3008 = vadd.xlane.f32.xlu0 %v3007_v25  ;;  %v3360_v25 = vld [vmem:[%s9242_s13 + $0x28] sm:$0xff] }
 0xe1c   :  { %v6229_v26 = vpop.eup %6228 }
 0xe1d   :  { %v3010_v27 = vsel %vm687_vm3, %v6229_v26, 0.0 }
 0xe1e   :  { %3011 = vadd.xlane.f32.xlu1 %v3010_v27 }
 0xea7   :  { %v3009_v23 = vpop.xlane.xlu0 %3008 }
 0xea8   :  { %6230 = vrcp.f32 %v3009_v23 }
 0xeab   :  { %v3012_v28 = vpop.xlane.xlu1 %3011 }
 0xeac   :  { %6232 = vrcp.f32 %v3012_v28  ;;  %v3359_v28 = vld [vmem:[%s9242_s13 + $0x20] sm:$0xff] }
 0xeb2   :  { %v6231_v32 = vpop.eup %6230 }
 0xeb3   :  { %v3015_v34 = vmul.f32 %v6231_v32, %v6227_v24  ;;  %v3366_v32 = vld [vmem:[%s9242_s13 + $0x58] sm:$0xff] }
 0xeb5   :  { %5371 = vmatmul.mubr.msk.f32.vlgmr.msra.gmra.mrb[44].mxu1 %vm687_vm3, %v3015_v34  ;;  %v5840_v34 = vpack.c.bf16 %v3361_v29, %v3359_v28  ;;  %v3397_v28 = vld [vmem:[%s9242_s13 + $0x150] sm:$0xff] }
 0xeb6   :  { %v6233_v44 = vpop.eup %6232  ;;  %5374 = vmatpush3.msra.mxu1 %v7549_v62  ;;  %5375 = vmatprep.mubr.msk.f32.mxu1 %vm6275_vm1, %v6274_v7  ;;  %v4765_v62 = vld [vmem:[%s9238_s9 + $0x1d8] sm:$0xff] }
 0xeb7   :  { %v3016_v45 = vmul.f32 %v6233_v44, %v6229_v26  ;;  %5819 = vmatprep.subr.bf16.mxu1 %v5818_v35  ;;  %v5826_v52 = vpack.c.bf16 %v4765_v62, %v4763_v49  ;;  %v3362_v26 = vld [vmem:[%s9242_s13 + $0x38] sm:$0xff]  ;;  %v5842_v35 = vpack.c.bf16 %v3366_v32, %v3364_v31  ;;  %v5844_v44 = vpack.c.bf16 %v3365_v38, %v3363_v37 }
 0xeb8   :  { %v5838_v23 = vpack.c.bf16 %v3362_v26, %v3360_v25  ;;  %v5850_v62 = vpack.c.bf16 %v3374_v48, %v3372_v46  ;;  %v3398_v25 = vld [vmem:[%s9242_s13 + $0x158] sm:$0xff]  ;;  %v76_v31 = vand.u32 127, %v75_v53 }
 0xeb9   :  { %5376 = vmatmul.mubr.msk.f32.vlgmr.msra.gmra.mrb[46].mxu1 %vm687_vm3, %v3016_v45  ;;  %v3367_v45 = vld [vmem:[%s9242_s13 + $0x60] sm:$0xff] }
 0xeba   :  { %5821 = vmatpush1.bf16.msra.mxu1 %v5820_v42  ;;  %3250 = vmatprep.mubr.f32.mxu1 %v6274_v7  ;;  %v5846_v42 = vpack.c.bf16 %v3370_v41, %v3368_v40  ;;  %v77_v32 = vadd.s32 128, %v76_v31  ;;  %v3523_v31 = vld [vmem:[%s9244_s15 + $0x58] sm:$0xff] }
 0xebb   :  { %5823 = vmatprep.subr.bf16.mxu1 %v5822_v30  ;;  %v3369_v30 = vld [vmem:[%s9242_s13 + $0x70] sm:$0xff] }
 0xebc   :  { %v5848_v49 = vpack.c.bf16 %v3369_v30, %v3367_v45  ;;  %vm79_vm4 = vcmp.lt.s32.totalorder %v77_v32, 240 }
 0xebd   :  { %v8191_v37 = vsel %vm79_vm4, 1.0, %v6274_v7 }
 0xebe   :  { %5825 = vmatpush1.bf16.msra.mxu1 %v5824_v51  ;;  %v3371_v51 = vld [vmem:[%s9242_s13 + $0x80] sm:$0xff] }
 0xebf   :  { %5827 = vmatprep.subr.bf16.mxu1 %v5826_v52  ;;  %v3373_v52 = vld [vmem:[%s9242_s13 + $0x90] sm:$0xff] }
 0xec0   :  { %v5852_v60 = vpack.c.bf16 %v3373_v52, %v3371_v51  ;;  %v3399_v51 = vld [vmem:[%s9242_s13 + $0x160] sm:$0xff]  ;;  %v3401_v52 = vld [vmem:[%s9242_s13 + $0x170] sm:$0xff] }
 0xec1   :  { %v5880_v58 = vpack.c.bf16 %v3401_v52, %v3399_v51  ;;  %v3533_v51 = vld [vmem:[%s9244_s15 + $0xa8] sm:$0xff]  ;;  %v3535_v52 = vld [vmem:[%s9244_s15 + $0xb8] sm:$0xff] }
 0xec2   :  { %5829 = vmatpush1.bf16.msra.mxu1 %v5828_v0  ;;  %v3375_v0 = vld [vmem:[%s9242_s13 + $0xa0] sm:$0xff] }
 0xec3   :  { %5831 = vmatprep.subr.bf16.mxu1 %v5830_v1  ;;  %v3377_v1 = vld [vmem:[%s9242_s13 + $0xb0] sm:$0xff] }
 0xec6   :  { %5833 = vmatpush1.bf16.msra.mxu1 %v5832_v5  ;;  %v5856_v5 = vpack.c.bf16 %v3377_v1, %v3375_v0  ;;  %v3403_v0 = vld [vmem:[%s9242_s13 + $0x180] sm:$0xff]  ;;  %v3405_v1 = vld [vmem:[%s9242_s13 + $0x190] sm:$0xff] }
 0xf88   :  { %v3086_v8 = vpop.f32.mrb[44].mxu1 }
 0xf89   :  { %v5372_v6 = vpop.f32.mrb[45].mxu1  ;;  %4770 = vmatmul.mubr.msk.f32.vlgmr.msra.gmra.mrb[20].mxu1 %vm534_vm2, %v3086_v8  ;;  %v5858_v8 = vpack.c.bf16 %v3382_v33, %v3380_v3  ;;  %v5884_v3 = vpack.c.bf16 %v3405_v1, %v3403_v0  ;;  %v3408_v33 = vld [vmem:[%s9242_s13 + $0x1a8] sm:$0xff]  ;;  %v3539_v1 = vld [vmem:[%s9244_s15 + $0xd8] sm:$0xff] }
 0xf8a   :  { %3256 = vmatprep.mubr.f32.mxu1 %v6274_v7  ;;  %v3379_v6 = vld [vmem:[%s9242_s13 + $0xc0] sm:$0xff]  ;;  %v3537_v0 = vld [vmem:[%s9244_s15 + $0xc8] sm:$0xff] }
 0xf8c   :  { %v3159_v36 = vpop.f32.mrb[46].mxu1 }
 0xf8d   :  { %v5377_v10 = vpop.f32.mrb[47].mxu1  ;;  %4771 = vmatmul.mubr.msk.f32.gmra.mrb[22].mxu1 %vm534_vm2, %v3159_v36  ;;  %v3381_v36 = vld [vmem:[%s9242_s13 + $0xd0] sm:$0xff] }
 0xf8e   :  { %v3384_v10 = vld [vmem:[%s9242_s13 + $0xe8] sm:$0xff] }
0x105c   :  { %v3252_v12 = vpop.f32.mrb[20].mxu1 }
0x105d   :  { %v3279_v14 = vadd.f32 %v3272_v39, %v3252_v12  ;;  %v3254_v47 = vpop.f32.mrb[21].mxu1  ;;  %v3383_v12 = vld [vmem:[%s9242_s13 + $0xe0] sm:$0xff] }
0x105e   :  { %v3280_v16 = vadd.f32 %v3276_v43, %v3254_v47  ;;  %v3388_v47 = vld [vmem:[%s9242_s13 + $0x108] sm:$0xff] }
0x105f   :  { %v8042_v9 = vadd.f32 %v3279_v14, %v6665_v4  ;;  %v3385_v14 = vld [vmem:[%s9242_s13 + $0xf0] sm:$0xff] }
0x1060   :  { %v8045_v17 = vadd.f32 %v3280_v16, %v6663_v2  ;;  %v3258_v50 = vpop.f32.mrb[22].mxu1  ;;  %v3356_v2 = vld [vmem:[%s9242_s13 + $0x8] sm:$0xff]  ;;  %v3390_v16 = vld [vmem:[%s9242_s13 + $0x118] sm:$0xff] }
0x1061   :  { %v3281_v18 = vadd.f32 %v3272_v39, %v3258_v50  ;;  %v3260_v19 = vpop.f32.mrb[23].mxu1  ;;  %v5834_v24 = vpack.c.bf16 %v3358_v22, %v3356_v2  ;;  %v5860_v39 = vpack.c.bf16 %v3381_v36, %v3379_v6  ;;  %v5864_v50 = vpack.c.bf16 %v3385_v14, %v3383_v12  ;;  %v3407_v6 = vld [vmem:[%s9242_s13 + $0x1a0] sm:$0xff]  ;;  %v3409_v36 = vld [vmem:[%s9242_s13 + $0x1b0] sm:$0xff] }
0x1062   :  { %v3282_v56 = vadd.f32 %v3276_v43, %v3260_v19  ;;  %v3289_v61 = vadd.f32 %v8045_v17, %v8042_v9  ;;  %v5862_v43 = vpack.c.bf16 %v3386_v11, %v3384_v10  ;;  %v3387_v19 = vld [vmem:[%s9242_s13 + $0x100] sm:$0xff]  ;;  %v5888_v10 = vpack.c.bf16 %v3409_v36, %v3407_v6  ;;  %v3412_v11 = vld [vmem:[%s9242_s13 + $0x1c8] sm:$0xff]  ;;  %v3413_v14 = vld [vmem:[%s9242_s13 + $0x1d0] sm:$0xff] }
0x1063   :  { %v8050_v20 = vadd.f32 %v3281_v18, %v6685_v15  ;;  %v3355_v15 = vld [vmem:[%s9242_s13] sm:$0xff]  ;;  %5835 = vmatprep.subr.bf16.mxu0 %v5834_v24  ;;  %v5866_v18 = vpack.c.bf16 %v3390_v16, %v3388_v47  ;;  %v3393_v24 = vld [vmem:[%s9242_s13 + $0x130] sm:$0xff]  ;;  %v3416_v16 = vld [vmem:[%s9242_s13 + $0x1e8] sm:$0xff] }
0x1064   :  { %v8053_v21 = vadd.f32 %v3282_v56, %v6683_v13  ;;  %3290 = vadd.xlane.f32.xlu0 %v3289_v61  ;;  %v3357_v13 = vld [vmem:[%s9242_s13 + $0x10] sm:$0xff]  ;;  %v3392_v61 = vld [vmem:[%s9242_s13 + $0x128] sm:$0xff]  ;;  %v3411_v12 = vld [vmem:[%s9242_s13 + $0x1c0] sm:$0xff] }
0x1065   :  { %v5836_v27 = vpack.c.bf16 %v3357_v13, %v3355_v15  ;;  %v3389_v56 = vld [vmem:[%s9242_s13 + $0x110] sm:$0xff]  ;;  %v3391_v15 = vld [vmem:[%s9242_s13 + $0x120] sm:$0xff]  ;;  %v3396_v13 = vld [vmem:[%s9242_s13 + $0x148] sm:$0xff]  ;;  %v5892_v47 = vpack.c.bf16 %v3413_v14, %v3411_v12 }
0x1066   :  { %v3292_v4 = vadd.f32 %v8053_v21, %v8050_v20  ;;  %v5868_v2 = vpack.c.bf16 %v3389_v56, %v3387_v19  ;;  %v5872_v26 = vpack.c.bf16 %v3393_v24, %v3391_v15  ;;  %v3417_v56 = vld [vmem:[%s9242_s13 + $0x1f0] sm:$0xff]  ;;  %v3541_v6 = vld [vmem:[%s9244_s15 + $0xe8] sm:$0xff]  ;;  %v3543_v36 = vld [vmem:[%s9244_s15 + $0xf8] sm:$0xff] }
0x1067   :  { %5837 = vmatpush1.bf16.msra.mxu0 %v5836_v27  ;;  %v5874_v27 = vpack.c.bf16 %v3398_v25, %v3396_v13  ;;  %v3514_v24 = vld [vmem:[%s9244_s15 + $0x10] sm:$0xff]  ;;  %v3517_v13 = vld [vmem:[%s9244_s15 + $0x28] sm:$0xff]  ;;  %v3519_v25 = vld [vmem:[%s9244_s15 + $0x38] sm:$0xff] }
0x1068   :  { %3293 = vadd.xlane.f32.xlu1 %v3292_v4  ;;  %5839 = vmatprep.subr.bf16.mxu0 %v5838_v23  ;;  %v3394_v4 = vld [vmem:[%s9242_s13 + $0x138] sm:$0xff]  ;;  %v3395_v23 = vld [vmem:[%s9242_s13 + $0x140] sm:$0xff]  ;;  %v3545_v12 = vld [vmem:[%s9244_s15 + $0x108] sm:$0xff] }
0x1069   :  { %v5870_v22 = vpack.c.bf16 %v3394_v4, %v3392_v61  ;;  %v5876_v29 = vpack.c.bf16 %v3397_v28, %v3395_v23  ;;  %v3513_v4 = vld [vmem:[%s9244_s15 + $0x8] sm:$0xff]  ;;  %v3516_v23 = vld [vmem:[%s9244_s15 + $0x20] sm:$0xff]  ;;  %v3518_v28 = vld [vmem:[%s9244_s15 + $0x30] sm:$0xff] }
0x106a   :  { %v5904_v32 = vpack.c.bf16 %v3518_v28, %v3516_v23  ;;  %v3547_v14 = vld [vmem:[%s9244_s15 + $0x118] sm:$0xff]  ;;  %v3557_v23 = vld [vmem:[%s9244_s15 + $0x168] sm:$0xff] }
0x106b   :  { %5841 = vmatpush1.bf16.msra.mxu0 %v5840_v34  ;;  %v3559_v28 = vld [vmem:[%s9244_s15 + $0x178] sm:$0xff] }
0x106c   :  { %5843 = vmatprep.subr.bf16.mxu0 %v5842_v35 }
0x106f   :  { %5845 = vmatpush1.bf16.msra.mxu0 %v5844_v44 }
0x1070   :  { %5847 = vmatprep.subr.bf16.mxu0 %v5846_v42 }
0x1073   :  { %5849 = vmatpush1.bf16.msra.mxu0 %v5848_v49  ;;  %v3402_v49 = vld [vmem:[%s9242_s13 + $0x178] sm:$0xff] }
0x1074   :  { %5851 = vmatprep.subr.bf16.mxu0 %v5850_v62 }
0x1077   :  { %5853 = vmatpush1.bf16.msra.mxu0 %v5852_v60  ;;  %v3406_v60 = vld [vmem:[%s9242_s13 + $0x198] sm:$0xff] }
0x1078   :  { %5855 = vmatprep.subr.bf16.mxu0 %v5854_v63  ;;  %v5882_v63 = vpack.c.bf16 %v3406_v60, %v3404_v59  ;;  %v5918_v59 = vpack.c.bf16 %v3535_v52, %v3533_v51  ;;  %v3532_v60 = vld [vmem:[%s9244_s15 + $0xa0] sm:$0xff] }
0x107b   :  { %5857 = vmatpush1.bf16.msra.mxu0 %v5856_v5  ;;  %v3410_v5 = vld [vmem:[%s9242_s13 + $0x1b8] sm:$0xff] }
0x107c   :  { %5859 = vmatprep.subr.bf16.mxu0 %v5858_v8  ;;  %v5886_v8 = vpack.c.bf16 %v3410_v5, %v3408_v33  ;;  %v5922_v33 = vpack.c.bf16 %v3539_v1, %v3537_v0  ;;  %v3536_v5 = vld [vmem:[%s9244_s15 + $0xc0] sm:$0xff] }
0x107f   :  { %5861 = vmatpush1.bf16.msra.mxu0 %v5860_v39  ;;  %v3414_v39 = vld [vmem:[%s9242_s13 + $0x1d8] sm:$0xff] }
0x1080   :  { %5863 = vmatprep.subr.bf16.mxu0 %v5862_v43  ;;  %v5890_v43 = vpack.c.bf16 %v3414_v39, %v3412_v11  ;;  %v5926_v11 = vpack.c.bf16 %v3543_v36, %v3541_v6  ;;  %v3540_v39 = vld [vmem:[%s9244_s15 + $0xe0] sm:$0xff] }
0x1083   :  { %5865 = vmatpush1.bf16.msra.mxu0 %v5864_v50  ;;  %v3418_v50 = vld [vmem:[%s9242_s13 + $0x1f8] sm:$0xff] }
0x1084   :  { %5867 = vmatprep.subr.bf16.mxu0 %v5866_v18  ;;  %v3415_v18 = vld [vmem:[%s9242_s13 + $0x1e0] sm:$0xff]  ;;  %v5894_v19 = vpack.c.bf16 %v3418_v50, %v3416_v16  ;;  %v5930_v16 = vpack.c.bf16 %v3547_v14, %v3545_v12 }
0x1085   :  { %v5896_v61 = vpack.c.bf16 %v3417_v56, %v3415_v18  ;;  %v3544_v50 = vld [vmem:[%s9244_s15 + $0x100] sm:$0xff]  ;;  %v3546_v18 = vld [vmem:[%s9244_s15 + $0x110] sm:$0xff]  ;;  %v3551_v56 = vld [vmem:[%s9244_s15 + $0x138] sm:$0xff] }
0x1087   :  { %5869 = vmatpush1.bf16.msra.mxu0 %v5868_v2  ;;  %v3515_v2 = vld [vmem:[%s9244_s15 + $0x18] sm:$0xff] }
0x1088   :  { %5871 = vmatprep.subr.bf16.mxu0 %v5870_v22  ;;  %v3512_v22 = vld [vmem:[%s9244_s15] sm:$0xff]  ;;  %v5898_v15 = vpack.c.bf16 %v3515_v2, %v3513_v4 }
0x1089   :  { %v3548_v2 = vld [vmem:[%s9244_s15 + $0x120] sm:$0xff] }
0x108a   :  { %5899 = vmatprep.subr.bf16.mxu1 %v5898_v15  ;;  %v3553_v15 = vld [vmem:[%s9244_s15 + $0x148] sm:$0xff] }
0x108b   :  { %5873 = vmatpush1.bf16.msra.mxu0 %v5872_v26  ;;  %v5900_v26 = vpack.c.bf16 %v3514_v24, %v3512_v22  ;;  %v3550_v22 = vld [vmem:[%s9244_s15 + $0x130] sm:$0xff]  ;;  %v3555_v24 = vld [vmem:[%s9244_s15 + $0x158] sm:$0xff] }
0x108c   :  { %5875 = vmatprep.subr.bf16.mxu0 %v5874_v27  ;;  %v5902_v27 = vpack.c.bf16 %v3519_v25, %v3517_v13  ;;  %v5936_v13 = vpack.c.bf16 %v3550_v22, %v3548_v2  ;;  %v5938_v25 = vpack.c.bf16 %v3555_v24, %v3553_v15  ;;  %v3572_v15 = vld [vmem:[%s9244_s15 + $0x1e0] sm:$0xff]  ;;  %v3574_v24 = vld [vmem:[%s9244_s15 + $0x1f0] sm:$0xff] }
0x108d   :  { %5901 = vmatpush1.bf16.msra.mxu1 %v5900_v26  ;;  %v3552_v26 = vld [vmem:[%s9244_s15 + $0x140] sm:$0xff] }
0x108e   :  { %5903 = vmatprep.subr.bf16.mxu1 %v5902_v27  ;;  %v3554_v27 = vld [vmem:[%s9244_s15 + $0x150] sm:$0xff] }
0x108f   :  { %5877 = vmatpush1.bf16.msra.mxu0 %v5876_v29  ;;  %v3521_v29 = vld [vmem:[%s9244_s15 + $0x48] sm:$0xff] }
0x1091   :  { %5905 = vmatpush1.bf16.msra.mxu1 %v5904_v32  ;;  %v3556_v32 = vld [vmem:[%s9244_s15 + $0x160] sm:$0xff] }
0x10f1   :  { %v3291_v34 = vpop.xlane.xlu0 %3290 }
0x10f2   :  { %v3295_v35 = vmul.f32 0.004166667, %v3291_v34  ;;  %v5906_v34 = vpack.c.bf16 %v3523_v31, %v3521_v29  ;;  %v5940_v29 = vpack.c.bf16 %v3554_v27, %v3552_v26  ;;  %v5942_v31 = vpack.c.bf16 %v3559_v28, %v3557_v23 }
0x10f4   :  { %v8194_v38 = vsub.f32 %v8042_v9, %v3295_v35  ;;  %v3298_v40 = vsub.f32 %v8045_v17, %v3295_v35  ;;  %v3520_v35 = vld [vmem:[%s9244_s15 + $0x40] sm:$0xff]  ;;  %5907 = vmatprep.subr.bf16.mxu1 %v5906_v34  ;;  %v3558_v34 = vld [vmem:[%s9244_s15 + $0x170] sm:$0xff] }
0x10f5   :  { %v3294_v41 = vpop.xlane.xlu1 %3293 }
0x10f6   :  { %v8198_v44 = vmul.f32 %v8191_v37, %v3298_v40  ;;  %v3296_v42 = vmul.f32 0.004166667, %v3294_v41  ;;  %v3305_v30 = vmul.f32 %v8194_v38, %v8194_v38  ;;  %v3522_v40 = vld [vmem:[%s9244_s15 + $0x50] sm:$0xff]  ;;  %v3525_v41 = vld [vmem:[%s9244_s15 + $0x68] sm:$0xff] }
0x10f8   :  { %v8201_v45 = vsub.f32 %v8050_v20, %v3296_v42  ;;  %v3300_v53 = vsub.f32 %v8053_v21, %v3296_v42  ;;  %v3306_v7 = vmul.f32 %v8198_v44, %v8198_v44  ;;  %v3400_v21 = vld [vmem:[%s9242_s13 + $0x168] sm:$0xff]  ;;  %v3527_v42 = vld [vmem:[%s9244_s15 + $0x78] sm:$0xff] }
0x10f9   :  { %v5878_v62 = vpack.c.bf16 %v3402_v49, %v3400_v21  ;;  %v3528_v49 = vld [vmem:[%s9244_s15 + $0x80] sm:$0xff] }
0x10fa   :  { %v8209_v9 = vmul.f32 %v8191_v37, %v3300_v53  ;;  %v3309_v17 = vadd.f32 %v3306_v7, %v3305_v30  ;;  %v3307_v46 = vmul.f32 %v8201_v45, %v8201_v45  ;;  %v5908_v53 = vpack.c.bf16 %v3522_v40, %v3520_v35  ;;  %v3524_v7 = vld [vmem:[%s9244_s15 + $0x60] sm:$0xff]  ;;  %v3561_v35 = vld [vmem:[%s9244_s15 + $0x188] sm:$0xff]  ;;  %v3563_v40 = vld [vmem:[%s9244_s15 + $0x198] sm:$0xff] }
0x10fb   :  { %5879 = vmatprep.subr.bf16.mxu0 %v5878_v62  ;;  %v5910_v30 = vpack.c.bf16 %v3527_v42, %v3525_v41  ;;  %v3530_v62 = vld [vmem:[%s9244_s15 + $0x90] sm:$0xff]  ;;  %v5944_v41 = vpack.c.bf16 %v3558_v34, %v3556_v32  ;;  %v5946_v42 = vpack.c.bf16 %v3563_v40, %v3561_v35 }
0x10fc   :  { %3310 = vadd.xlane.f32.xlu0 %v3309_v17  ;;  %v3308_v20 = vmul.f32 %v8209_v9, %v8209_v9  ;;  %5881 = vmatpush1.bf16.msra.mxu0 %v5880_v58  ;;  %v3526_v17 = vld [vmem:[%s9244_s15 + $0x70] sm:$0xff]  ;;  %v5916_v58 = vpack.c.bf16 %v3530_v62, %v3528_v49  ;;  %v3569_v49 = vld [vmem:[%s9244_s15 + $0x1c8] sm:$0xff]  ;;  %v3571_v62 = vld [vmem:[%s9244_s15 + $0x1d8] sm:$0xff] }
0x10fd   :  { %5883 = vmatprep.subr.bf16.mxu0 %v5882_v63  ;;  %5909 = vmatpush1.bf16.msra.mxu1 %v5908_v53  ;;  %v3534_v63 = vld [vmem:[%s9244_s15 + $0xb0] sm:$0xff]  ;;  %v3560_v53 = vld [vmem:[%s9244_s15 + $0x180] sm:$0xff]  ;;  %v5954_v52 = vpack.c.bf16 %v3571_v62, %v3569_v49 }
0x10fe   :  { %v3312_v48 = vadd.f32 %v3308_v20, %v3307_v46  ;;  %v3529_v46 = vld [vmem:[%s9244_s15 + $0x88] sm:$0xff]  ;;  %v3531_v20 = vld [vmem:[%s9244_s15 + $0x98] sm:$0xff]  ;;  %5911 = vmatprep.subr.bf16.mxu1 %v5910_v30  ;;  %v3562_v30 = vld [vmem:[%s9244_s15 + $0x190] sm:$0xff] }
0x10ff   :  { %v5914_v21 = vpack.c.bf16 %v3531_v20, %v3529_v46  ;;  %v5948_v46 = vpack.c.bf16 %v3562_v30, %v3560_v53 }
0x1100   :  { %3313 = vadd.xlane.f32.xlu1 %v3312_v48  ;;  %5885 = vmatpush1.bf16.msra.mxu0 %v5884_v3  ;;  %v5912_v48 = vpack.c.bf16 %v3526_v17, %v3524_v7  ;;  %v5920_v3 = vpack.c.bf16 %v3534_v63, %v3532_v60  ;;  %v3565_v7 = vld [vmem:[%s9244_s15 + $0x1a8] sm:$0xff]  ;;  %v3567_v17 = vld [vmem:[%s9244_s15 + $0x1b8] sm:$0xff] }
0x1101   :  { %5887 = vmatprep.subr.bf16.mxu0 %v5886_v8  ;;  %v3538_v8 = vld [vmem:[%s9244_s15 + $0xd0] sm:$0xff]  ;;  %v5950_v20 = vpack.c.bf16 %v3567_v17, %v3565_v7  ;;  %v3576_v7 = vld [vmem:[%s9245_s16] sm:$0x3] }
0x1102   :  { %5913 = vmatpush1.bf16.msra.mxu1 %v5912_v48  ;;  %v3564_v48 = vld [vmem:[%s9244_s15 + $0x1a0] sm:$0xff]  ;;  %v3581_v17 = vrot.slane %v3576_v7, %v6647_v57 }
0x1103   :  { %5915 = vmatprep.subr.bf16.mxu1 %v5914_v21  ;;  %v3566_v21 = vld [vmem:[%s9244_s15 + $0x1b0] sm:$0xff] }
0x1104   :  { %5889 = vmatpush1.bf16.msra.mxu0 %v5888_v10  ;;  %v5924_v10 = vpack.c.bf16 %v3538_v8, %v3536_v5  ;;  %v5952_v51 = vpack.c.bf16 %v3566_v21, %v3564_v48 }
0x1105   :  { %5891 = vmatprep.subr.bf16.mxu0 %v5890_v43  ;;  %v3542_v43 = vld [vmem:[%s9244_s15 + $0xf0] sm:$0xff] }
0x1106   :  { %5917 = vmatpush1.bf16.msra.mxu1 %v5916_v58 }
0x1107   :  { %5919 = vmatprep.subr.bf16.mxu1 %v5918_v59 }
0x1108   :  { %5893 = vmatpush1.bf16.msra.mxu0 %v5892_v47  ;;  %v5928_v47 = vpack.c.bf16 %v3542_v43, %v3540_v39 }
0x1109   :  { %5895 = vmatprep.subr.bf16.mxu0 %v5894_v19  ;;  %v3549_v19 = vld [vmem:[%s9244_s15 + $0x128] sm:$0xff] }
0x110a   :  { %5921 = vmatpush1.bf16.msra.mxu1 %v5920_v3  ;;  %v5934_v4 = vpack.c.bf16 %v3551_v56, %v3549_v19  ;;  %v3287_v3 = vld [vmem:[%s9240_s11] sm:$0x3] }
0x110b   :  { %5923 = vmatprep.subr.bf16.mxu1 %v5922_v33  ;;  %v3288_v33 = vld [vmem:[%s9241_s12] sm:$0x3]  ;;  %v3329_v5 = vrot.slane %v3287_v3, %v6647_v57  ;;  %v3333_v8 = vrot.slane %v3287_v3, %v6641_v55 }
0x110c   :  { %5897 = vmatpush1.bf16.msra.mxu0 %v5896_v61  ;;  %v5932_v61 = vpack.c.bf16 %v3546_v18, %v3544_v50  ;;  %v3348_v39 = vrot.slane %v3288_v33, %v6641_v55 }
0x110e   :  { %5925 = vmatpush1.bf16.msra.mxu1 %v5924_v10 }
0x110f   :  { %5927 = vmatprep.subr.bf16.mxu1 %v5926_v11  ;;  %v3344_v11 = vrot.slane %v3288_v33, %v6647_v57  ;;  %v3767_v33 = vld [vmem:[%s9248_s19 + $0x8] sm:$0xff] }
0x1112   :  { %5929 = vmatpush1.bf16.msra.mxu1 %v5928_v47 }
0x1113   :  { %5931 = vmatprep.subr.bf16.mxu1 %v5930_v16 }
0x1116   :  { %5933 = vmatpush1.bf16.msra.mxu1 %v5932_v61 }
0x1117   :  { %5935 = vmatprep.subr.bf16.mxu1 %v5934_v4  ;;  %v3570_v4 = vld [vmem:[%s9244_s15 + $0x1d0] sm:$0xff] }
0x111a   :  { %5937 = vmatpush1.bf16.msra.mxu1 %v5936_v13  ;;  %v5960_v13 = vpack.c.bf16 %v3574_v24, %v3572_v15 }
0x111b   :  { %5939 = vmatprep.subr.bf16.mxu1 %v5938_v25  ;;  %v3419_v25 = vld [vmem:[%s9243_s14] sm:$0x3] }
0x111c   :  { %v3424_v26 = vrot.slane %v3419_v25, %v6647_v57  ;;  %v3428_v27 = vrot.slane %v3419_v25, %v6641_v55  ;;  %v3784_v25 = vld [vmem:[%s9248_s19 + $0x90] sm:$0xff] }
0x111e   :  { %5941 = vmatpush1.bf16.msra.mxu1 %v5940_v29 }
0x111f   :  { %5943 = vmatprep.subr.bf16.mxu1 %v5942_v31 }
0x1122   :  { %5945 = vmatpush1.bf16.msra.mxu1 %v5944_v41 }
0x1123   :  { %5947 = vmatprep.subr.bf16.mxu1 %v5946_v42 }
0x1126   :  { %5949 = vmatpush1.bf16.msra.mxu1 %v5948_v46  ;;  %v3585_v46 = vrot.slane %v3576_v7, %v6641_v55 }
0x1127   :  { %5951 = vmatprep.subr.bf16.mxu1 %v5950_v20 }
0x112a   :  { %5953 = vmatpush1.bf16.msra.mxu1 %v5952_v51 }
0x112b   :  { %5955 = vmatprep.subr.bf16.mxu1 %v5954_v52 }
0x1189   :  { %v3311_v58 = vpop.xlane.xlu0 %3310 }
0x118a   :  { %v3315_v59 = vmul.f32 0.004166667, %v3311_v58 }
0x118c   :  { %v3317_v60 = vadd.f32 1e-05, %v3315_v59 }
0x118d   :  { %v3314_v63 = vpop.xlane.xlu1 %3313 }
0x118e   :  { %6234 = vrsqrt.f32 %v3317_v60  ;;  %v3316_v0 = vmul.f32 0.004166667, %v3314_v63 }
0x1190   :  { %v3318_v1 = vadd.f32 1e-05, %v3316_v0 }
0x1192   :  { %6236 = vrsqrt.f32 %v3318_v1 }
0x1198   :  { %v6235_v6 = vpop.eup %6234 }
0x1199   :  { %v3321_v36 = vmul.f32 %v6235_v6, %v8194_v38  ;;  %v3322_v10 = vmul.f32 %v6235_v6, %v8198_v44  ;;  %v3568_v44 = vld [vmem:[%s9244_s15 + $0x1c0] sm:$0xff] }
0x119a   :  { %v5956_v2 = vpack.c.bf16 %v3570_v4, %v3568_v44 }
0x119b   :  { %v3336_v43 = vmul.f32 %v3329_v5, %v3321_v36  ;;  %v3337_v12 = vmul.f32 %v3333_v8, %v3322_v10  ;;  %v3768_v36 = vld [vmem:[%s9248_s19 + $0x10] sm:$0xff]  ;;  %v3771_v10 = vld [vmem:[%s9248_s19 + $0x28] sm:$0xff] }
0x119c   :  { %v6237_v14 = vpop.eup %6236  ;;  %5957 = vmatpush1.bf16.msra.mxu1 %v5956_v2  ;;  %v3778_v2 = vld [vmem:[%s9248_s19 + $0x60] sm:$0xff] }
0x119d   :  { %v3351_v47 = vadd.f32 %v3344_v11, %v3336_v43  ;;  %v3352_v16 = vadd.f32 %v3348_v39, %v3337_v12  ;;  %v3324_v50 = vmul.f32 %v6237_v14, %v8209_v9  ;;  %v3323_v18 = vmul.f32 %v6237_v14, %v8201_v45  ;;  %v3573_v45 = vld [vmem:[%s9244_s15 + $0x1e8] sm:$0xff]  ;;  %v3575_v9 = vld [vmem:[%s9244_s15 + $0x1f8] sm:$0xff]  ;;  %v3770_v12 = vld [vmem:[%s9248_s19 + $0x20] sm:$0xff] }
0x119e   :  { %v5958_v22 = vpack.c.bf16 %v3575_v9, %v3573_v45  ;;  %v3772_v14 = vld [vmem:[%s9248_s19 + $0x30] sm:$0xff]  ;;  %v3783_v9 = vld [vmem:[%s9248_s19 + $0x88] sm:$0xff] }
0x119f   :  { %3495 = vmatprep.mubr.f32.mxu0 %v3352_v16  ;;  %v3339_v19 = vmul.f32 %v3333_v8, %v3324_v50  ;;  %v3338_v56 = vmul.f32 %v3329_v5, %v3323_v18  ;;  %v3769_v5 = vld [vmem:[%s9248_s19 + $0x18] sm:$0xff]  ;;  %v3766_v8 = vld [vmem:[%s9248_s19] sm:$0xff]  ;;  %v5968_v50 = vpack.c.bf16 %v3772_v14, %v3770_v12  ;;  %v3780_v45 = vld [vmem:[%s9248_s19 + $0x70] sm:$0xff] }
0x11a0   :  { %3496 = vmatmul.mubr.f32.vlgmr.msra.gmra.mrb[40].mxu0 %v3351_v47  ;;  %5959 = vmatprep.subr.bf16.mxu1 %v5958_v22  ;;  %v5962_v6 = vpack.c.bf16 %v3769_v5, %v3767_v33  ;;  %v3785_v22 = vld [vmem:[%s9248_s19 + $0x98] sm:$0xff]  ;;  %v5976_v15 = vpack.c.bf16 %v3780_v45, %v3778_v2  ;;  %v3794_v33 = vld [vmem:[%s9248_s19 + $0xe0] sm:$0xff]  ;;  %v3796_v5 = vld [vmem:[%s9248_s19 + $0xf0] sm:$0xff] }
0x11a1   :  { %v3354_v38 = vadd.f32 %v3348_v39, %v3339_v19  ;;  %v3353_v61 = vadd.f32 %v3344_v11, %v3338_v56  ;;  %5961 = vmatpush1.bf16.msra.mxu1 %v5960_v13  ;;  %v3773_v11 = vld [vmem:[%s9248_s19 + $0x38] sm:$0xff]  ;;  %v5964_v39 = vpack.c.bf16 %v3768_v36, %v3766_v8  ;;  %v3774_v19 = vld [vmem:[%s9248_s19 + $0x40] sm:$0xff]  ;;  %v3776_v56 = vld [vmem:[%s9248_s19 + $0x50] sm:$0xff]  ;;  %v5978_v24 = vpack.c.bf16 %v3785_v22, %v3783_v9 }
0x11a2   :  { %v5966_v43 = vpack.c.bf16 %v3773_v11, %v3771_v10  ;;  %5963 = vmatprep.subr.bf16.mxu0 %v5962_v6  ;;  %v5972_v44 = vpack.c.bf16 %v3776_v56, %v3774_v19  ;;  %v3782_v13 = vld [vmem:[%s9248_s19 + $0x80] sm:$0xff]  ;;  %v5992_v8 = vpack.c.bf16 %v3796_v5, %v3794_v33  ;;  %v3799_v6 = vld [vmem:[%s9248_s19 + $0x108] sm:$0xff]  ;;  %v3801_v36 = vld [vmem:[%s9248_s19 + $0x118] sm:$0xff] }
0x11a3   :  { %3501 = vmatprep.mubr.f32.mxu0 %v3354_v38  ;;  %5965 = vmatpush1.bf16.msra.mxu0 %v5964_v39  ;;  %v5994_v10 = vpack.c.bf16 %v3801_v36, %v3799_v6  ;;  %v3798_v11 = vld [vmem:[%s9248_s19 + $0x100] sm:$0xff]  ;;  %v3800_v39 = vld [vmem:[%s9248_s19 + $0x110] sm:$0xff]  ;;  %v3803_v12 = vld [vmem:[%s9248_s19 + $0x128] sm:$0xff] }
0x11a4   :  { %3502 = vmatmul.mubr.f32.gmra.mrb[42].mxu0 %v3353_v61  ;;  %5967 = vmatprep.subr.bf16.mxu0 %v5966_v43  ;;  %v5996_v43 = vpack.c.bf16 %v3800_v39, %v3798_v11  ;;  %v3805_v14 = vld [vmem:[%s9248_s19 + $0x138] sm:$0xff]  ;;  %v3807_v19 = vld [vmem:[%s9248_s19 + $0x148] sm:$0xff]  ;;  %v3810_v22 = vld [vmem:[%s9248_s19 + $0x160] sm:$0xff] }
0x11a5   :  { %v3809_v56 = vld [vmem:[%s9248_s19 + $0x158] sm:$0xff]  ;;  %v3811_v2 = vld [vmem:[%s9248_s19 + $0x168] sm:$0xff]  ;;  %v3942_v33 = vld [vmem:[%s9250_s21 + $0x40] sm:$0xff] }
0x11a6   :  { %v3813_v45 = vld [vmem:[%s9248_s19 + $0x178] sm:$0xff]  ;;  %v3950_v36 = vld [vmem:[%s9250_s21 + $0x80] sm:$0xff] }
0x11a7   :  { %5969 = vmatpush1.bf16.msra.mxu0 %v5968_v50  ;;  %v3804_v50 = vld [vmem:[%s9248_s19 + $0x130] sm:$0xff]  ;;  %v6006_v9 = vpack.c.bf16 %v3813_v45, %v3811_v2  ;;  %v3945_v6 = vld [vmem:[%s9250_s21 + $0x58] sm:$0xff]  ;;  %v3975_v2 = vld [vmem:[%s9250_s21 + $0x148] sm:$0xff] }
0x11a8   :  { %v3949_v11 = vld [vmem:[%s9250_s21 + $0x78] sm:$0xff]  ;;  %v6030_v39 = vpack.c.bf16 %v3950_v36, %v3945_v6  ;;  %v3980_v45 = vld [vmem:[%s9250_s21 + $0x170] sm:$0xff] }
0x1273   :  { %v3497_v23 = vpop.f32.mrb[40].mxu0 }
0x1274   :  { %v3498_v28 = vadd.f32 %v3497_v23, %v3424_v26  ;;  %v3499_v29 = vpop.f32.mrb[41].mxu0  ;;  %v5980_v23 = vpack.c.bf16 %v3784_v25, %v3782_v13  ;;  %v3815_v13 = vld [vmem:[%s9248_s19 + $0x188] sm:$0xff]  ;;  %v3817_v25 = vld [vmem:[%s9248_s19 + $0x198] sm:$0xff] }
0x1275   :  { %v3500_v31 = vadd.f32 %v3499_v29, %v3428_v27  ;;  %v3786_v29 = vld [vmem:[%s9248_s19 + $0xa0] sm:$0xff] }
0x1276   :  { %v3508_v35 = vmax.f32 %v3498_v28, 0.0 }
0x1277   :  { %v3509_v32 = vmax.f32 %v3500_v31, 0.0  ;;  %v3503_v34 = vpop.f32.mrb[42].mxu0  ;;  %v3788_v31 = vld [vmem:[%s9248_s19 + $0xb0] sm:$0xff] }
0x1278   :  { %v3504_v40 = vadd.f32 %v3503_v34, %v3424_v26  ;;  %v3505_v41 = vpop.f32.mrb[43].mxu0  ;;  %v3787_v26 = vld [vmem:[%s9248_s19 + $0xa8] sm:$0xff] }
0x1279   :  { %v3506_v42 = vadd.f32 %v3505_v41, %v3428_v27  ;;  %3652 = vmatprep.mubr.f32.mxu1 %v3509_v32  ;;  %v3789_v27 = vld [vmem:[%s9248_s19 + $0xb8] sm:$0xff]  ;;  %v5984_v32 = vpack.c.bf16 %v3788_v31, %v3786_v29 }
0x127a   :  { %3653 = vmatmul.mubr.f32.vlgmr.msra.gmra.mrb[48].mxu1 %v3508_v35  ;;  %v3510_v30 = vmax.f32 %v3504_v40, 0.0  ;;  %v5982_v28 = vpack.c.bf16 %v3789_v27, %v3787_v26  ;;  %v3814_v26 = vld [vmem:[%s9248_s19 + $0x180] sm:$0xff]  ;;  %v6010_v27 = vpack.c.bf16 %v3817_v25, %v3815_v13  ;;  %v3821_v29 = vld [vmem:[%s9248_s19 + $0x1b8] sm:$0xff] }
0x127b   :  { %v3511_v53 = vmax.f32 %v3506_v42, 0.0  ;;  %v3985_v13 = vld [vmem:[%s9250_s21 + $0x198] sm:$0xff]  ;;  %v3990_v25 = vld [vmem:[%s9250_s21 + $0x1c0] sm:$0xff] }
0x127d   :  { %3658 = vmatprep.mubr.f32.mxu1 %v3511_v53 }
0x127e   :  { %3659 = vmatmul.mubr.f32.gmra.mrb[50].mxu1 %v3510_v30 }
0x134d   :  { %v3654_v20 = vpop.f32.mrb[48].mxu1 }
0x134e   :  { %v3655_v48 = vadd.f32 %v3654_v20, %v3581_v17  ;;  %v3656_v21 = vpop.f32.mrb[49].mxu1 }
0x134f   :  { %v3657_v49 = vadd.f32 %v3656_v21, %v3585_v46 }
0x1350   :  { %v3665_v62 = vadd.f32 %v3655_v48, %v3351_v47  ;;  %v3775_v47 = vld [vmem:[%s9248_s19 + $0x48] sm:$0xff] }
0x1351   :  { %v8491_v51 = vadd.f32 %v3657_v49, %v3352_v16  ;;  %v3660_v52 = vpop.f32.mrb[50].mxu1  ;;  %v3777_v16 = vld [vmem:[%s9248_s19 + $0x58] sm:$0xff] }
0x1352   :  { %v3661_v58 = vadd.f32 %v3660_v52, %v3581_v17  ;;  %v3662_v59 = vpop.f32.mrb[51].mxu1  ;;  %v5970_v18 = vpack.c.bf16 %v3777_v16, %v3775_v47  ;;  %v3791_v52 = vld [vmem:[%s9248_s19 + $0xc8] sm:$0xff]  ;;  %v5998_v47 = vpack.c.bf16 %v3805_v14, %v3803_v12  ;;  %v3802_v16 = vld [vmem:[%s9248_s19 + $0x120] sm:$0xff]  ;;  %v3960_v14 = vld [vmem:[%s9250_s21 + $0xd0] sm:$0xff] }
0x1353   :  { %v3663_v60 = vadd.f32 %v3662_v59, %v3585_v46  ;;  %v3671_v63 = vadd.f32 %v8491_v51, %v3665_v62  ;;  %v3790_v59 = vld [vmem:[%s9248_s19 + $0xc0] sm:$0xff]  ;;  %v3955_v12 = vld [vmem:[%s9250_s21 + $0xa8] sm:$0xff] }
0x1354   :  { %v3667_v0 = vadd.f32 %v3661_v58, %v3353_v61  ;;  %v3781_v61 = vld [vmem:[%s9248_s19 + $0x78] sm:$0xff]  ;;  %5971 = vmatprep.subr.bf16.mxu0 %v5970_v18  ;;  %v6000_v18 = vpack.c.bf16 %v3804_v50, %v3802_v16  ;;  %v3954_v16 = vld [vmem:[%s9250_s21 + $0xa0] sm:$0xff]  ;;  %v3959_v50 = vld [vmem:[%s9250_s21 + $0xc8] sm:$0xff] }
0x1355   :  { %v8494_v1 = vadd.f32 %v3663_v60, %v3354_v38  ;;  %3672 = vadd.xlane.f32.xlu0 %v3671_v63  ;;  %v3779_v38 = vld [vmem:[%s9248_s19 + $0x68] sm:$0xff]  ;;  %5973 = vmatpush1.bf16.msra.mxu0 %v5972_v44  ;;  %v3793_v58 = vld [vmem:[%s9248_s19 + $0xd8] sm:$0xff]  ;;  %v3792_v60 = vld [vmem:[%s9248_s19 + $0xd0] sm:$0xff] }
0x1356   :  { %v5974_v4 = vpack.c.bf16 %v3781_v61, %v3779_v38  ;;  %v5988_v63 = vpack.c.bf16 %v3792_v60, %v3790_v59  ;;  %v6002_v38 = vpack.c.bf16 %v3809_v56, %v3807_v19  ;;  %v3806_v61 = vld [vmem:[%s9248_s19 + $0x140] sm:$0xff]  ;;  %v3808_v44 = vld [vmem:[%s9248_s19 + $0x150] sm:$0xff]  ;;  %v3935_v59 = vld [vmem:[%s9250_s21 + $0x8] sm:$0xff] }
0x1357   :  { %v3674_v3 = vadd.f32 %v8494_v1, %v3667_v0  ;;  %v3940_v60 = vld [vmem:[%s9250_s21 + $0x30] sm:$0xff]  ;;  %v3965_v19 = vld [vmem:[%s9250_s21 + $0xf8] sm:$0xff]  ;;  %v3970_v56 = vld [vmem:[%s9250_s21 + $0x120] sm:$0xff] }
0x1358   :  { %5975 = vmatprep.subr.bf16.mxu0 %v5974_v4  ;;  %v6004_v4 = vpack.c.bf16 %v3808_v44, %v3806_v61  ;;  %v6038_v61 = vpack.c.bf16 %v3970_v56, %v3965_v19  ;;  %v3969_v44 = vld [vmem:[%s9250_s21 + $0x118] sm:$0xff] }
0x1359   :  { %3675 = vadd.xlane.f32.xlu1 %v3674_v3  ;;  %5977 = vmatpush1.bf16.msra.mxu0 %v5976_v15  ;;  %v3812_v15 = vld [vmem:[%s9248_s19 + $0x170] sm:$0xff] }
0x135a   :  { %5979 = vmatprep.subr.bf16.mxu0 %v5978_v24  ;;  %v6008_v24 = vpack.c.bf16 %v3812_v15, %v3810_v22  ;;  %v6042_v22 = vpack.c.bf16 %v3980_v45, %v3975_v2  ;;  %v3979_v15 = vld [vmem:[%s9250_s21 + $0x168] sm:$0xff] }
0x135d   :  { %5981 = vmatpush1.bf16.msra.mxu0 %v5980_v23  ;;  %v3816_v23 = vld [vmem:[%s9248_s19 + $0x190] sm:$0xff] }
0x135e   :  { %5983 = vmatprep.subr.bf16.mxu0 %v5982_v28  ;;  %v3819_v28 = vld [vmem:[%s9248_s19 + $0x1a8] sm:$0xff]  ;;  %v6012_v31 = vpack.c.bf16 %v3816_v23, %v3814_v26  ;;  %v3984_v26 = vld [vmem:[%s9250_s21 + $0x190] sm:$0xff]  ;;  %v3989_v23 = vld [vmem:[%s9250_s21 + $0x1b8] sm:$0xff] }
0x1361   :  { %5985 = vmatpush1.bf16.msra.mxu0 %v5984_v32  ;;  %v6014_v32 = vpack.c.bf16 %v3821_v29, %v3819_v28  ;;  %v6048_v28 = vpack.c.bf16 %v3989_v23, %v3984_v26  ;;  %v3995_v29 = vld [vmem:[%s9250_s21 + $0x1e8] sm:$0xff] }
0x13e2   :  { %v3673_v34 = vpop.xlane.xlu0 %3672 }
0x13e3   :  { %v3677_v35 = vmul.f32 0.004166667, %v3673_v34  ;;  %v3818_v34 = vld [vmem:[%s9248_s19 + $0x1a0] sm:$0xff] }
0x13e5   :  { %v8569_v40 = vsub.f32 %v3665_v62, %v3677_v35  ;;  %v3680_v41 = vsub.f32 %v8491_v51, %v3677_v35  ;;  %v3820_v35 = vld [vmem:[%s9248_s19 + $0x1b0] sm:$0xff] }
0x13e6   :  { %v3676_v42 = vpop.xlane.xlu1 %3675 }
0x13e7   :  { %v8573_v53 = vmul.f32 %v8191_v37, %v3680_v41  ;;  %v3678_v30 = vmul.f32 0.004166667, %v3676_v42  ;;  %v3687_v46 = vmul.f32 %v8569_v40, %v8569_v40  ;;  %v3823_v41 = vld [vmem:[%s9248_s19 + $0x1c8] sm:$0xff]  ;;  %v3825_v42 = vld [vmem:[%s9248_s19 + $0x1d8] sm:$0xff] }
0x13e9   :  { %v8575_v7 = vsub.f32 %v3667_v0, %v3678_v30  ;;  %v3682_v17 = vsub.f32 %v8494_v1, %v3678_v30  ;;  %v3688_v20 = vmul.f32 %v8573_v53, %v8573_v53  ;;  %v3795_v0 = vld [vmem:[%s9248_s19 + $0xe8] sm:$0xff]  ;;  %v3797_v1 = vld [vmem:[%s9248_s19 + $0xf8] sm:$0xff]  ;;  %v6016_v30 = vpack.c.bf16 %v3820_v35, %v3818_v34 }
0x13ea   :  { %v5990_v3 = vpack.c.bf16 %v3797_v1, %v3795_v0  ;;  %v6026_v0 = vpack.c.bf16 %v3940_v60, %v3935_v59  ;;  %v3939_v1 = vld [vmem:[%s9250_s21 + $0x28] sm:$0xff] }
0x13eb   :  { %v8583_v48 = vmul.f32 %v8191_v37, %v3682_v17  ;;  %v3691_v21 = vadd.f32 %v3688_v20, %v3687_v46  ;;  %v3689_v49 = vmul.f32 %v8575_v7, %v8575_v7  ;;  %v5986_v37 = vpack.c.bf16 %v3793_v58, %v3791_v52  ;;  %v3822_v46 = vld [vmem:[%s9248_s19 + $0x1c0] sm:$0xff]  ;;  %v3824_v20 = vld [vmem:[%s9248_s19 + $0x1d0] sm:$0xff]  ;;  %v3999_v35 = vld [vmem:[%s9250_s21 + $0x208] sm:$0xff] }
0x13ec   :  { %v6018_v17 = vpack.c.bf16 %v3825_v42, %v3823_v41  ;;  %v3826_v52 = vld [vmem:[%s9248_s19 + $0x1e0] sm:$0xff]  ;;  %v3828_v58 = vld [vmem:[%s9248_s19 + $0x1f0] sm:$0xff]  ;;  %6027 = vmatprep.subr.bf16.mxu1 %v6026_v0  ;;  %v4005_v42 = vld [vmem:[%s9250_s21 + $0x238] sm:$0xff] }
0x13ed   :  { %3692 = vadd.xlane.f32.xlu0 %v3691_v21  ;;  %v3690_v62 = vmul.f32 %v8583_v48, %v8583_v48  ;;  %5987 = vmatprep.subr.bf16.mxu0 %v5986_v37  ;;  %v3827_v21 = vld [vmem:[%s9248_s19 + $0x1e8] sm:$0xff]  ;;  %v6024_v37 = vpack.c.bf16 %v3828_v58, %v3826_v52 }
0x13ee   :  { %5989 = vmatpush1.bf16.msra.mxu0 %v5988_v63  ;;  %v3934_v63 = vld [vmem:[%s9250_s21] sm:$0xff]  ;;  %v4019_v58 = vld [vmem:[%s9250_s21 + $0x2a8] sm:$0xff] }
0x13ef   :  { %v3694_v51 = vadd.f32 %v3690_v62, %v3689_v49  ;;  %5991 = vmatprep.subr.bf16.mxu0 %v5990_v3  ;;  %v3829_v49 = vld [vmem:[%s9248_s19 + $0x1f8] sm:$0xff]  ;;  %v6020_v62 = vpack.c.bf16 %v3824_v20, %v3822_v46  ;;  %v6028_v5 = vpack.c.bf16 %v3939_v1, %v3934_v63 }
0x13f0   :  { %v3937_v3 = vld [vmem:[%s9250_s21 + $0x18] sm:$0xff] }
0x13f1   :  { %3695 = vadd.xlane.f32.xlu1 %v3694_v51  ;;  %v6022_v51 = vpack.c.bf16 %v3829_v49, %v3827_v21  ;;  %6029 = vmatpush1.bf16.msra.mxu1 %v6028_v5  ;;  %v4009_v20 = vld [vmem:[%s9250_s21 + $0x258] sm:$0xff]  ;;  %v4015_v49 = vld [vmem:[%s9250_s21 + $0x288] sm:$0xff]  ;;  %v3670_v5 = vld [vmem:[%s9247_s18] sm:$0x3] }
0x13f2   :  { %5993 = vmatpush1.bf16.msra.mxu0 %v5992_v8  ;;  %v6090_v8 = vpack.c.bf16 %v3942_v33, %v3937_v3  ;;  %6031 = vmatprep.subr.bf16.mxu1 %v6030_v39  ;;  %v3669_v33 = vld [vmem:[%s9246_s17] sm:$0x3] }
0x13f3   :  { %5995 = vmatprep.subr.bf16.mxu0 %v5994_v10  ;;  %v3944_v10 = vld [vmem:[%s9250_s21 + $0x50] sm:$0xff]  ;;  %v3715_v6 = vrot.slane %v3669_v33, %v6641_v55 }
0x13f6   :  { %5997 = vmatpush1.bf16.msra.mxu0 %v5996_v43  ;;  %v6032_v43 = vpack.c.bf16 %v3949_v11, %v3944_v10  ;;  %v3726_v10 = vrot.slane %v3670_v5, %v6647_v57 }
0x13f7   :  { %5999 = vmatprep.subr.bf16.mxu0 %v5998_v47  ;;  %v6034_v47 = vpack.c.bf16 %v3960_v14, %v3955_v12 }
0x13f8   :  { %6033 = vmatpush1.bf16.msra.mxu1 %v6032_v43  ;;  %v3730_v43 = vrot.slane %v3670_v5, %v6641_v55  ;;  %v3956_v5 = vld [vmem:[%s9250_s21 + $0xb0] sm:$0xff] }
0x13f9   :  { %6035 = vmatprep.subr.bf16.mxu1 %v6034_v47 }
0x13fa   :  { %6001 = vmatpush1.bf16.msra.mxu0 %v6000_v18  ;;  %v6036_v18 = vpack.c.bf16 %v3959_v50, %v3954_v16 }
0x13fb   :  { %6003 = vmatprep.subr.bf16.mxu0 %v6002_v38  ;;  %v3964_v38 = vld [vmem:[%s9250_s21 + $0xf0] sm:$0xff] }
0x13fc   :  { %6037 = vmatpush1.bf16.msra.mxu1 %v6036_v18 }
0x13fd   :  { %6039 = vmatprep.subr.bf16.mxu1 %v6038_v61 }
0x13fe   :  { %6005 = vmatpush1.bf16.msra.mxu0 %v6004_v4  ;;  %v6040_v4 = vpack.c.bf16 %v3969_v44, %v3964_v38 }
0x13ff   :  { %6007 = vmatprep.subr.bf16.mxu0 %v6006_v9  ;;  %v3974_v9 = vld [vmem:[%s9250_s21 + $0x140] sm:$0xff] }
0x1400   :  { %6041 = vmatpush1.bf16.msra.mxu1 %v6040_v4 }
0x1401   :  { %6043 = vmatprep.subr.bf16.mxu1 %v6042_v22 }
0x1402   :  { %6009 = vmatpush1.bf16.msra.mxu0 %v6008_v24  ;;  %v6044_v24 = vpack.c.bf16 %v3979_v15, %v3974_v9 }
0x1403   :  { %6011 = vmatprep.subr.bf16.mxu0 %v6010_v27  ;;  %v6046_v27 = vpack.c.bf16 %v3990_v25, %v3985_v13 }
0x1404   :  { %6045 = vmatpush1.bf16.msra.mxu1 %v6044_v24 }
0x1405   :  { %6047 = vmatprep.subr.bf16.mxu1 %v6046_v27 }
0x1406   :  { %6013 = vmatpush1.bf16.msra.mxu0 %v6012_v31  ;;  %v4000_v31 = vld [vmem:[%s9250_s21 + $0x210] sm:$0xff] }
0x1407   :  { %6015 = vmatprep.subr.bf16.mxu0 %v6014_v32  ;;  %v3994_v32 = vld [vmem:[%s9250_s21 + $0x1e0] sm:$0xff]  ;;  %v6050_v34 = vpack.c.bf16 %v4000_v31, %v3995_v29 }
0x1408   :  { %6049 = vmatpush1.bf16.msra.mxu1 %v6048_v28  ;;  %v6052_v41 = vpack.c.bf16 %v3999_v35, %v3994_v32 }
0x1409   :  { %6051 = vmatprep.subr.bf16.mxu1 %v6050_v34 }
0x140a   :  { %6017 = vmatpush1.bf16.msra.mxu0 %v6016_v30  ;;  %v4010_v30 = vld [vmem:[%s9250_s21 + $0x260] sm:$0xff] }
0x140b   :  { %6019 = vmatprep.subr.bf16.mxu0 %v6018_v17  ;;  %v4004_v17 = vld [vmem:[%s9250_s21 + $0x230] sm:$0xff]  ;;  %v6054_v46 = vpack.c.bf16 %v4010_v30, %v4005_v42 }
0x140c   :  { %6053 = vmatpush1.bf16.msra.mxu1 %v6052_v41  ;;  %v6056_v21 = vpack.c.bf16 %v4009_v20, %v4004_v17  ;;  %v3936_v30 = vld [vmem:[%s9250_s21 + $0x10] sm:$0xff]  ;;  %v3941_v17 = vld [vmem:[%s9250_s21 + $0x38] sm:$0xff] }
0x140d   :  { %6055 = vmatprep.subr.bf16.mxu1 %v6054_v46  ;;  %v3947_v46 = vld [vmem:[%s9250_s21 + $0x68] sm:$0xff]  ;;  %v3952_v20 = vld [vmem:[%s9250_s21 + $0x90] sm:$0xff] }
0x140e   :  { %6021 = vmatpush1.bf16.msra.mxu0 %v6020_v62  ;;  %v4020_v62 = vld [vmem:[%s9250_s21 + $0x2b0] sm:$0xff] }
0x140f   :  { %6023 = vmatprep.subr.bf16.mxu0 %v6022_v51  ;;  %v4014_v51 = vld [vmem:[%s9250_s21 + $0x280] sm:$0xff]  ;;  %v6058_v52 = vpack.c.bf16 %v4020_v62, %v4015_v49 }
0x1410   :  { %6057 = vmatpush1.bf16.msra.mxu1 %v6056_v21 }
0x1411   :  { %6059 = vmatprep.subr.bf16.mxu1 %v6058_v52  ;;  %v6092_v52 = vpack.c.bf16 %v3941_v17, %v3936_v30  ;;  %v4029_v30 = vld [vmem:[%s9250_s21 + $0x2f8] sm:$0xff]  ;;  %v4027_v17 = vld [vmem:[%s9250_s21 + $0x2e8] sm:$0xff] }
0x1412   :  { %6025 = vmatpush1.bf16.msra.mxu0 %v6024_v37  ;;  %v6060_v37 = vpack.c.bf16 %v4019_v58, %v4014_v51 }
0x1413   :  { %6091 = vmatprep.subr.bf16.mxu0 %v6090_v8  ;;  %v3711_v8 = vrot.slane %v3669_v33, %v6647_v57 }
0x1414   :  { %6061 = vmatpush1.bf16.msra.mxu1 %v6060_v37 }
0x147a   :  { %v3693_v59 = vpop.xlane.xlu0 %3692 }
0x147b   :  { %v3697_v60 = vmul.f32 0.004166667, %v3693_v59  ;;  %v6094_v59 = vpack.c.bf16 %v3952_v20, %v3947_v46  ;;  %v4032_v20 = vld [vmem:[%s9250_s21 + $0x310] sm:$0xff] }
0x147d   :  { %v3699_v63 = vadd.f32 1e-05, %v3697_v60  ;;  %v3946_v60 = vld [vmem:[%s9250_s21 + $0x60] sm:$0xff] }
0x147e   :  { %v3696_v0 = vpop.xlane.xlu1 %3695 }
0x147f   :  { %6238 = vrsqrt.f32 %v3699_v63  ;;  %v3698_v1 = vmul.f32 0.004166667, %v3696_v0  ;;  %v3951_v63 = vld [vmem:[%s9250_s21 + $0x88] sm:$0xff]  ;;  %v3957_v0 = vld [vmem:[%s9250_s21 + $0xb8] sm:$0xff] }
0x1481   :  { %v3700_v3 = vadd.f32 1e-05, %v3698_v1  ;;  %v3962_v1 = vld [vmem:[%s9250_s21 + $0xe0] sm:$0xff] }
0x1482   :  { %v6098_v33 = vpack.c.bf16 %v3962_v1, %v3957_v0  ;;  %v4042_v1 = vld [vmem:[%s9250_s21 + $0x360] sm:$0xff] }
0x1483   :  { %6240 = vrsqrt.f32 %v3700_v3  ;;  %v6096_v3 = vpack.c.bf16 %v3951_v63, %v3946_v60  ;;  %v4039_v60 = vld [vmem:[%s9250_s21 + $0x348] sm:$0xff]  ;;  %v4037_v63 = vld [vmem:[%s9250_s21 + $0x338] sm:$0xff] }
0x1489   :  { %v6239_v36 = vpop.eup %6238 }
0x148a   :  { %v3703_v11 = vmul.f32 %v6239_v36, %v8569_v40  ;;  %v3704_v39 = vmul.f32 %v6239_v36, %v8573_v53  ;;  %v3972_v36 = vld [vmem:[%s9250_s21 + $0x130] sm:$0xff] }
0x148c   :  { %v3718_v12 = vmul.f32 %v3711_v8, %v3703_v11  ;;  %v3719_v14 = vmul.f32 %v3715_v6, %v3704_v39  ;;  %v3966_v39 = vld [vmem:[%s9250_s21 + $0x100] sm:$0xff] }
0x148d   :  { %v6241_v47 = vpop.eup %6240 }
0x148e   :  { %v3733_v16 = vadd.f32 %v3726_v10, %v3718_v12  ;;  %v3705_v50 = vmul.f32 %v6241_v47, %v8575_v7  ;;  %v3706_v18 = vmul.f32 %v6241_v47, %v8583_v48  ;;  %v3734_v19 = vadd.f32 %v3730_v43, %v3719_v14  ;;  %v3977_v12 = vld [vmem:[%s9250_s21 + $0x158] sm:$0xff]  ;;  %v3982_v14 = vld [vmem:[%s9250_s21 + $0x180] sm:$0xff] }
0x1490   :  { %v3720_v56 = vmul.f32 %v3711_v8, %v3705_v50  ;;  %v3721_v38 = vmul.f32 %v3715_v6, %v3706_v18  ;;  %v3743_v61 = vrot.slane %v3734_v19, 4  ;;  %v3737_v44 = vrot.slane %v3733_v16, 4  ;;  %v3961_v8 = vld [vmem:[%s9250_s21 + $0xd8] sm:$0xff]  ;;  %v3967_v6 = vld [vmem:[%s9250_s21 + $0x108] sm:$0xff]  ;;  %v3976_v50 = vld [vmem:[%s9250_s21 + $0x150] sm:$0xff] }
0x1491   :  { %v6102_v11 = vpack.c.bf16 %v3972_v36, %v3967_v6  ;;  %v3981_v18 = vld [vmem:[%s9250_s21 + $0x178] sm:$0xff]  ;;  %v4050_v36 = vld [vmem:[%s9250_s21 + $0x3a0] sm:$0xff] }
0x1492   :  { %v3735_v4 = vadd.f32 %v3726_v10, %v3720_v56  ;;  %v3736_v2 = vadd.f32 %v3730_v43, %v3721_v38  ;;  %v3744_v40 = vadd.f32 %v3743_v61, %v3734_v19  ;;  %v3738_v45 = vadd.f32 %v3737_v44, %v3733_v16  ;;  %v3971_v43 = vld [vmem:[%s9250_s21 + $0x128] sm:$0xff]  ;;  %v3992_v56 = vld [vmem:[%s9250_s21 + $0x1d0] sm:$0xff]  ;;  %v3986_v44 = vld [vmem:[%s9250_s21 + $0x1a0] sm:$0xff] }
0x1493   :  { %v6100_v10 = vpack.c.bf16 %v3961_v8, %v3956_v5  ;;  %v6104_v47 = vpack.c.bf16 %v3971_v43, %v3966_v39  ;;  %v6106_v16 = vpack.c.bf16 %v3982_v14, %v3977_v12  ;;  %v3987_v19 = vld [vmem:[%s9250_s21 + $0x1a8] sm:$0xff]  ;;  %v6108_v38 = vpack.c.bf16 %v3981_v18, %v3976_v50  ;;  %v4045_v6 = vld [vmem:[%s9250_s21 + $0x378] sm:$0xff]  ;;  %v4052_v14 = vld [vmem:[%s9250_s21 + $0x3b0] sm:$0xff] }
0x1494   :  { %v3745_v53 = vrot.slane %v3744_v40, 2  ;;  %v3755_v9 = vrot.slane %v3736_v2, 4  ;;  %v3739_v22 = vrot.slane %v3738_v45, 2  ;;  %v3749_v15 = vrot.slane %v3735_v4, 4  ;;  %v4049_v39 = vld [vmem:[%s9250_s21 + $0x398] sm:$0xff]  ;;  %v4047_v43 = vld [vmem:[%s9250_s21 + $0x388] sm:$0xff] }
0x1495   :  { %v6110_v61 = vpack.c.bf16 %v3992_v56, %v3987_v19  ;;  %v6130_v5 = vpack.c.bf16 %v4042_v1, %v4037_v63  ;;  %v6134_v50 = vpack.c.bf16 %v4052_v14, %v4047_v43  ;;  %v4055_v19 = vld [vmem:[%s9250_s21 + $0x3c8] sm:$0xff]  ;;  %v4060_v56 = vld [vmem:[%s9250_s21 + $0x3f0] sm:$0xff] }
0x1496   :  { %v3746_v24 = vadd.f32 %v3745_v53, %v3744_v40  ;;  %v3756_v13 = vadd.f32 %v3755_v9, %v3736_v2  ;;  %v3740_v25 = vadd.f32 %v3739_v22, %v3738_v45  ;;  %v3750_v26 = vadd.f32 %v3749_v15, %v3735_v4  ;;  %v3991_v4 = vld [vmem:[%s9250_s21 + $0x1c8] sm:$0xff]  ;;  %v3997_v2 = vld [vmem:[%s9250_s21 + $0x1f8] sm:$0xff]  ;;  %v4002_v40 = vld [vmem:[%s9250_s21 + $0x220] sm:$0xff] }
0x1497   :  { %v6112_v45 = vpack.c.bf16 %v3991_v4, %v3986_v44  ;;  %v6114_v53 = vpack.c.bf16 %v4002_v40, %v3997_v2  ;;  %v3996_v9 = vld [vmem:[%s9250_s21 + $0x1f0] sm:$0xff]  ;;  %v4001_v22 = vld [vmem:[%s9250_s21 + $0x218] sm:$0xff]  ;;  %v4007_v15 = vld [vmem:[%s9250_s21 + $0x248] sm:$0xff] }
0x1498   :  { %v3747_v7 = vrot.slane %v3746_v24, 1  ;;  %v3757_v27 = vrot.slane %v3756_v13, 2  ;;  %v3741_v48 = vrot.slane %v3740_v25, 1  ;;  %v3751_v23 = vrot.slane %v3750_v26, 2  ;;  %v4059_v44 = vld [vmem:[%s9250_s21 + $0x3e8] sm:$0xff]  ;;  %v4057_v4 = vld [vmem:[%s9250_s21 + $0x3d8] sm:$0xff] }
0x1499   :  { %v4062_v40 = vld [vmem:[%s9250_s21 + $0x400] sm:$0xff]  ;;  %v4092_v63 = vld [vmem:[%s9250_s21 + $0x4f0] sm:$0xff] }
0x149a   :  { %v3758_v28 = vadd.f32 %v3757_v27, %v3756_v13  ;;  %v3752_v29 = vadd.f32 %v3751_v23, %v3750_v26  ;;  %v3748_v31 = vadd.f32 %v3747_v7, %v3746_v24  ;;  %v3742_v34 = vadd.f32 %v3741_v48, %v3740_v25  ;;  %v4012_v24 = vld [vmem:[%s9250_s21 + $0x270] sm:$0xff]  ;;  %v4006_v26 = vld [vmem:[%s9250_s21 + $0x240] sm:$0xff]  ;;  %v4011_v7 = vld [vmem:[%s9250_s21 + $0x268] sm:$0xff] }
0x149b   :  { %v6116_v13 = vpack.c.bf16 %v4001_v22, %v3996_v9  ;;  %v6118_v25 = vpack.c.bf16 %v4012_v24, %v4007_v15  ;;  %v4017_v27 = vld [vmem:[%s9250_s21 + $0x298] sm:$0xff]  ;;  %v4022_v48 = vld [vmem:[%s9250_s21 + $0x2c0] sm:$0xff]  ;;  %v6120_v23 = vpack.c.bf16 %v4011_v7, %v4006_v26  ;;  %v6138_v9 = vpack.c.bf16 %v4062_v40, %v4057_v4  ;;  %v4067_v7 = vld [vmem:[%s9250_s21 + $0x428] sm:$0xff] }
0x149c   :  { %v3759_v32 = vrot.slane %v3758_v28, 1  ;;  %v3753_v35 = vrot.slane %v3752_v29, 1  ;;  %v3763_v21 = vmul.f32 0.125, %v3748_v31  ;;  %v3762_v62 = vmul.f32 0.125, %v3742_v34  ;;  %v4021_v31 = vld [vmem:[%s9250_s21 + $0x2b8] sm:$0xff]  ;;  %v4070_v24 = vld [vmem:[%s9250_s21 + $0x440] sm:$0xff] }
0x149d   :  { %v4025_v34 = vld [vmem:[%s9250_s21 + $0x2d8] sm:$0xff]  ;;  %v4028_v4 = vld [vmem:[%s9250_s21 + $0x2f0] sm:$0xff] }
0x149e   :  { %v3760_v41 = vadd.f32 %v3759_v32, %v3758_v28  ;;  %v3754_v42 = vadd.f32 %v3753_v35, %v3752_v29  ;;  %v6122_v28 = vpack.c.bf16 %v4022_v48, %v4017_v27  ;;  %v4016_v29 = vld [vmem:[%s9250_s21 + $0x290] sm:$0xff]  ;;  %v4030_v35 = vld [vmem:[%s9250_s21 + $0x300] sm:$0xff]  ;;  %v4065_v15 = vld [vmem:[%s9250_s21 + $0x418] sm:$0xff] }
0x149f   :  { %v6124_v32 = vpack.c.bf16 %v4021_v31, %v4016_v29  ;;  %v4069_v26 = vld [vmem:[%s9250_s21 + $0x438] sm:$0xff]  ;;  %v4072_v48 = vld [vmem:[%s9250_s21 + $0x450] sm:$0xff] }
0x14a0   :  { %v3765_v49 = vmul.f32 0.125, %v3760_v41  ;;  %v3764_v51 = vmul.f32 0.125, %v3754_v42  ;;  %v6062_v41 = vpack.c.bf16 %v4030_v35, %v4025_v34  ;;  %v4024_v42 = vld [vmem:[%s9250_s21 + $0x2d0] sm:$0xff]  ;;  %v6142_v29 = vpack.c.bf16 %v4072_v48, %v4067_v7  ;;  %v4074_v35 = vld [vmem:[%s9250_s21 + $0x460] sm:$0xff] }
0x14a1   :  { %v6064_v46 = vpack.c.bf16 %v4029_v30, %v4024_v42  ;;  %v4080_v34 = vld [vmem:[%s9250_s21 + $0x490] sm:$0xff]  ;;  %v4079_v42 = vld [vmem:[%s9250_s21 + $0x488] sm:$0xff]  ;;  %v4077_v30 = vld [vmem:[%s9250_s21 + $0x478] sm:$0xff] }
0x14a2   :  { %v3848_v58 = vsel %vm3846_vm5, %v3765_v49, %v3763_v21  ;;  %v3847_v37 = vsel %vm3846_vm5, %v3764_v51, %v3762_v62  ;;  %v4026_v21 = vld [vmem:[%s9250_s21 + $0x2e0] sm:$0xff]  ;;  %v4031_v49 = vld [vmem:[%s9250_s21 + $0x308] sm:$0xff]  ;;  %6063 = vmatprep.subr.bf16.mxu1 %v6062_v41  ;;  %v6126_v62 = vpack.c.bf16 %v4032_v20, %v4027_v17  ;;  %v4048_v48 = vld [vmem:[%s9250_s21 + $0x390] sm:$0xff] }
0x14a3   :  { %3915 = vmatprep.mubr.f32.mxu0 %v3848_v58  ;;  %v6128_v51 = vpack.c.bf16 %v4031_v49, %v4026_v21  ;;  %6065 = vmatpush1.bf16.msra.mxu1 %v6064_v46  ;;  %v4040_v58 = vld [vmem:[%s9250_s21 + $0x350] sm:$0xff]  ;;  %v4082_v17 = vld [vmem:[%s9250_s21 + $0x4a0] sm:$0xff]  ;;  %v6084_v46 = vpack.c.bf16 %v4079_v42, %v4074_v35  ;;  %v4081_v49 = vld [vmem:[%s9250_s21 + $0x498] sm:$0xff] }
0x14a4   :  { %3916 = vmatmul.mubr.f32.vlgmr.msra.gmra.mrb[44].mxu0 %v3847_v37  ;;  %v6146_v20 = vpack.c.bf16 %v4082_v17, %v4077_v30  ;;  %v4076_v21 = vld [vmem:[%s9250_s21 + $0x470] sm:$0xff]  ;;  %v3958_v7 = vld [vmem:[%s9250_s21 + $0xc0] sm:$0xff]  ;;  %v4063_v35 = vld [vmem:[%s9250_s21 + $0x408] sm:$0xff] }
0x14a5   :  { %6093 = vmatpush1.bf16.msra.mxu0 %v6092_v52  ;;  %v4035_v52 = vld [vmem:[%s9250_s21 + $0x328] sm:$0xff]  ;;  %v3978_v30 = vld [vmem:[%s9250_s21 + $0x160] sm:$0xff] }
0x14a6   :  { %6095 = vmatprep.subr.bf16.mxu0 %v6094_v59  ;;  %v6066_v37 = vpack.c.bf16 %v4040_v58, %v4035_v52  ;;  %v4034_v59 = vld [vmem:[%s9250_s21 + $0x320] sm:$0xff]  ;;  %v4084_v58 = vld [vmem:[%s9250_s21 + $0x4b0] sm:$0xff]  ;;  %v3983_v17 = vld [vmem:[%s9250_s21 + $0x188] sm:$0xff] }
0x14a7   :  { %v6068_v0 = vpack.c.bf16 %v4039_v60, %v4034_v59  ;;  %v4090_v52 = vld [vmem:[%s9250_s21 + $0x4e0] sm:$0xff]  ;;  %v4087_v60 = vld [vmem:[%s9250_s21 + $0x4c8] sm:$0xff] }
0x14a8   :  { %6067 = vmatprep.subr.bf16.mxu1 %v6066_v37  ;;  %v4089_v37 = vld [vmem:[%s9250_s21 + $0x4d8] sm:$0xff] }
0x14a9   :  { %6097 = vmatpush1.bf16.msra.mxu0 %v6096_v3  ;;  %v4036_v3 = vld [vmem:[%s9250_s21 + $0x330] sm:$0xff]  ;;  %6069 = vmatpush1.bf16.msra.mxu1 %v6068_v0  ;;  %v4086_v0 = vld [vmem:[%s9250_s21 + $0x4c0] sm:$0xff]  ;;  %v6088_v1 = vpack.c.bf16 %v4089_v37, %v4084_v58  ;;  %v4083_v58 = vld [vmem:[%s9250_s21 + $0x4a8] sm:$0xff] }
0x14aa   :  { %6099 = vmatprep.subr.bf16.mxu0 %v6098_v33  ;;  %v4041_v33 = vld [vmem:[%s9250_s21 + $0x358] sm:$0xff] }
0x14ab   :  { %v6132_v8 = vpack.c.bf16 %v4041_v33, %v4036_v3  ;;  %v6150_v3 = vpack.c.bf16 %v4092_v63, %v4087_v60  ;;  %v4091_v33 = vld [vmem:[%s9250_s21 + $0x4e8] sm:$0xff]  ;;  %v3998_v60 = vld [vmem:[%s9250_s21 + $0x200] sm:$0xff] }
0x14ac   :  { %v4003_v63 = vld [vmem:[%s9250_s21 + $0x228] sm:$0xff] }
0x14ad   :  { %6101 = vmatpush1.bf16.msra.mxu0 %v6100_v10  ;;  %v6070_v10 = vpack.c.bf16 %v4050_v36, %v4045_v6  ;;  %v4023_v6 = vld [vmem:[%s9250_s21 + $0x2c8] sm:$0xff] }
0x14ae   :  { %6103 = vmatprep.subr.bf16.mxu0 %v6102_v11  ;;  %v4044_v11 = vld [vmem:[%s9250_s21 + $0x370] sm:$0xff] }
0x14af   :  { %v6072_v12 = vpack.c.bf16 %v4049_v39, %v4044_v11  ;;  %6071 = vmatprep.subr.bf16.mxu1 %v6070_v10  ;;  %v3830_v10 = vld [vmem:[%s9249_s20] sm:$0x3] }
0x14b0   :  { %v3835_v11 = vrot.slane %v3830_v10, %v6647_v57  ;;  %v3839_v39 = vrot.slane %v3830_v10, %v6641_v55  ;;  %v4094_v10 = vld [vmem:[%s9251_s22] sm:$0x1f] }
0x14b1   :  { %6105 = vmatpush1.bf16.msra.mxu0 %v6104_v47  ;;  %v4046_v47 = vld [vmem:[%s9250_s21 + $0x380] sm:$0xff]  ;;  %6073 = vmatpush1.bf16.msra.mxu1 %v6072_v12 }
0x14b2   :  { %6107 = vmatprep.subr.bf16.mxu0 %v6106_v16  ;;  %v4051_v16 = vld [vmem:[%s9250_s21 + $0x3a8] sm:$0xff] }
0x14b3   :  { %v6136_v18 = vpack.c.bf16 %v4051_v16, %v4046_v47 }
0x14b5   :  { %6109 = vmatpush1.bf16.msra.mxu0 %v6108_v38  ;;  %v6074_v38 = vpack.c.bf16 %v4060_v56, %v4055_v19 }
0x14b6   :  { %6111 = vmatprep.subr.bf16.mxu0 %v6110_v61  ;;  %v4054_v61 = vld [vmem:[%s9250_s21 + $0x3c0] sm:$0xff] }
0x14b7   :  { %v6076_v2 = vpack.c.bf16 %v4059_v44, %v4054_v61  ;;  %6075 = vmatprep.subr.bf16.mxu1 %v6074_v38  ;;  %v3938_v61 = vld [vmem:[%s9250_s21 + $0x20] sm:$0xff]  ;;  %v3943_v44 = vld [vmem:[%s9250_s21 + $0x48] sm:$0xff] }
0x14b8   :  { %v6156_v40 = vpack.c.bf16 %v3943_v44, %v3938_v61 }
0x14b9   :  { %6113 = vmatpush1.bf16.msra.mxu0 %v6112_v45  ;;  %v4056_v45 = vld [vmem:[%s9250_s21 + $0x3d0] sm:$0xff]  ;;  %6077 = vmatpush1.bf16.msra.mxu1 %v6076_v2  ;;  %v4033_v2 = vld [vmem:[%s9250_s21 + $0x318] sm:$0xff] }
0x14ba   :  { %6115 = vmatprep.subr.bf16.mxu0 %v6114_v53  ;;  %v4061_v53 = vld [vmem:[%s9250_s21 + $0x3f8] sm:$0xff] }
0x14bb   :  { %v6140_v22 = vpack.c.bf16 %v4061_v53, %v4056_v45  ;;  %v6158_v53 = vpack.c.bf16 %v4033_v2, %v4028_v4 }
0x14bd   :  { %6117 = vmatpush1.bf16.msra.mxu0 %v6116_v13  ;;  %v6078_v13 = vpack.c.bf16 %v4070_v24, %v4065_v15  ;;  %v4038_v24 = vld [vmem:[%s9250_s21 + $0x340] sm:$0xff] }
0x14be   :  { %6119 = vmatprep.subr.bf16.mxu0 %v6118_v25  ;;  %v4064_v25 = vld [vmem:[%s9250_s21 + $0x410] sm:$0xff] }
0x14bf   :  { %v6080_v27 = vpack.c.bf16 %v4069_v26, %v4064_v25  ;;  %6079 = vmatprep.subr.bf16.mxu1 %v6078_v13  ;;  %v4043_v13 = vld [vmem:[%s9250_s21 + $0x368] sm:$0xff] }
0x14c0   :  { %v6162_v26 = vpack.c.bf16 %v4043_v13, %v4038_v24 }
0x14c1   :  { %6121 = vmatpush1.bf16.msra.mxu0 %v6120_v23  ;;  %v4066_v23 = vld [vmem:[%s9250_s21 + $0x420] sm:$0xff]  ;;  %6081 = vmatpush1.bf16.msra.mxu1 %v6080_v27  ;;  %v3963_v27 = vld [vmem:[%s9250_s21 + $0xe8] sm:$0xff] }
0x14c2   :  { %6123 = vmatprep.subr.bf16.mxu0 %v6122_v28  ;;  %v4071_v28 = vld [vmem:[%s9250_s21 + $0x448] sm:$0xff] }
0x14c3   :  { %v6144_v31 = vpack.c.bf16 %v4071_v28, %v4066_v23  ;;  %v4053_v23 = vld [vmem:[%s9250_s21 + $0x3b8] sm:$0xff]  ;;  %v6164_v28 = vpack.c.bf16 %v3963_v27, %v3958_v7 }
0x14c5   :  { %6125 = vmatpush1.bf16.msra.mxu0 %v6124_v32  ;;  %v4075_v32 = vld [vmem:[%s9250_s21 + $0x468] sm:$0xff] }
0x14c6   :  { %6127 = vmatprep.subr.bf16.mxu0 %v6126_v62  ;;  %v6082_v41 = vpack.c.bf16 %v4080_v34, %v4075_v32  ;;  %v4085_v62 = vld [vmem:[%s9250_s21 + $0x4b8] sm:$0xff]  ;;  %v4058_v34 = vld [vmem:[%s9250_s21 + $0x3e0] sm:$0xff] }
0x14c7   :  { %v6086_v59 = vpack.c.bf16 %v4090_v52, %v4085_v62  ;;  %v3973_v32 = vld [vmem:[%s9250_s21 + $0x138] sm:$0xff]  ;;  %v6170_v42 = vpack.c.bf16 %v4063_v35, %v4058_v34  ;;  %v3988_v62 = vld [vmem:[%s9250_s21 + $0x1b0] sm:$0xff]  ;;  %v4078_v52 = vld [vmem:[%s9250_s21 + $0x480] sm:$0xff] }
0x14c8   :  { %6083 = vmatprep.subr.bf16.mxu1 %v6082_v41 }
0x14c9   :  { %6129 = vmatpush1.bf16.msra.mxu0 %v6128_v51  ;;  %v6148_v51 = vpack.c.bf16 %v4081_v49, %v4076_v21  ;;  %6085 = vmatpush1.bf16.msra.mxu1 %v6084_v46  ;;  %v4068_v46 = vld [vmem:[%s9250_s21 + $0x430] sm:$0xff]  ;;  %v6172_v21 = vpack.c.bf16 %v3983_v17, %v3978_v30 }
0x14ca   :  { %6131 = vmatprep.subr.bf16.mxu0 %v6130_v5  ;;  %6087 = vmatprep.subr.bf16.mxu1 %v6086_v59  ;;  %v6152_v5 = vpack.c.bf16 %v4091_v33, %v4086_v0  ;;  %v6178_v59 = vpack.c.bf16 %v4083_v58, %v4078_v52  ;;  %v4088_v0 = vld [vmem:[%s9250_s21 + $0x4d0] sm:$0xff] }
0x14cd   :  { %6133 = vmatpush1.bf16.msra.mxu0 %v6132_v8  ;;  %6089 = vmatpush1.bf16.msra.mxu1 %v6088_v1  ;;  %v4018_v8 = vld [vmem:[%s9250_s21 + $0x2a0] sm:$0xff]  ;;  %v4093_v1 = vld [vmem:[%s9250_s21 + $0x4f8] sm:$0xff] }
0x14ce   :  { %6135 = vmatprep.subr.bf16.mxu0 %v6134_v50  ;;  %v6154_v36 = vpack.c.bf16 %v4023_v6, %v4018_v8  ;;  %v6182_v33 = vpack.c.bf16 %v4093_v1, %v4088_v0  ;;  %v4013_v8 = vld [vmem:[%s9250_s21 + $0x278] sm:$0xff] }
0x14d0   :  { %6155 = vmatprep.subr.bf16.mxu1 %v6154_v36  ;;  %v4106_v36 = vsub.s32 2, %v6638_v54 }
0x14d1   :  { %6137 = vmatpush1.bf16.msra.mxu0 %v6136_v18 }
0x14d2   :  { %6139 = vmatprep.subr.bf16.mxu0 %v6138_v9  ;;  %v3948_v9 = vld [vmem:[%s9250_s21 + $0x70] sm:$0xff] }
0x14d5   :  { %6141 = vmatpush1.bf16.msra.mxu0 %v6140_v22  ;;  %v3953_v22 = vld [vmem:[%s9250_s21 + $0x98] sm:$0xff] }
0x14d6   :  { %6143 = vmatprep.subr.bf16.mxu0 %v6142_v29  ;;  %v6160_v25 = vpack.c.bf16 %v3953_v22, %v3948_v9  ;;  %v6166_v29 = vpack.c.bf16 %v4053_v23, %v4048_v48 }
0x14d9   :  { %6145 = vmatpush1.bf16.msra.mxu0 %v6144_v31  ;;  %v3968_v31 = vld [vmem:[%s9250_s21 + $0x110] sm:$0xff] }
0x14da   :  { %6147 = vmatprep.subr.bf16.mxu0 %v6146_v20  ;;  %v6168_v41 = vpack.c.bf16 %v3973_v32, %v3968_v31  ;;  %v4073_v20 = vld [vmem:[%s9250_s21 + $0x458] sm:$0xff] }
0x14db   :  { %v6174_v49 = vpack.c.bf16 %v4073_v20, %v4068_v46 }
0x14dd   :  { %6149 = vmatpush1.bf16.msra.mxu0 %v6148_v51  ;;  %v3993_v51 = vld [vmem:[%s9250_s21 + $0x1d8] sm:$0xff] }
0x14de   :  { %6151 = vmatprep.subr.bf16.mxu0 %v6150_v3  ;;  %v6176_v37 = vpack.c.bf16 %v3993_v51, %v3988_v62  ;;  %v6180_v3 = vpack.c.bf16 %v4003_v63, %v3998_v60 }
0x14e1   :  { %6153 = vmatpush1.bf16.msra.mxu0 %v6152_v5  ;;  %v4008_v5 = vld [vmem:[%s9250_s21 + $0x250] sm:$0xff]  ;;  %s6277_s21 = smov [#allocation2]  }
0x14e2   :  { %v6184_v6 = vpack.c.bf16 %v4013_v8, %v4008_v5  ;;  %s4372_s22 = sshll.u32 %s6277_s21, 4  ;;  %s4373_s22 = int_to_ptr.vmem [resolvable:$true] %s4372_s22 }
0x14e3   :  { %s6250_s7 = scalar_lea.vmem %s4373_s22, 160  ;;  %p6255_p1 = scmp.lt.s32.totalorder %s4373_s22, %s4373_s22 }
0x14e4   :  { %p6251_p0 = scmp.ne.s32.totalorder %s4373_s22, %s6250_s7  ;;  %p6256_p2 = scmp.lt.s32.totalorder %s6250_s7, %s6250_s7 }
0x14e6   :  { %p6257_p3 = por %p6256_p2, %p6255_p1 }
0x14e8   :  { %p6258_p4 = pnand %p6257_p3, %p6251_p0 }
0x1577   :  { %v3917_v43 = vpop.f32.mrb[44].mxu0 }
0x1578   :  { %v3918_v12 = vadd.f32 %v3917_v43, %v3835_v11  ;;  %v3919_v14 = vpop.f32.mrb[45].mxu0  ;;  %v6276_v11 = vmov 1983009808   ;;  %v4110_v43 = vsub.s32 3, %v6638_v54 }
0x1579   :  { %v3920_v47 = vadd.f32 %v3919_v14, %v3839_v39  ;;  %v4341_v39 = vunpack.c.l.s4 %v6276_v11  ;;  %v4107_v14 = vrot.slane %v4094_v10, %v4106_v36 }
0x157a   :  { %v4772_v16 = vmul.f32 -1.442695, %v3918_v12  ;;  %v4099_v12 = vrot.slane %v4094_v10, %v6647_v57 }
0x157b   :  { %v4773_v50 = vmul.f32 -1.442695, %v3920_v47  ;;  %v4103_v47 = vrot.slane %v4094_v10, %v6641_v55  ;;  %v4114_v55 = vsub.s32 4, %v6638_v54 }
0x157c   :  { %6242 = vpow2.f32 %v4772_v16  ;;  %v4342_v16 = vunpack.c.0.s8 %v4341_v39 }
0x157d   :  { %6244 = vpow2.f32 %v4773_v50  ;;  %v4111_v50 = vrot.slane %v4094_v10, %v4110_v43  ;;  %v4115_v24 = vrot.slane %v4094_v10, %v4114_v55 }
0x157e   :  { %v4345_v2 = vsub.s32 %v4342_v16, %v6638_v54 }
0x1586   :  { %v6243_v18 = vpop.eup %6242 }
0x1587   :  { %v6245_v19 = vpop.eup %6244  ;;  %v3928_v56 = vadd.f32 1.0, %v6243_v18 }
0x1588   :  { %v3929_v38 = vadd.f32 1.0, %v6245_v19 }
0x158a   :  { %6246 = vrcp.f32 %v3929_v38 }
0x158b   :  { %6248 = vrcp.f32 %v3928_v56 }
0x1594   :  { %v6247_v45 = vpop.eup %6246 }
0x1595   :  { %v6249_v15 = vpop.eup %6248  ;;  %4185 = vmatprep.mubr.f32.mxu1 %v6247_v45  ;;  %4256 = vmatprep.mubr.f32.mxu0 %v6247_v45 }
0x1596   :  { %4186 = vmatmul.mubr.f32.vlgmr.msra.gmra.mrb[52].mxu1 %v6249_v15  ;;  %4257 = vmatmul.mubr.f32.vlgmr.msra.gmra.mrb[46].mxu0 %v6249_v15 }
0x1597   :  { %6157 = vmatpush3.bf16.msra.mxu1 %v6156_v40  ;;  %4327 = vmatprep.mubr.f32.mxu1 %v6247_v45 }
0x1598   :  { %6159 = vmatprep.subr.bf16.mxu1 %v6158_v53 }
0x159b   :  { %6161 = vmatpush3.bf16.msra.mxu1 %v6160_v25 }
0x159c   :  { %6163 = vmatprep.subr.bf16.mxu1 %v6162_v26 }
0x159f   :  { %6165 = vmatpush3.bf16.msra.mxu1 %v6164_v28 }
0x15a0   :  { %6167 = vmatprep.subr.bf16.mxu1 %v6166_v29 }
0x15a3   :  { %6169 = vmatpush3.bf16.msra.mxu1 %v6168_v41 }
0x15a4   :  { %6171 = vmatprep.subr.bf16.mxu1 %v6170_v42 }
0x15a7   :  { %6173 = vmatpush3.bf16.msra.mxu1 %v6172_v21 }
0x15a8   :  { %6175 = vmatprep.subr.bf16.mxu1 %v6174_v49 }
0x15ab   :  { %6177 = vmatpush3.bf16.msra.mxu1 %v6176_v37 }
0x15ac   :  { %6179 = vmatprep.subr.bf16.mxu1 %v6178_v59 }
0x15af   :  { %6181 = vmatpush3.bf16.msra.mxu1 %v6180_v3 }
0x15b0   :  { %6183 = vmatprep.subr.bf16.mxu1 %v6182_v33 }
0x15b3   :  { %6185 = vmatpush3.bf16.msra.mxu1 %v6184_v6 }
0x15b6   :  { %4328 = vmatmul.mubr.f32.vlgmr.msra.gmra.mrb[54].mxu1 %v6249_v15 }
0x1669   :  { %v4187_v18 = vpop.f32.mrb[52].mxu1  ;;  %v4258_v19 = vpop.f32.mrb[46].mxu0 }
0x166a   :  { %v4188_v56 = vadd.f32 %v4187_v18, %v4099_v12  ;;  %v4259_v38 = vadd.f32 %v4258_v19, %v4107_v14  ;;  %v4189_v61 = vpop.f32.mrb[53].mxu1  ;;  %v4260_v44 = vpop.f32.mrb[47].mxu0 }
0x166b   :  { %v4190_v4 = vadd.f32 %v4189_v61, %v4103_v47  ;;  %v4261_v40 = vadd.f32 %v4260_v44, %v4111_v50 }
0x166d   :  { %v4338_v45 = vcombine.low %v4188_v56, %v4190_v4  ;;  %v4339_v53 = vcombine.low %v4259_v38, %v4261_v40 }
0x166f   :  { %v4346_v9 = vrot.slane %v4338_v45, %v4345_v2  ;;  %v4353_v22 = vrot.slane %v4339_v53, %v4345_v2 }
0x1671   :  { %v4354_v57 = vcombine.low %v4346_v9, %v4353_v22 }
0x1673   :  { %4364 = vst [vmem:[#allocation2] sm:$0xff] %v4354_v57 }
0x1689   :  { %v5295_v15 = vpop.f32.mrb[54].mxu1 }
0x168a   :  { %v5296_v13 = vpop.f32.mrb[55].mxu1 }
0x168b   :  { %v5297_v25 = vadd.f32 %v5296_v13, %v5295_v15 }
0x168d   :  { %v4330_v26 = vadd.f32 %v5297_v25, %v4115_v24 }
0x168f   :  { %4774 = vst.sshfl [vmem:[#allocation2 + $0x8] sm:$0x3 pattern:$0x76325410] %v4330_v26 }
0x1690   :  { %6261 = shalt.err (!%p6258_p4)
}
0x1691   :  { %s6262_s19 = scalar_lea.hbm %s9252_s23, 160 }
0x1692   :  { %p6263_p5 = scmp.ne.s32.totalorder %s9252_s23, %s6262_s19  ;;  %p6266_p6 = scmp.lt.u32.totalorder %s6262_s19, %s9252_s23 }
0x1694   :  { %p6268_p7 = pnand %p6266_p6, %p6263_p5 }
0x1696   :  { %6271 = shalt.err (!%p6268_p7)
}
0x1697   :  { %4375 = dma.vmem_to_hbm [thread:$0]  %s4373_s22, 160, %s9252_s23, [#allocation3]  }
0x1698   :  { %6272 = dma.done.wait [#allocation3], 160  }
0x1699   :  { %6273 = vsyncadd [#allocation3], 4294967136 }
0x169a   :  { %4379 = vsyncpa [#allocation3], 1 }

</bundles_post_ra>
